<compile_context>
chip_gen: v6e
topology: v6e:2x2x1
jax: 0.10.0
libtpu: 0.0.40
codegen_flags: <defaults>
</compile_context>

<pallas_src>
import jax
import jax.numpy as jnp
from jax import lax
from jax.experimental import pallas as pl
from jax.experimental.pallas import tpu as pltpu

VMEM = pltpu.MemorySpace.VMEM


# ----------------------------------------------------------------------------
# Small helpers
# ----------------------------------------------------------------------------
def _bf16_dot(a, b):
    """MXU matmul with bf16 operands and f32 accumulation."""
    return jnp.dot(a.astype(jnp.bfloat16), b.astype(jnp.bfloat16),
                   preferred_element_type=jnp.float32)


def _bf16_dot_t(a, b, contract):
    """General contraction (avoids explicit .T feeding the MXU)."""
    return lax.dot_general(a.astype(jnp.bfloat16), b.astype(jnp.bfloat16),
                           dimension_numbers=(contract, ((), ())),
                           preferred_element_type=jnp.float32)


def _softmax(x, axis):
    m = jnp.max(x, axis=axis, keepdims=True)
    e = jnp.exp(x - m)
    return e * pl.reciprocal(jnp.sum(e, axis=axis, keepdims=True), approx=True)


def _row_block(m, target=256):
    """Largest friendly row-block <= target that divides m (full if small)."""
    if m <= target:
        return m
    for bm in (256, 128, 64, 32, 16, 8):
        if m % bm == 0:
            return bm
    return m


# ----------------------------------------------------------------------------
# Row-tiled fused linear kernel:  y = x @ w + b   (bf16 MXU, f32 accumulate)
# ----------------------------------------------------------------------------
def _linear_kernel(x_ref, w_ref, b_ref, o_ref):
    o_ref[...] = _bf16_dot(x_ref[...], w_ref[...]) + b_ref[...]


def linear(x2d, w, b=None):
    m, k = x2d.shape
    k2, n = w.shape
    assert k == k2
    if b is None:
        b = jnp.zeros((n,), jnp.float32)
    bm = _row_block(m)
    return pl.pallas_call(
        _linear_kernel,
        grid=(m // bm,),
        in_specs=[pl.BlockSpec((bm, k), lambda i: (i, 0)),
                  pl.BlockSpec((k, n), lambda i: (0, 0)),
                  pl.BlockSpec((1, n), lambda i: (0, 0))],
        out_specs=pl.BlockSpec((bm, n), lambda i: (i, 0)),
        out_shape=jax.ShapeDtypeStruct((m, n), jnp.float32),
        compiler_params=pltpu.CompilerParams(
            dimension_semantics=("parallel",)),
    )(x2d, w, b.reshape(1, n))


# ----------------------------------------------------------------------------
# Fused embedding kernel: projection + 2 highway layers, M-tiled over rows.
# ----------------------------------------------------------------------------
def _emb_kernel(x_ref, wp_ref, wt0_ref, bt0_ref, wg0_ref, bg0_ref,
                wt1_ref, bt1_ref, wg1_ref, bg1_ref, o_ref):
    x = _bf16_dot(x_ref[...], wp_ref[...])                      # bias-free proj
    for wt, bt, wg, bg in ((wt0_ref, bt0_ref, wg0_ref, bg0_ref),
                           (wt1_ref, bt1_ref, wg1_ref, bg1_ref)):
        t = jax.nn.relu(_bf16_dot(x, wt[...]) + bt[...])
        g = jax.nn.sigmoid(_bf16_dot(x, wg[...]) + bg[...])
        x = g * t + (1.0 - g) * x
    o_ref[...] = x


def embedding_tm(idxs, word_vectors, p, h):
    """Embedding lookup + projection + highway; returns TIME-MAJOR [L, B, h]."""
    B, L = idxs.shape
    emb = jnp.take(word_vectors, idxs.T, axis=0)                # [L, B, Dw]
    Dw = emb.shape[-1]
    m = L * B
    bm = _row_block(m)
    x = pl.pallas_call(
        _emb_kernel,
        grid=(m // bm,),
        in_specs=[pl.BlockSpec((bm, Dw), lambda i: (i, 0)),
                  pl.BlockSpec((Dw, h), lambda i: (0, 0)),
                  pl.BlockSpec((h, h), lambda i: (0, 0)),
                  pl.BlockSpec((1, h), lambda i: (0, 0)),
                  pl.BlockSpec((h, h), lambda i: (0, 0)),
                  pl.BlockSpec((1, h), lambda i: (0, 0)),
                  pl.BlockSpec((h, h), lambda i: (0, 0)),
                  pl.BlockSpec((1, h), lambda i: (0, 0)),
                  pl.BlockSpec((h, h), lambda i: (0, 0)),
                  pl.BlockSpec((1, h), lambda i: (0, 0))],
        out_specs=pl.BlockSpec((bm, h), lambda i: (i, 0)),
        out_shape=jax.ShapeDtypeStruct((m, h), jnp.float32),
        compiler_params=pltpu.CompilerParams(
            dimension_semantics=("parallel",)),
    )(emb.reshape(m, Dw),
      p["w_proj"],
      p["hwy_t_w0"], p["hwy_t_b0"].reshape(1, h),
      p["hwy_g_w0"], p["hwy_g_b0"].reshape(1, h),
      p["hwy_t_w1"], p["hwy_t_b1"].reshape(1, h),
      p["hwy_g_w1"], p["hwy_g_b1"].reshape(1, h))
    return x.reshape(L, B, h)


# ----------------------------------------------------------------------------
# Fused bidirectional LSTM recurrence (torch gate order i, f, g, o).
#   xp = x @ [W_ih_f^T | W_ih_b^T] + biases  is precomputed (big tiled matmul).
#   Both directions run in one kernel; (h, c) live in fori_loop carries.
#   Output rows are stored lane-dense as [B, 2H] (fwd || bwd).
# ----------------------------------------------------------------------------
def _bilstm_kernel(xp_ref, whh_f_ref, whh_b_ref, o_ref, hb_scr):
    L, B, _ = xp_ref.shape
    H = whh_f_ref.shape[0]
    wf = whh_f_ref[...].astype(jnp.bfloat16)          # [H, 4H]
    wb = whh_b_ref[...].astype(jnp.bfloat16)

    def cell(x_gates, h, c, w_bf):
        gates = x_gates + jnp.dot(h.astype(jnp.bfloat16), w_bf,
                                  preferred_element_type=jnp.float32)
        i = jax.nn.sigmoid(gates[:, 0 * H:1 * H])
        f = jax.nn.sigmoid(gates[:, 1 * H:2 * H])
        g = jnp.tanh(gates[:, 2 * H:3 * H])
        o = jax.nn.sigmoid(gates[:, 3 * H:4 * H])
        c_new = f * c + i * g
        h_new = o * jnp.tanh(c_new)
        return h_new, c_new

    z = jnp.zeros((B, H), jnp.float32)

    # Pass 1: backward direction (time reversed in-kernel, no glue reverse).
    def bwd_step(t, carry):
        h, c = carry
        tb = L - 1 - t
        xg = xp_ref[tb][:, 4 * H:]
        h, c = cell(xg, h, c, wb)
        hb_scr[tb] = h
        return (h, c)

    lax.fori_loop(0, L, bwd_step, (z, z))

    # Pass 2: forward direction; emit lane-dense fwd||bwd rows.
    def fwd_step(t, carry):
        h, c = carry
        xg = xp_ref[t][:, :4 * H]
        h, c = cell(xg, h, c, wf)
        o_ref[t] = jnp.concatenate([h, hb_scr[t]], axis=-1)
        return (h, c)

    lax.fori_loop(0, L, fwd_step, (z, z))


def bilstm_tm(x_tm, p, hsz):
    """Bidirectional LSTM on time-major input [L, B, D] -> [L, B, 2H]."""
    L, B, D = x_tm.shape
    w_ih = jnp.concatenate([p["w_ih_f"].T, p["w_ih_b"].T], axis=1)      # [D, 8H]
    bias = jnp.concatenate([p["b_ih_f"] + p["b_hh_f"],
                            p["b_ih_b"] + p["b_hh_b"]])                 # [8H]
    xp = linear(x_tm.reshape(L * B, D), w_ih, bias).reshape(L, B, 8 * hsz)
    return pl.pallas_call(
        _bilstm_kernel,
        out_shape=jax.ShapeDtypeStruct((L, B, 2 * hsz), jnp.float32),
        in_specs=[pl.BlockSpec(memory_space=VMEM)] * 3,
        out_specs=pl.BlockSpec(memory_space=VMEM),
        scratch_shapes=[pltpu.VMEM((L, B, hsz), jnp.float32)],
    )(xp, p["w_hh_f"].T, p["w_hh_b"].T)


# ----------------------------------------------------------------------------
# BiDAF attention kernel (per-batch program, lane-dense concat output).
# ----------------------------------------------------------------------------
def _bidaf_att_kernel(c_ref, q_ref, cmask_ref, qmask_ref,
                      cw_ref, qw_ref, cqw_ref, bias_ref, o_ref):
    c = c_ref[...]            # [Lc, 2h]
    q = q_ref[...]            # [Lq, 2h]
    cmask = cmask_ref[...]    # [Lc, 1]
    qmask = qmask_ref[...]    # [1, Lq]

    s0 = _bf16_dot(c, cw_ref[...])                            # [Lc, 1]
    s1 = _bf16_dot_t(qw_ref[...], q, ((1,), (1,)))            # [1, Lq]
    s2 = _bf16_dot_t(c * cqw_ref[...], q, ((1,), (1,)))       # [Lc, Lq]
    s = s0 + s1 + s2 + bias_ref[...]

    s1soft = _softmax(jnp.where(qmask > 0.0, s, -1e30), axis=-1)  # over q
    s2soft = _softmax(jnp.where(cmask > 0.0, s, -1e30), axis=0)   # over c

    a = _bf16_dot(s1soft, q)                                  # [Lc, 2h]
    tmp = _bf16_dot_t(s2soft, c, ((0,), (0,)))                # [Lq, 2h]  (s2ᵀ·c)
    bb = _bf16_dot(s1soft, tmp)                               # [Lc, 2h]

    # Single lane-dense store of the concat features [c, a, c*a, c*b].
    o_ref[...] = jnp.concatenate([c, a, c * a, c * bb], axis=-1)


def bidaf_attention(c, q, c_mask_f, q_mask_f, p):
    B, Lc, D2 = c.shape
    Lq = q.shape[1]
    return pl.pallas_call(
        _bidaf_att_kernel,
        grid=(B,),
        in_specs=[
            pl.BlockSpec((None, Lc, D2), lambda b: (b, 0, 0)),
            pl.BlockSpec((None, Lq, D2), lambda b: (b, 0, 0)),
            pl.BlockSpec((None, Lc, 1), lambda b: (b, 0, 0)),
            pl.BlockSpec((None, 1, Lq), lambda b: (b, 0, 0)),
            pl.BlockSpec((D2, 1), lambda b: (0, 0)),
            pl.BlockSpec((1, D2), lambda b: (0, 0)),
            pl.BlockSpec((1, D2), lambda b: (0, 0)),
            pl.BlockSpec((1, 1), lambda b: (0, 0)),
        ],
        out_specs=pl.BlockSpec((None, Lc, 4 * D2), lambda b: (b, 0, 0)),
        out_shape=jax.ShapeDtypeStruct((B, Lc, 4 * D2), jnp.float32),
        compiler_params=pltpu.CompilerParams(
            dimension_semantics=("parallel",)),
    )(c, q, c_mask_f.reshape(B, Lc, 1), q_mask_f.reshape(B, 1, Lq),
      p["c_weight"], p["q_weight"], p["cq_weight"], p["bias"])


# ----------------------------------------------------------------------------
# Self-attention kernel (R-net style gated self-matching), per-batch program.
# ----------------------------------------------------------------------------
def _self_att_kernel(x_ref, mask_ref, wq_ref, wk_ref, wgx_ref, wgc_ref, bg_ref,
                     o_ref):
    x = x_ref[...]          # [Lc, 8h]
    mask = mask_ref[...]    # [1, Lc] over keys
    q = jnp.tanh(_bf16_dot(x, wq_ref[...]))
    k = jnp.tanh(_bf16_dot(x, wk_ref[...]))
    s = _bf16_dot_t(q, k, ((1,), (1,)))                       # [Lc, Lc]
    a = _softmax(jnp.where(mask > 0.0, s, -1e30), axis=-1)
    ctx = _bf16_dot(a, x)                                     # [Lc, 8h]
    g = jax.nn.sigmoid(_bf16_dot(x, wgx_ref[...])
                       + _bf16_dot(ctx, wgc_ref[...])
                       + bg_ref[...])
    o_ref[...] = g * ctx + (1.0 - g) * x


def self_attention(x, c_mask_f, p):
    B, Lc, D8 = x.shape
    hq = p["wq"].shape[1]
    return pl.pallas_call(
        _self_att_kernel,
        grid=(B,),
        in_specs=[
            pl.BlockSpec((None, Lc, D8), lambda b: (b, 0, 0)),
            pl.BlockSpec((None, 1, Lc), lambda b: (b, 0, 0)),
            pl.BlockSpec((D8, hq), lambda b: (0, 0)),
            pl.BlockSpec((D8, hq), lambda b: (0, 0)),
            pl.BlockSpec((D8, D8), lambda b: (0, 0)),
            pl.BlockSpec((D8, D8), lambda b: (0, 0)),
            pl.BlockSpec((1, D8), lambda b: (0, 0)),
        ],
        out_specs=pl.BlockSpec((None, Lc, D8), lambda b: (b, 0, 0)),
        out_shape=jax.ShapeDtypeStruct((B, Lc, D8), jnp.float32),
        compiler_params=pltpu.CompilerParams(
            dimension_semantics=("parallel",)),
    )(x, c_mask_f.reshape(B, 1, Lc), p["wq"], p["wk"], p["wg_x"], p["wg_c"],
      p["bg"].reshape(1, D8))


# ----------------------------------------------------------------------------
# BiDAF output kernel: the two heads share one stacked matmul, lane-dense
# [2, Lc] masked log-softmax output per batch.
# ----------------------------------------------------------------------------
def _output_kernel(att_ref, mod_ref, mod2_ref, mask_ref,
                   wa_ref, wm_ref, b_ref, o_ref):
    att = att_ref[...]                                            # [Lc, 8h]
    mm = jnp.concatenate([mod_ref[...], mod2_ref[...]], axis=-1)  # [Lc, 4h]
    mask = mask_ref[...]                                          # [1, Lc]
    logits = (_bf16_dot_t(wa_ref[...], att, ((1,), (1,)))         # [2, Lc]
              + _bf16_dot_t(wm_ref[...], mm, ((1,), (1,)))
              + b_ref[...])
    lm = jnp.where(mask > 0.0, logits, -1e30)
    m = jnp.max(lm, axis=-1, keepdims=True)
    z = lm - m
    lse = jnp.log(jnp.sum(jnp.exp(z), axis=-1, keepdims=True))
    o_ref[...] = z - lse


def bidaf_output(att, mod, mod2, c_mask_f, p):
    B, Lc, D8 = att.shape
    D2 = mod.shape[-1]
    wa_t = jnp.concatenate([p["w_att1"].T, p["w_att2"].T], axis=0)   # [2, 8h]
    zero = jnp.zeros((1, D2), jnp.float32)
    wm_t = jnp.concatenate(
        [jnp.concatenate([p["w_mod1"].T, zero], axis=1),
         jnp.concatenate([zero, p["w_mod2"].T], axis=1)], axis=0)    # [2, 4h]
    b2 = jnp.concatenate([p["b1"], p["b2"]], axis=0)                 # [2, 1]
    out = pl.pallas_call(
        _output_kernel,
        grid=(B,),
        in_specs=[
            pl.BlockSpec((None, Lc, D8), lambda b: (b, 0, 0)),
            pl.BlockSpec((None, Lc, D2), lambda b: (b, 0, 0)),
            pl.BlockSpec((None, Lc, D2), lambda b: (b, 0, 0)),
            pl.BlockSpec((None, 1, Lc), lambda b: (b, 0, 0)),
            pl.BlockSpec((2, D8), lambda b: (0, 0)),
            pl.BlockSpec((2, 2 * D2), lambda b: (0, 0)),
            pl.BlockSpec((2, 1), lambda b: (0, 0)),
        ],
        out_specs=pl.BlockSpec((None, 2, Lc), lambda b: (b, 0, 0)),
        out_shape=jax.ShapeDtypeStruct((B, 2, Lc), jnp.float32),
        compiler_params=pltpu.CompilerParams(
            dimension_semantics=("parallel",)),
    )(att, mod, mod2, c_mask_f.reshape(B, 1, Lc), wa_t, wm_t, b2)
    return out[:, 0, :], out[:, 1, :]


# ----------------------------------------------------------------------------
# Model glue
# ----------------------------------------------------------------------------
def bidaf_selfatt_forward(cw_idxs, qw_idxs, params, h):
    c_mask = (cw_idxs != 0).astype(jnp.float32)
    q_mask = (qw_idxs != 0).astype(jnp.float32)

    # Embedding + highway, time-major activations for the LSTM stack.
    c_emb = embedding_tm(cw_idxs, params["word_vectors"], params["emb"], h)
    q_emb = embedding_tm(qw_idxs, params["word_vectors"], params["emb"], h)

    c_enc_tm = bilstm_tm(c_emb, params["enc"], h)            # [Lc, B, 2h]
    q_enc_tm = bilstm_tm(q_emb, params["enc"], h)            # [Lq, B, 2h]

    c_enc = c_enc_tm.transpose(1, 0, 2)                      # [B, Lc, 2h]
    q_enc = q_enc_tm.transpose(1, 0, 2)                      # [B, Lq, 2h]

    att = bidaf_attention(c_enc, q_enc, c_mask, q_mask, params["att"])  # [B,Lc,8h]
    att = self_attention(att, c_mask, params["self_att"])               # [B,Lc,8h]

    att_tm = att.transpose(1, 0, 2)                          # [Lc, B, 8h]
    m_tm = bilstm_tm(att_tm, params["mod_l0"], h)            # 2-layer modeling RNN
    m_tm = bilstm_tm(m_tm, params["mod_l1"], h)              # [Lc, B, 2h]
    mod2_tm = bilstm_tm(m_tm, params["out_rnn"], h)          # output-layer RNN

    mod = m_tm.transpose(1, 0, 2)                            # [B, Lc, 2h]
    mod2 = mod2_tm.transpose(1, 0, 2)

    log_p1, log_p2 = bidaf_output(att, mod, mod2, c_mask, params["out"])
    return log_p1, log_p2


def make_params(key, V, Dw, h):
    keys = iter(jax.random.split(key, 128))

    def p(shape, scale=0.1):
        return scale * jax.random.normal(next(keys), shape, dtype=jnp.float32)

    def lstm_params(in_dim):
        return {
            "w_ih_f": p((4 * h, in_dim)), "w_hh_f": p((4 * h, h)),
            "b_ih_f": p((4 * h,)), "b_hh_f": p((4 * h,)),
            "w_ih_b": p((4 * h, in_dim)), "w_hh_b": p((4 * h, h)),
            "b_ih_b": p((4 * h,)), "b_hh_b": p((4 * h,)),
        }

    return {
        "word_vectors": p((V, Dw), 1.0),
        "emb": {
            "w_proj": p((Dw, h)),
            "hwy_t_w0": p((h, h)), "hwy_t_b0": p((h,)),
            "hwy_g_w0": p((h, h)), "hwy_g_b0": p((h,)),
            "hwy_t_w1": p((h, h)), "hwy_t_b1": p((h,)),
            "hwy_g_w1": p((h, h)), "hwy_g_b1": p((h,)),
        },
        "enc": lstm_params(h),
        "att": {
            "c_weight": p((2 * h, 1)),
            "q_weight": p((1, 2 * h)),
            "cq_weight": p((1, 2 * h)),
            "bias": p((1, 1)),
        },
        "self_att": {
            "wq": p((8 * h, h)), "wk": p((8 * h, h)),
            "wg_x": p((8 * h, 8 * h)), "wg_c": p((8 * h, 8 * h)),
            "bg": p((8 * h,)),
        },
        "mod_l0": lstm_params(8 * h),
        "mod_l1": lstm_params(2 * h),
        "out_rnn": lstm_params(2 * h),
        "out": {
            "w_att1": p((8 * h, 1)), "w_mod1": p((2 * h, 1)), "b1": p((1, 1)),
            "w_att2": p((8 * h, 1)), "w_mod2": p((2 * h, 1)), "b2": p((1, 1)),
        },
    }


if __name__ == "__main__":
    B, Lc, Lq, V, Dw, h = 2, 16, 8, 50, 24, 16
    key = jax.random.PRNGKey(0)
    k1, k2, k3 = jax.random.split(key, 3)
    # token ids drawn from [1, V) -> all-True masks / full-length sequences
    cw_idxs = jax.random.randint(k1, (B, Lc), 1, V, dtype=jnp.int32)
    qw_idxs = jax.random.randint(k2, (B, Lq), 1, V, dtype=jnp.int32)
    params = make_params(k3, V, Dw, h)

    forward = jax.jit(bidaf_selfatt_forward, static_argnames=("h",))
    log_p1, log_p2 = forward(cw_idxs, qw_idxs, params, h=h)
    jax.block_until_ready((log_p1, log_p2))

    assert log_p1.shape == (B, Lc) and log_p2.shape == (B, Lc)
    assert bool(jnp.all(jnp.isfinite(log_p1))) and bool(jnp.all(jnp.isfinite(log_p2)))
    # log-softmax rows must sum to ~1 in prob space
    assert bool(jnp.allclose(jnp.sum(jnp.exp(log_p1), axis=-1), 1.0, atol=1e-4))
    assert bool(jnp.allclose(jnp.sum(jnp.exp(log_p2), axis=-1), 1.0, atol=1e-4))
    print("KERNEL_OK")
</pallas_src>

<mosaic_0001>
module attributes {stable_mosaic.version = 11 : i64} {
  func.func @_emb_kernel(%arg0: i32, %arg1: memref<32x24xf32, #tpu.memory_space<vmem>>, %arg2: memref<24x16xf32, #tpu.memory_space<vmem>>, %arg3: memref<16x16xf32, #tpu.memory_space<vmem>>, %arg4: memref<1x16xf32, #tpu.memory_space<vmem>>, %arg5: memref<16x16xf32, #tpu.memory_space<vmem>>, %arg6: memref<1x16xf32, #tpu.memory_space<vmem>>, %arg7: memref<16x16xf32, #tpu.memory_space<vmem>>, %arg8: memref<1x16xf32, #tpu.memory_space<vmem>>, %arg9: memref<16x16xf32, #tpu.memory_space<vmem>>, %arg10: memref<1x16xf32, #tpu.memory_space<vmem>>, %arg11: memref<32x16xf32, #tpu.memory_space<vmem>>) attributes {dimension_semantics = [#tpu.dimension_semantics<parallel>], iteration_bounds = array<i64: 1>, scalar_prefetch = 0 : i64, scratch_operands = 0 : i64, tpu.core_type = #tpu.core_type<tc>, window_params = [{transform_indices = @transform_0, window_bounds = array<i64: 32, 24>}, {pipeline_mode = #tpu.pipeline_mode<synchronous>, transform_indices = @transform_1, window_bounds = array<i64: 24, 16>}, {pipeline_mode = #tpu.pipeline_mode<synchronous>, transform_indices = @transform_2, window_bounds = array<i64: 16, 16>}, {pipeline_mode = #tpu.pipeline_mode<synchronous>, transform_indices = @transform_3, window_bounds = array<i64: 1, 16>}, {pipeline_mode = #tpu.pipeline_mode<synchronous>, transform_indices = @transform_4, window_bounds = array<i64: 16, 16>}, {pipeline_mode = #tpu.pipeline_mode<synchronous>, transform_indices = @transform_5, window_bounds = array<i64: 1, 16>}, {pipeline_mode = #tpu.pipeline_mode<synchronous>, transform_indices = @transform_6, window_bounds = array<i64: 16, 16>}, {pipeline_mode = #tpu.pipeline_mode<synchronous>, transform_indices = @transform_7, window_bounds = array<i64: 1, 16>}, {pipeline_mode = #tpu.pipeline_mode<synchronous>, transform_indices = @transform_8, window_bounds = array<i64: 16, 16>}, {pipeline_mode = #tpu.pipeline_mode<synchronous>, transform_indices = @transform_9, window_bounds = array<i64: 1, 16>}, {transform_indices = @transform_10, window_bounds = array<i64: 32, 16>}]} {
    %c0 = arith.constant 0 : index
    %c0_0 = arith.constant 0 : index
    %0 = vector.load %arg1[%c0, %c0_0] : memref<32x24xf32, #tpu.memory_space<vmem>>, vector<32x24xf32>
    %c0_1 = arith.constant 0 : index
    %c0_2 = arith.constant 0 : index
    %1 = vector.load %arg2[%c0_1, %c0_2] : memref<24x16xf32, #tpu.memory_space<vmem>>, vector<24x16xf32>
    %2 = arith.truncf %0 : vector<32x24xf32> to vector<32x24xbf16>
    %3 = arith.truncf %1 : vector<24x16xf32> to vector<24x16xbf16>
    %cst = arith.constant dense<0.000000e+00> : vector<32x16xf32>
    %4 = tpu.matmul %2, %3, %cst {dimension_numbers = #tpu.dot_dimension_numbers<[1], [0], [0], [1], [0, 0, 1, 1], [], []>} : vector<32x24xbf16>, vector<24x16xbf16>, vector<32x16xf32> -> vector<32x16xf32>
    %c0_3 = arith.constant 0 : index
    %c0_4 = arith.constant 0 : index
    %5 = vector.load %arg3[%c0_3, %c0_4] : memref<16x16xf32, #tpu.memory_space<vmem>>, vector<16x16xf32>
    %6 = arith.truncf %4 : vector<32x16xf32> to vector<32x16xbf16>
    %7 = arith.truncf %5 : vector<16x16xf32> to vector<16x16xbf16>
    %cst_5 = arith.constant dense<0.000000e+00> : vector<32x16xf32>
    %8 = tpu.matmul %6, %7, %cst_5 {dimension_numbers = #tpu.dot_dimension_numbers<[1], [0], [0], [1], [0, 0, 1, 1], [], []>} : vector<32x16xbf16>, vector<16x16xbf16>, vector<32x16xf32> -> vector<32x16xf32>
    %c0_6 = arith.constant 0 : index
    %c0_7 = arith.constant 0 : index
    %9 = vector.load %arg4[%c0_6, %c0_7] : memref<1x16xf32, #tpu.memory_space<vmem>>, vector<1x16xf32>
    %10 = vector.broadcast %9 : vector<1x16xf32> to vector<32x16xf32>
    %11 = arith.addf %8, %10 : vector<32x16xf32>
    %cst_8 = arith.constant 0.000000e+00 : f32
    %12 = vector.broadcast %cst_8 : f32 to vector<32x16xf32>
    %13 = arith.maximumf %11, %12 : vector<32x16xf32>
    %c0_9 = arith.constant 0 : index
    %c0_10 = arith.constant 0 : index
    %14 = vector.load %arg5[%c0_9, %c0_10] : memref<16x16xf32, #tpu.memory_space<vmem>>, vector<16x16xf32>
    %15 = arith.truncf %4 : vector<32x16xf32> to vector<32x16xbf16>
    %16 = arith.truncf %14 : vector<16x16xf32> to vector<16x16xbf16>
    %cst_11 = arith.constant dense<0.000000e+00> : vector<32x16xf32>
    %17 = tpu.matmul %15, %16, %cst_11 {dimension_numbers = #tpu.dot_dimension_numbers<[1], [0], [0], [1], [0, 0, 1, 1], [], []>} : vector<32x16xbf16>, vector<16x16xbf16>, vector<32x16xf32> -> vector<32x16xf32>
    %c0_12 = arith.constant 0 : index
    %c0_13 = arith.constant 0 : index
    %18 = vector.load %arg6[%c0_12, %c0_13] : memref<1x16xf32, #tpu.memory_space<vmem>>, vector<1x16xf32>
    %19 = vector.broadcast %18 : vector<1x16xf32> to vector<32x16xf32>
    %20 = arith.addf %17, %19 : vector<32x16xf32>
    %21 = arith.negf %20 : vector<32x16xf32>
    %22 = math.exp %21 : vector<32x16xf32>
    %cst_14 = arith.constant 1.000000e+00 : f32
    %23 = vector.broadcast %cst_14 : f32 to vector<32x16xf32>
    %24 = arith.addf %23, %22 : vector<32x16xf32>
    %25 = arith.divf %23, %24 : vector<32x16xf32>
    %26 = arith.mulf %25, %13 : vector<32x16xf32>
    %cst_15 = arith.constant 1.000000e+00 : f32
    %27 = vector.broadcast %cst_15 : f32 to vector<32x16xf32>
    %28 = arith.subf %27, %25 : vector<32x16xf32>
    %29 = arith.mulf %28, %4 : vector<32x16xf32>
    %30 = arith.addf %26, %29 : vector<32x16xf32>
    %c0_16 = arith.constant 0 : index
    %c0_17 = arith.constant 0 : index
    %31 = vector.load %arg7[%c0_16, %c0_17] : memref<16x16xf32, #tpu.memory_space<vmem>>, vector<16x16xf32>
    %32 = arith.truncf %30 : vector<32x16xf32> to vector<32x16xbf16>
    %33 = arith.truncf %31 : vector<16x16xf32> to vector<16x16xbf16>
    %cst_18 = arith.constant dense<0.000000e+00> : vector<32x16xf32>
    %34 = tpu.matmul %32, %33, %cst_18 {dimension_numbers = #tpu.dot_dimension_numbers<[1], [0], [0], [1], [0, 0, 1, 1], [], []>} : vector<32x16xbf16>, vector<16x16xbf16>, vector<32x16xf32> -> vector<32x16xf32>
    %c0_19 = arith.constant 0 : index
    %c0_20 = arith.constant 0 : index
    %35 = vector.load %arg8[%c0_19, %c0_20] : memref<1x16xf32, #tpu.memory_space<vmem>>, vector<1x16xf32>
    %36 = vector.broadcast %35 : vector<1x16xf32> to vector<32x16xf32>
    %37 = arith.addf %34, %36 : vector<32x16xf32>
    %cst_21 = arith.constant 0.000000e+00 : f32
    %38 = vector.broadcast %cst_21 : f32 to vector<32x16xf32>
    %39 = arith.maximumf %37, %38 : vector<32x16xf32>
    %c0_22 = arith.constant 0 : index
    %c0_23 = arith.constant 0 : index
    %40 = vector.load %arg9[%c0_22, %c0_23] : memref<16x16xf32, #tpu.memory_space<vmem>>, vector<16x16xf32>
    %41 = arith.truncf %30 : vector<32x16xf32> to vector<32x16xbf16>
    %42 = arith.truncf %40 : vector<16x16xf32> to vector<16x16xbf16>
    %cst_24 = arith.constant dense<0.000000e+00> : vector<32x16xf32>
    %43 = tpu.matmul %41, %42, %cst_24 {dimension_numbers = #tpu.dot_dimension_numbers<[1], [0], [0], [1], [0, 0, 1, 1], [], []>} : vector<32x16xbf16>, vector<16x16xbf16>, vector<32x16xf32> -> vector<32x16xf32>
    %c0_25 = arith.constant 0 : index
    %c0_26 = arith.constant 0 : index
    %44 = vector.load %arg10[%c0_25, %c0_26] : memref<1x16xf32, #tpu.memory_space<vmem>>, vector<1x16xf32>
    %45 = vector.broadcast %44 : vector<1x16xf32> to vector<32x16xf32>
    %46 = arith.addf %43, %45 : vector<32x16xf32>
    %47 = arith.negf %46 : vector<32x16xf32>
    %48 = math.exp %47 : vector<32x16xf32>
    %cst_27 = arith.constant 1.000000e+00 : f32
    %49 = vector.broadcast %cst_27 : f32 to vector<32x16xf32>
    %50 = arith.addf %49, %48 : vector<32x16xf32>
    %51 = arith.divf %49, %50 : vector<32x16xf32>
    %52 = arith.mulf %51, %39 : vector<32x16xf32>
    %cst_28 = arith.constant 1.000000e+00 : f32
    %53 = vector.broadcast %cst_28 : f32 to vector<32x16xf32>
    %54 = arith.subf %53, %51 : vector<32x16xf32>
    %55 = arith.mulf %54, %30 : vector<32x16xf32>
    %56 = arith.addf %52, %55 : vector<32x16xf32>
    %c0_29 = arith.constant 0 : index
    %c0_30 = arith.constant 0 : index
    %57 = vector.load %arg11[%c0_29, %c0_30] : memref<32x16xf32, #tpu.memory_space<vmem>>, vector<32x16xf32>
    tpu.vector_store %arg11[%c0_29, %c0_30], %56 {strides = array<i32>} : memref<32x16xf32, #tpu.memory_space<vmem>>, vector<32x16xf32>,
    return
  }
  func.func @transform_0(%arg0: i32) -> (i32, i32) {
    %c0_i32 = arith.constant 0 : i32
    %c0_i32_0 = arith.constant 0 : i32
    return %arg0, %c0_i32 : i32, i32
  }
  func.func @transform_1(%arg0: i32) -> (i32, i32) {
    %c0_i32 = arith.constant 0 : i32
    %c0_i32_0 = arith.constant 0 : i32
    %c0_i32_1 = arith.constant 0 : i32
    return %c0_i32, %c0_i32_0 : i32, i32
  }
  func.func @transform_2(%arg0: i32) -> (i32, i32) {
    %c0_i32 = arith.constant 0 : i32
    %c0_i32_0 = arith.constant 0 : i32
    %c0_i32_1 = arith.constant 0 : i32
    return %c0_i32, %c0_i32_0 : i32, i32
  }
  func.func @transform_3(%arg0: i32) -> (i32, i32) {
    %c0_i32 = arith.constant 0 : i32
    %c0_i32_0 = arith.constant 0 : i32
    %c0_i32_1 = arith.constant 0 : i32
    return %c0_i32, %c0_i32_0 : i32, i32
  }
  func.func @transform_4(%arg0: i32) -> (i32, i32) {
    %c0_i32 = arith.constant 0 : i32
    %c0_i32_0 = arith.constant 0 : i32
    %c0_i32_1 = arith.constant 0 : i32
    return %c0_i32, %c0_i32_0 : i32, i32
  }
  func.func @transform_5(%arg0: i32) -> (i32, i32) {
    %c0_i32 = arith.constant 0 : i32
    %c0_i32_0 = arith.constant 0 : i32
    %c0_i32_1 = arith.constant 0 : i32
    return %c0_i32, %c0_i32_0 : i32, i32
  }
  func.func @transform_6(%arg0: i32) -> (i32, i32) {
    %c0_i32 = arith.constant 0 : i32
    %c0_i32_0 = arith.constant 0 : i32
    %c0_i32_1 = arith.constant 0 : i32
    return %c0_i32, %c0_i32_0 : i32, i32
  }
  func.func @transform_7(%arg0: i32) -> (i32, i32) {
    %c0_i32 = arith.constant 0 : i32
    %c0_i32_0 = arith.constant 0 : i32
    %c0_i32_1 = arith.constant 0 : i32
    return %c0_i32, %c0_i32_0 : i32, i32
  }
  func.func @transform_8(%arg0: i32) -> (i32, i32) {
    %c0_i32 = arith.constant 0 : i32
    %c0_i32_0 = arith.constant 0 : i32
    %c0_i32_1 = arith.constant 0 : i32
    return %c0_i32, %c0_i32_0 : i32, i32
  }
  func.func @transform_9(%arg0: i32) -> (i32, i32) {
    %c0_i32 = arith.constant 0 : i32
    %c0_i32_0 = arith.constant 0 : i32
    %c0_i32_1 = arith.constant 0 : i32
    return %c0_i32, %c0_i32_0 : i32, i32
  }
  func.func @transform_10(%arg0: i32) -> (i32, i32) {
    %c0_i32 = arith.constant 0 : i32
    %c0_i32_0 = arith.constant 0 : i32
    return %arg0, %c0_i32 : i32, i32
  }
}

module attributes {stable_mosaic.version = 11 : i64} {
  func.func @_linear_kernel(%arg0: i32, %arg1: memref<32x16xf32, #tpu.memory_space<vmem>>, %arg2: memref<16x128xf32, #tpu.memory_space<vmem>>, %arg3: memref<1x128xf32, #tpu.memory_space<vmem>>, %arg4: memref<32x128xf32, #tpu.memory_space<vmem>>) attributes {dimension_semantics = [#tpu.dimension_semantics<parallel>], iteration_bounds = array<i64: 1>, scalar_prefetch = 0 : i64, scratch_operands = 0 : i64, tpu.core_type = #tpu.core_type<tc>, window_params = [{transform_indices = @transform_0, window_bounds = array<i64: 32, 16>}, {pipeline_mode = #tpu.pipeline_mode<synchronous>, transform_indices = @transform_1, window_bounds = array<i64: 16, 128>}, {pipeline_mode = #tpu.pipeline_mode<synchronous>, transform_indices = @transform_2, window_bounds = array<i64: 1, 128>}, {transform_indices = @transform_3, window_bounds = array<i64: 32, 128>}]} {
    %c0 = arith.constant 0 : index
    %c0_0 = arith.constant 0 : index
    %0 = vector.load %arg1[%c0, %c0_0] : memref<32x16xf32, #tpu.memory_space<vmem>>, vector<32x16xf32>
    %c0_1 = arith.constant 0 : index
    %c0_2 = arith.constant 0 : index
    %1 = vector.load %arg2[%c0_1, %c0_2] : memref<16x128xf32, #tpu.memory_space<vmem>>, vector<16x128xf32>
    %2 = arith.truncf %0 : vector<32x16xf32> to vector<32x16xbf16>
    %3 = arith.truncf %1 : vector<16x128xf32> to vector<16x128xbf16>
    %cst = arith.constant dense<0.000000e+00> : vector<32x128xf32>
    %4 = tpu.matmul %2, %3, %cst {dimension_numbers = #tpu.dot_dimension_numbers<[1], [0], [0], [1], [0, 0, 1, 1], [], []>} : vector<32x16xbf16>, vector<16x128xbf16>, vector<32x128xf32> -> vector<32x128xf32>
    %c0_3 = arith.constant 0 : index
    %c0_4 = arith.constant 0 : index
    %5 = vector.load %arg3[%c0_3, %c0_4] : memref<1x128xf32, #tpu.memory_space<vmem>>, vector<1x128xf32>
    %6 = vector.broadcast %5 : vector<1x128xf32> to vector<32x128xf32>
    %7 = arith.addf %4, %6 : vector<32x128xf32>
    %c0_5 = arith.constant 0 : index
    %c0_6 = arith.constant 0 : index
    %8 = vector.load %arg4[%c0_5, %c0_6] : memref<32x128xf32, #tpu.memory_space<vmem>>, vector<32x128xf32>
    tpu.vector_store %arg4[%c0_5, %c0_6], %7 {strides = array<i32>} : memref<32x128xf32, #tpu.memory_space<vmem>>, vector<32x128xf32>,
    return
  }
  func.func @transform_0(%arg0: i32) -> (i32, i32) {
    %c0_i32 = arith.constant 0 : i32
    %c0_i32_0 = arith.constant 0 : i32
    return %arg0, %c0_i32 : i32, i32
  }
  func.func @transform_1(%arg0: i32) -> (i32, i32) {
    %c0_i32 = arith.constant 0 : i32
    %c0_i32_0 = arith.constant 0 : i32
    %c0_i32_1 = arith.constant 0 : i32
    return %c0_i32, %c0_i32_0 : i32, i32
  }
  func.func @transform_2(%arg0: i32) -> (i32, i32) {
    %c0_i32 = arith.constant 0 : i32
    %c0_i32_0 = arith.constant 0 : i32
    %c0_i32_1 = arith.constant 0 : i32
    return %c0_i32, %c0_i32_0 : i32, i32
  }
  func.func @transform_3(%arg0: i32) -> (i32, i32) {
    %c0_i32 = arith.constant 0 : i32
    %c0_i32_0 = arith.constant 0 : i32
    return %arg0, %c0_i32 : i32, i32
  }
}

module attributes {stable_mosaic.version = 11 : i64} {
  func.func @_bilstm_kernel(%arg0: memref<16x2x128xf32, #tpu.memory_space<vmem>>, %arg1: memref<16x64xf32, #tpu.memory_space<vmem>>, %arg2: memref<16x64xf32, #tpu.memory_space<vmem>>, %arg3: memref<16x2x32xf32, #tpu.memory_space<vmem>>, %arg4: memref<16x2x16xf32, #tpu.memory_space<vmem>>) attributes {dimension_semantics = [], scalar_prefetch = 0 : i64, scratch_operands = 1 : i64, tpu.core_type = #tpu.core_type<tc>} {
    %c0 = arith.constant 0 : index
    %c0_0 = arith.constant 0 : index
    %0 = vector.load %arg1[%c0, %c0_0] : memref<16x64xf32, #tpu.memory_space<vmem>>, vector<16x64xf32>
    %1 = arith.truncf %0 : vector<16x64xf32> to vector<16x64xbf16>
    %c0_1 = arith.constant 0 : index
    %c0_2 = arith.constant 0 : index
    %2 = vector.load %arg2[%c0_1, %c0_2] : memref<16x64xf32, #tpu.memory_space<vmem>>, vector<16x64xf32>
    %3 = arith.truncf %2 : vector<16x64xf32> to vector<16x64xbf16>
    %cst = arith.constant 0.000000e+00 : f32
    %4 = vector.broadcast %cst : f32 to vector<2x16xf32>
    %c0_i32 = arith.constant 0 : i32
    %c16_i32 = arith.constant 16 : i32
    %5 = arith.addi %c0_i32, %c16_i32 : i32
    %c1_i32 = arith.constant 1 : i32
    %6:2 = scf.for %arg5 = %c0_i32 to %5 step %c1_i32 iter_args(%arg6 = %4, %arg7 = %4) -> (vector<2x16xf32>, vector<2x16xf32>)  : i32 {
      %c15_i32 = arith.constant 15 : i32
      %9 = arith.subi %c15_i32, %arg5 : i32
      %10 = arith.index_cast %9 : i32 to index
      %c0_8 = arith.constant 0 : index
      %c0_9 = arith.constant 0 : index
      %11 = vector.load %arg0[%10, %c0_8, %c0_9] : memref<16x2x128xf32, #tpu.memory_space<vmem>>, vector<1x2x128xf32>
      %12 = vector.shape_cast %11 : vector<1x2x128xf32> to vector<2x128xf32>
      %13 = vector.extract_strided_slice %12 {offsets = [0, 64], sizes = [2, 64], strides = [1, 1]} : vector<2x128xf32> to vector<2x64xf32>
      %14 = arith.truncf %arg6 : vector<2x16xf32> to vector<2x16xbf16>
      %cst_10 = arith.constant dense<0.000000e+00> : vector<2x64xf32>
      %15 = tpu.matmul %14, %3, %cst_10 {dimension_numbers = #tpu.dot_dimension_numbers<[1], [0], [0], [1], [0, 0, 1, 1], [], []>} : vector<2x16xbf16>, vector<16x64xbf16>, vector<2x64xf32> -> vector<2x64xf32>
      %16 = arith.addf %13, %15 : vector<2x64xf32>
      %17 = vector.extract_strided_slice %16 {offsets = [0, 0], sizes = [2, 16], strides = [1, 1]} : vector<2x64xf32> to vector<2x16xf32>
      %18 = arith.negf %17 : vector<2x16xf32>
      %19 = math.exp %18 : vector<2x16xf32>
      %cst_11 = arith.constant 1.000000e+00 : f32
      %20 = vector.broadcast %cst_11 : f32 to vector<2x16xf32>
      %21 = arith.addf %20, %19 : vector<2x16xf32>
      %22 = arith.divf %20, %21 : vector<2x16xf32>
      %23 = vector.extract_strided_slice %16 {offsets = [0, 16], sizes = [2, 16], strides = [1, 1]} : vector<2x64xf32> to vector<2x16xf32>
      %24 = arith.negf %23 : vector<2x16xf32>
      %25 = math.exp %24 : vector<2x16xf32>
      %cst_12 = arith.constant 1.000000e+00 : f32
      %26 = vector.broadcast %cst_12 : f32 to vector<2x16xf32>
      %27 = arith.addf %26, %25 : vector<2x16xf32>
      %28 = arith.divf %26, %27 : vector<2x16xf32>
      %29 = vector.extract_strided_slice %16 {offsets = [0, 32], sizes = [2, 16], strides = [1, 1]} : vector<2x64xf32> to vector<2x16xf32>
      %30 = math.tanh %29 : vector<2x16xf32>
      %31 = vector.extract_strided_slice %16 {offsets = [0, 48], sizes = [2, 16], strides = [1, 1]} : vector<2x64xf32> to vector<2x16xf32>
      %32 = arith.negf %31 : vector<2x16xf32>
      %33 = math.exp %32 : vector<2x16xf32>
      %cst_13 = arith.constant 1.000000e+00 : f32
      %34 = vector.broadcast %cst_13 : f32 to vector<2x16xf32>
      %35 = arith.addf %34, %33 : vector<2x16xf32>
      %36 = arith.divf %34, %35 : vector<2x16xf32>
      %37 = arith.mulf %28, %arg7 : vector<2x16xf32>
      %38 = arith.mulf %22, %30 : vector<2x16xf32>
      %39 = arith.addf %37, %38 : vector<2x16xf32>
      %40 = math.tanh %39 : vector<2x16xf32>
      %41 = arith.mulf %36, %40 : vector<2x16xf32>
      %42 = arith.index_cast %9 : i32 to index
      %c0_14 = arith.constant 0 : index
      %c0_15 = arith.constant 0 : index
      %43 = vector.load %arg4[%42, %c0_14, %c0_15] : memref<16x2x16xf32, #tpu.memory_space<vmem>>, vector<1x2x16xf32>
      %44 = vector.shape_cast %43 : vector<1x2x16xf32> to vector<2x16xf32>
      %45 = vector.shape_cast %41 : vector<2x16xf32> to vector<1x2x16xf32>
      tpu.vector_store %arg4[%42, %c0_14, %c0_15], %45 {strides = array<i32>} : memref<16x2x16xf32, #tpu.memory_space<vmem>>, vector<1x2x16xf32>,
      scf.yield %41, %39 : vector<2x16xf32>, vector<2x16xf32>
    }
    %c16_i32_3 = arith.constant 16 : i32
    %c0_i32_4 = arith.constant 0 : i32
    %c16_i32_5 = arith.constant 16 : i32
    %7 = arith.addi %c0_i32_4, %c16_i32_5 : i32
    %c1_i32_6 = arith.constant 1 : i32
    %8:2 = scf.for %arg5 = %c0_i32_4 to %7 step %c1_i32_6 iter_args(%arg6 = %4, %arg7 = %4) -> (vector<2x16xf32>, vector<2x16xf32>)  : i32 {
      %9 = arith.index_cast %arg5 : i32 to index
      %c0_8 = arith.constant 0 : index
      %c0_9 = arith.constant 0 : index
      %10 = vector.load %arg0[%9, %c0_8, %c0_9] : memref<16x2x128xf32, #tpu.memory_space<vmem>>, vector<1x2x128xf32>
      %11 = vector.shape_cast %10 : vector<1x2x128xf32> to vector<2x128xf32>
      %12 = vector.extract_strided_slice %11 {offsets = [0, 0], sizes = [2, 64], strides = [1, 1]} : vector<2x128xf32> to vector<2x64xf32>
      %13 = arith.truncf %arg6 : vector<2x16xf32> to vector<2x16xbf16>
      %cst_10 = arith.constant dense<0.000000e+00> : vector<2x64xf32>
      %14 = tpu.matmul %13, %1, %cst_10 {dimension_numbers = #tpu.dot_dimension_numbers<[1], [0], [0], [1], [0, 0, 1, 1], [], []>} : vector<2x16xbf16>, vector<16x64xbf16>, vector<2x64xf32> -> vector<2x64xf32>
      %15 = arith.addf %12, %14 : vector<2x64xf32>
      %16 = vector.extract_strided_slice %15 {offsets = [0, 0], sizes = [2, 16], strides = [1, 1]} : vector<2x64xf32> to vector<2x16xf32>
      %17 = arith.negf %16 : vector<2x16xf32>
      %18 = math.exp %17 : vector<2x16xf32>
      %cst_11 = arith.constant 1.000000e+00 : f32
      %19 = vector.broadcast %cst_11 : f32 to vector<2x16xf32>
      %20 = arith.addf %19, %18 : vector<2x16xf32>
      %21 = arith.divf %19, %20 : vector<2x16xf32>
      %22 = vector.extract_strided_slice %15 {offsets = [0, 16], sizes = [2, 16], strides = [1, 1]} : vector<2x64xf32> to vector<2x16xf32>
      %23 = arith.negf %22 : vector<2x16xf32>
      %24 = math.exp %23 : vector<2x16xf32>
      %cst_12 = arith.constant 1.000000e+00 : f32
      %25 = vector.broadcast %cst_12 : f32 to vector<2x16xf32>
      %26 = arith.addf %25, %24 : vector<2x16xf32>
      %27 = arith.divf %25, %26 : vector<2x16xf32>
      %28 = vector.extract_strided_slice %15 {offsets = [0, 32], sizes = [2, 16], strides = [1, 1]} : vector<2x64xf32> to vector<2x16xf32>
      %29 = math.tanh %28 : vector<2x16xf32>
      %30 = vector.extract_strided_slice %15 {offsets = [0, 48], sizes = [2, 16], strides = [1, 1]} : vector<2x64xf32> to vector<2x16xf32>
      %31 = arith.negf %30 : vector<2x16xf32>
      %32 = math.exp %31 : vector<2x16xf32>
      %cst_13 = arith.constant 1.000000e+00 : f32
      %33 = vector.broadcast %cst_13 : f32 to vector<2x16xf32>
      %34 = arith.addf %33, %32 : vector<2x16xf32>
      %35 = arith.divf %33, %34 : vector<2x16xf32>
      %36 = arith.mulf %27, %arg7 : vector<2x16xf32>
      %37 = arith.mulf %21, %29 : vector<2x16xf32>
      %38 = arith.addf %36, %37 : vector<2x16xf32>
      %39 = math.tanh %38 : vector<2x16xf32>
      %40 = arith.mulf %35, %39 : vector<2x16xf32>
      %41 = arith.index_cast %arg5 : i32 to index
      %c0_14 = arith.constant 0 : index
      %c0_15 = arith.constant 0 : index
      %42 = vector.load %arg4[%41, %c0_14, %c0_15] : memref<16x2x16xf32, #tpu.memory_space<vmem>>, vector<1x2x16xf32>
      %43 = vector.shape_cast %42 : vector<1x2x16xf32> to vector<2x16xf32>
      %44 = tpu.concatenate %40, %43 in 1 : vector<2x16xf32>, vector<2x16xf32> -> vector<2x32xf32>
      %45 = arith.index_cast %arg5 : i32 to index
      %c0_16 = arith.constant 0 : index
      %c0_17 = arith.constant 0 : index
      %46 = vector.load %arg3[%45, %c0_16, %c0_17] : memref<16x2x32xf32, #tpu.memory_space<vmem>>, vector<1x2x32xf32>
      %47 = vector.shape_cast %46 : vector<1x2x32xf32> to vector<2x32xf32>
      %48 = vector.shape_cast %44 : vector<2x32xf32> to vector<1x2x32xf32>
      tpu.vector_store %arg3[%45, %c0_16, %c0_17], %48 {strides = array<i32>} : memref<16x2x32xf32, #tpu.memory_space<vmem>>, vector<1x2x32xf32>,
      scf.yield %40, %38 : vector<2x16xf32>, vector<2x16xf32>
    }
    %c16_i32_7 = arith.constant 16 : i32
    return
  }
}

module attributes {stable_mosaic.version = 11 : i64} {
  func.func @_emb_kernel(%arg0: i32, %arg1: memref<16x24xf32, #tpu.memory_space<vmem>>, %arg2: memref<24x16xf32, #tpu.memory_space<vmem>>, %arg3: memref<16x16xf32, #tpu.memory_space<vmem>>, %arg4: memref<1x16xf32, #tpu.memory_space<vmem>>, %arg5: memref<16x16xf32, #tpu.memory_space<vmem>>, %arg6: memref<1x16xf32, #tpu.memory_space<vmem>>, %arg7: memref<16x16xf32, #tpu.memory_space<vmem>>, %arg8: memref<1x16xf32, #tpu.memory_space<vmem>>, %arg9: memref<16x16xf32, #tpu.memory_space<vmem>>, %arg10: memref<1x16xf32, #tpu.memory_space<vmem>>, %arg11: memref<16x16xf32, #tpu.memory_space<vmem>>) attributes {dimension_semantics = [#tpu.dimension_semantics<parallel>], iteration_bounds = array<i64: 1>, scalar_prefetch = 0 : i64, scratch_operands = 0 : i64, tpu.core_type = #tpu.core_type<tc>, window_params = [{transform_indices = @transform_0, window_bounds = array<i64: 16, 24>}, {pipeline_mode = #tpu.pipeline_mode<synchronous>, transform_indices = @transform_1, window_bounds = array<i64: 24, 16>}, {pipeline_mode = #tpu.pipeline_mode<synchronous>, transform_indices = @transform_2, window_bounds = array<i64: 16, 16>}, {pipeline_mode = #tpu.pipeline_mode<synchronous>, transform_indices = @transform_3, window_bounds = array<i64: 1, 16>}, {pipeline_mode = #tpu.pipeline_mode<synchronous>, transform_indices = @transform_4, window_bounds = array<i64: 16, 16>}, {pipeline_mode = #tpu.pipeline_mode<synchronous>, transform_indices = @transform_5, window_bounds = array<i64: 1, 16>}, {pipeline_mode = #tpu.pipeline_mode<synchronous>, transform_indices = @transform_6, window_bounds = array<i64: 16, 16>}, {pipeline_mode = #tpu.pipeline_mode<synchronous>, transform_indices = @transform_7, window_bounds = array<i64: 1, 16>}, {pipeline_mode = #tpu.pipeline_mode<synchronous>, transform_indices = @transform_8, window_bounds = array<i64: 16, 16>}, {pipeline_mode = #tpu.pipeline_mode<synchronous>, transform_indices = @transform_9, window_bounds = array<i64: 1, 16>}, {transform_indices = @transform_10, window_bounds = array<i64: 16, 16>}]} {
    %c0 = arith.constant 0 : index
    %c0_0 = arith.constant 0 : index
    %0 = vector.load %arg1[%c0, %c0_0] : memref<16x24xf32, #tpu.memory_space<vmem>>, vector<16x24xf32>
    %c0_1 = arith.constant 0 : index
    %c0_2 = arith.constant 0 : index
    %1 = vector.load %arg2[%c0_1, %c0_2] : memref<24x16xf32, #tpu.memory_space<vmem>>, vector<24x16xf32>
    %2 = arith.truncf %0 : vector<16x24xf32> to vector<16x24xbf16>
    %3 = arith.truncf %1 : vector<24x16xf32> to vector<24x16xbf16>
    %cst = arith.constant dense<0.000000e+00> : vector<16x16xf32>
    %4 = tpu.matmul %2, %3, %cst {dimension_numbers = #tpu.dot_dimension_numbers<[1], [0], [0], [1], [0, 0, 1, 1], [], []>} : vector<16x24xbf16>, vector<24x16xbf16>, vector<16x16xf32> -> vector<16x16xf32>
    %c0_3 = arith.constant 0 : index
    %c0_4 = arith.constant 0 : index
    %5 = vector.load %arg3[%c0_3, %c0_4] : memref<16x16xf32, #tpu.memory_space<vmem>>, vector<16x16xf32>
    %6 = arith.truncf %4 : vector<16x16xf32> to vector<16x16xbf16>
    %7 = arith.truncf %5 : vector<16x16xf32> to vector<16x16xbf16>
    %cst_5 = arith.constant dense<0.000000e+00> : vector<16x16xf32>
    %8 = tpu.matmul %6, %7, %cst_5 {dimension_numbers = #tpu.dot_dimension_numbers<[1], [0], [0], [1], [0, 0, 1, 1], [], []>} : vector<16x16xbf16>, vector<16x16xbf16>, vector<16x16xf32> -> vector<16x16xf32>
    %c0_6 = arith.constant 0 : index
    %c0_7 = arith.constant 0 : index
    %9 = vector.load %arg4[%c0_6, %c0_7] : memref<1x16xf32, #tpu.memory_space<vmem>>, vector<1x16xf32>
    %10 = vector.broadcast %9 : vector<1x16xf32> to vector<16x16xf32>
    %11 = arith.addf %8, %10 : vector<16x16xf32>
    %cst_8 = arith.constant 0.000000e+00 : f32
    %12 = vector.broadcast %cst_8 : f32 to vector<16x16xf32>
    %13 = arith.maximumf %11, %12 : vector<16x16xf32>
    %c0_9 = arith.constant 0 : index
    %c0_10 = arith.constant 0 : index
    %14 = vector.load %arg5[%c0_9, %c0_10] : memref<16x16xf32, #tpu.memory_space<vmem>>, vector<16x16xf32>
    %15 = arith.truncf %4 : vector<16x16xf32> to vector<16x16xbf16>
    %16 = arith.truncf %14 : vector<16x16xf32> to vector<16x16xbf16>
    %cst_11 = arith.constant dense<0.000000e+00> : vector<16x16xf32>
    %17 = tpu.matmul %15, %16, %cst_11 {dimension_numbers = #tpu.dot_dimension_numbers<[1], [0], [0], [1], [0, 0, 1, 1], [], []>} : vector<16x16xbf16>, vector<16x16xbf16>, vector<16x16xf32> -> vector<16x16xf32>
    %c0_12 = arith.constant 0 : index
    %c0_13 = arith.constant 0 : index
    %18 = vector.load %arg6[%c0_12, %c0_13] : memref<1x16xf32, #tpu.memory_space<vmem>>, vector<1x16xf32>
    %19 = vector.broadcast %18 : vector<1x16xf32> to vector<16x16xf32>
    %20 = arith.addf %17, %19 : vector<16x16xf32>
    %21 = arith.negf %20 : vector<16x16xf32>
    %22 = math.exp %21 : vector<16x16xf32>
    %cst_14 = arith.constant 1.000000e+00 : f32
    %23 = vector.broadcast %cst_14 : f32 to vector<16x16xf32>
    %24 = arith.addf %23, %22 : vector<16x16xf32>
    %25 = arith.divf %23, %24 : vector<16x16xf32>
    %26 = arith.mulf %25, %13 : vector<16x16xf32>
    %cst_15 = arith.constant 1.000000e+00 : f32
    %27 = vector.broadcast %cst_15 : f32 to vector<16x16xf32>
    %28 = arith.subf %27, %25 : vector<16x16xf32>
    %29 = arith.mulf %28, %4 : vector<16x16xf32>
    %30 = arith.addf %26, %29 : vector<16x16xf32>
    %c0_16 = arith.constant 0 : index
    %c0_17 = arith.constant 0 : index
    %31 = vector.load %arg7[%c0_16, %c0_17] : memref<16x16xf32, #tpu.memory_space<vmem>>, vector<16x16xf32>
    %32 = arith.truncf %30 : vector<16x16xf32> to vector<16x16xbf16>
    %33 = arith.truncf %31 : vector<16x16xf32> to vector<16x16xbf16>
    %cst_18 = arith.constant dense<0.000000e+00> : vector<16x16xf32>
    %34 = tpu.matmul %32, %33, %cst_18 {dimension_numbers = #tpu.dot_dimension_numbers<[1], [0], [0], [1], [0, 0, 1, 1], [], []>} : vector<16x16xbf16>, vector<16x16xbf16>, vector<16x16xf32> -> vector<16x16xf32>
    %c0_19 = arith.constant 0 : index
    %c0_20 = arith.constant 0 : index
    %35 = vector.load %arg8[%c0_19, %c0_20] : memref<1x16xf32, #tpu.memory_space<vmem>>, vector<1x16xf32>
    %36 = vector.broadcast %35 : vector<1x16xf32> to vector<16x16xf32>
    %37 = arith.addf %34, %36 : vector<16x16xf32>
    %cst_21 = arith.constant 0.000000e+00 : f32
    %38 = vector.broadcast %cst_21 : f32 to vector<16x16xf32>
    %39 = arith.maximumf %37, %38 : vector<16x16xf32>
    %c0_22 = arith.constant 0 : index
    %c0_23 = arith.constant 0 : index
    %40 = vector.load %arg9[%c0_22, %c0_23] : memref<16x16xf32, #tpu.memory_space<vmem>>, vector<16x16xf32>
    %41 = arith.truncf %30 : vector<16x16xf32> to vector<16x16xbf16>
    %42 = arith.truncf %40 : vector<16x16xf32> to vector<16x16xbf16>
    %cst_24 = arith.constant dense<0.000000e+00> : vector<16x16xf32>
    %43 = tpu.matmul %41, %42, %cst_24 {dimension_numbers = #tpu.dot_dimension_numbers<[1], [0], [0], [1], [0, 0, 1, 1], [], []>} : vector<16x16xbf16>, vector<16x16xbf16>, vector<16x16xf32> -> vector<16x16xf32>
    %c0_25 = arith.constant 0 : index
    %c0_26 = arith.constant 0 : index
    %44 = vector.load %arg10[%c0_25, %c0_26] : memref<1x16xf32, #tpu.memory_space<vmem>>, vector<1x16xf32>
    %45 = vector.broadcast %44 : vector<1x16xf32> to vector<16x16xf32>
    %46 = arith.addf %43, %45 : vector<16x16xf32>
    %47 = arith.negf %46 : vector<16x16xf32>
    %48 = math.exp %47 : vector<16x16xf32>
    %cst_27 = arith.constant 1.000000e+00 : f32
    %49 = vector.broadcast %cst_27 : f32 to vector<16x16xf32>
    %50 = arith.addf %49, %48 : vector<16x16xf32>
    %51 = arith.divf %49, %50 : vector<16x16xf32>
    %52 = arith.mulf %51, %39 : vector<16x16xf32>
    %cst_28 = arith.constant 1.000000e+00 : f32
    %53 = vector.broadcast %cst_28 : f32 to vector<16x16xf32>
    %54 = arith.subf %53, %51 : vector<16x16xf32>
    %55 = arith.mulf %54, %30 : vector<16x16xf32>
    %56 = arith.addf %52, %55 : vector<16x16xf32>
    %c0_29 = arith.constant 0 : index
    %c0_30 = arith.constant 0 : index
    %57 = vector.load %arg11[%c0_29, %c0_30] : memref<16x16xf32, #tpu.memory_space<vmem>>, vector<16x16xf32>
    tpu.vector_store %arg11[%c0_29, %c0_30], %56 {strides = array<i32>} : memref<16x16xf32, #tpu.memory_space<vmem>>, vector<16x16xf32>,
    return
  }
  func.func @transform_0(%arg0: i32) -> (i32, i32) {
    %c0_i32 = arith.constant 0 : i32
    %c0_i32_0 = arith.constant 0 : i32
    return %arg0, %c0_i32 : i32, i32
  }
  func.func @transform_1(%arg0: i32) -> (i32, i32) {
    %c0_i32 = arith.constant 0 : i32
    %c0_i32_0 = arith.constant 0 : i32
    %c0_i32_1 = arith.constant 0 : i32
    return %c0_i32, %c0_i32_0 : i32, i32
  }
  func.func @transform_2(%arg0: i32) -> (i32, i32) {
    %c0_i32 = arith.constant 0 : i32
    %c0_i32_0 = arith.constant 0 : i32
    %c0_i32_1 = arith.constant 0 : i32
    return %c0_i32, %c0_i32_0 : i32, i32
  }
  func.func @transform_3(%arg0: i32) -> (i32, i32) {
    %c0_i32 = arith.constant 0 : i32
    %c0_i32_0 = arith.constant 0 : i32
    %c0_i32_1 = arith.constant 0 : i32
    return %c0_i32, %c0_i32_0 : i32, i32
  }
  func.func @transform_4(%arg0: i32) -> (i32, i32) {
    %c0_i32 = arith.constant 0 : i32
    %c0_i32_0 = arith.constant 0 : i32
    %c0_i32_1 = arith.constant 0 : i32
    return %c0_i32, %c0_i32_0 : i32, i32
  }
  func.func @transform_5(%arg0: i32) -> (i32, i32) {
    %c0_i32 = arith.constant 0 : i32
    %c0_i32_0 = arith.constant 0 : i32
    %c0_i32_1 = arith.constant 0 : i32
    return %c0_i32, %c0_i32_0 : i32, i32
  }
  func.func @transform_6(%arg0: i32) -> (i32, i32) {
    %c0_i32 = arith.constant 0 : i32
    %c0_i32_0 = arith.constant 0 : i32
    %c0_i32_1 = arith.constant 0 : i32
    return %c0_i32, %c0_i32_0 : i32, i32
  }
  func.func @transform_7(%arg0: i32) -> (i32, i32) {
    %c0_i32 = arith.constant 0 : i32
    %c0_i32_0 = arith.constant 0 : i32
    %c0_i32_1 = arith.constant 0 : i32
    return %c0_i32, %c0_i32_0 : i32, i32
  }
  func.func @transform_8(%arg0: i32) -> (i32, i32) {
    %c0_i32 = arith.constant 0 : i32
    %c0_i32_0 = arith.constant 0 : i32
    %c0_i32_1 = arith.constant 0 : i32
    return %c0_i32, %c0_i32_0 : i32, i32
  }
  func.func @transform_9(%arg0: i32) -> (i32, i32) {
    %c0_i32 = arith.constant 0 : i32
    %c0_i32_0 = arith.constant 0 : i32
    %c0_i32_1 = arith.constant 0 : i32
    return %c0_i32, %c0_i32_0 : i32, i32
  }
  func.func @transform_10(%arg0: i32) -> (i32, i32) {
    %c0_i32 = arith.constant 0 : i32
    %c0_i32_0 = arith.constant 0 : i32
    return %arg0, %c0_i32 : i32, i32
  }
}

module attributes {stable_mosaic.version = 11 : i64} {
  func.func @_bilstm_kernel(%arg0: memref<8x2x128xf32, #tpu.memory_space<vmem>>, %arg1: memref<16x64xf32, #tpu.memory_space<vmem>>, %arg2: memref<16x64xf32, #tpu.memory_space<vmem>>, %arg3: memref<8x2x32xf32, #tpu.memory_space<vmem>>, %arg4: memref<8x2x16xf32, #tpu.memory_space<vmem>>) attributes {dimension_semantics = [], scalar_prefetch = 0 : i64, scratch_operands = 1 : i64, tpu.core_type = #tpu.core_type<tc>} {
    %c0 = arith.constant 0 : index
    %c0_0 = arith.constant 0 : index
    %0 = vector.load %arg1[%c0, %c0_0] : memref<16x64xf32, #tpu.memory_space<vmem>>, vector<16x64xf32>
    %1 = arith.truncf %0 : vector<16x64xf32> to vector<16x64xbf16>
    %c0_1 = arith.constant 0 : index
    %c0_2 = arith.constant 0 : index
    %2 = vector.load %arg2[%c0_1, %c0_2] : memref<16x64xf32, #tpu.memory_space<vmem>>, vector<16x64xf32>
    %3 = arith.truncf %2 : vector<16x64xf32> to vector<16x64xbf16>
    %cst = arith.constant 0.000000e+00 : f32
    %4 = vector.broadcast %cst : f32 to vector<2x16xf32>
    %c0_i32 = arith.constant 0 : i32
    %c8_i32 = arith.constant 8 : i32
    %5 = arith.addi %c0_i32, %c8_i32 : i32
    %c1_i32 = arith.constant 1 : i32
    %6:2 = scf.for %arg5 = %c0_i32 to %5 step %c1_i32 iter_args(%arg6 = %4, %arg7 = %4) -> (vector<2x16xf32>, vector<2x16xf32>)  : i32 {
      %c7_i32 = arith.constant 7 : i32
      %9 = arith.subi %c7_i32, %arg5 : i32
      %10 = arith.index_cast %9 : i32 to index
      %c0_8 = arith.constant 0 : index
      %c0_9 = arith.constant 0 : index
      %11 = vector.load %arg0[%10, %c0_8, %c0_9] : memref<8x2x128xf32, #tpu.memory_space<vmem>>, vector<1x2x128xf32>
      %12 = vector.shape_cast %11 : vector<1x2x128xf32> to vector<2x128xf32>
      %13 = vector.extract_strided_slice %12 {offsets = [0, 64], sizes = [2, 64], strides = [1, 1]} : vector<2x128xf32> to vector<2x64xf32>
      %14 = arith.truncf %arg6 : vector<2x16xf32> to vector<2x16xbf16>
      %cst_10 = arith.constant dense<0.000000e+00> : vector<2x64xf32>
      %15 = tpu.matmul %14, %3, %cst_10 {dimension_numbers = #tpu.dot_dimension_numbers<[1], [0], [0], [1], [0, 0, 1, 1], [], []>} : vector<2x16xbf16>, vector<16x64xbf16>, vector<2x64xf32> -> vector<2x64xf32>
      %16 = arith.addf %13, %15 : vector<2x64xf32>
      %17 = vector.extract_strided_slice %16 {offsets = [0, 0], sizes = [2, 16], strides = [1, 1]} : vector<2x64xf32> to vector<2x16xf32>
      %18 = arith.negf %17 : vector<2x16xf32>
      %19 = math.exp %18 : vector<2x16xf32>
      %cst_11 = arith.constant 1.000000e+00 : f32
      %20 = vector.broadcast %cst_11 : f32 to vector<2x16xf32>
      %21 = arith.addf %20, %19 : vector<2x16xf32>
      %22 = arith.divf %20, %21 : vector<2x16xf32>
      %23 = vector.extract_strided_slice %16 {offsets = [0, 16], sizes = [2, 16], strides = [1, 1]} : vector<2x64xf32> to vector<2x16xf32>
      %24 = arith.negf %23 : vector<2x16xf32>
      %25 = math.exp %24 : vector<2x16xf32>
      %cst_12 = arith.constant 1.000000e+00 : f32
      %26 = vector.broadcast %cst_12 : f32 to vector<2x16xf32>
      %27 = arith.addf %26, %25 : vector<2x16xf32>
      %28 = arith.divf %26, %27 : vector<2x16xf32>
      %29 = vector.extract_strided_slice %16 {offsets = [0, 32], sizes = [2, 16], strides = [1, 1]} : vector<2x64xf32> to vector<2x16xf32>
      %30 = math.tanh %29 : vector<2x16xf32>
      %31 = vector.extract_strided_slice %16 {offsets = [0, 48], sizes = [2, 16], strides = [1, 1]} : vector<2x64xf32> to vector<2x16xf32>
      %32 = arith.negf %31 : vector<2x16xf32>
      %33 = math.exp %32 : vector<2x16xf32>
      %cst_13 = arith.constant 1.000000e+00 : f32
      %34 = vector.broadcast %cst_13 : f32 to vector<2x16xf32>
      %35 = arith.addf %34, %33 : vector<2x16xf32>
      %36 = arith.divf %34, %35 : vector<2x16xf32>
      %37 = arith.mulf %28, %arg7 : vector<2x16xf32>
      %38 = arith.mulf %22, %30 : vector<2x16xf32>
      %39 = arith.addf %37, %38 : vector<2x16xf32>
      %40 = math.tanh %39 : vector<2x16xf32>
      %41 = arith.mulf %36, %40 : vector<2x16xf32>
      %42 = arith.index_cast %9 : i32 to index
      %c0_14 = arith.constant 0 : index
      %c0_15 = arith.constant 0 : index
      %43 = vector.load %arg4[%42, %c0_14, %c0_15] : memref<8x2x16xf32, #tpu.memory_space<vmem>>, vector<1x2x16xf32>
      %44 = vector.shape_cast %43 : vector<1x2x16xf32> to vector<2x16xf32>
      %45 = vector.shape_cast %41 : vector<2x16xf32> to vector<1x2x16xf32>
      tpu.vector_store %arg4[%42, %c0_14, %c0_15], %45 {strides = array<i32>} : memref<8x2x16xf32, #tpu.memory_space<vmem>>, vector<1x2x16xf32>,
      scf.yield %41, %39 : vector<2x16xf32>, vector<2x16xf32>
    }
    %c8_i32_3 = arith.constant 8 : i32
    %c0_i32_4 = arith.constant 0 : i32
    %c8_i32_5 = arith.constant 8 : i32
    %7 = arith.addi %c0_i32_4, %c8_i32_5 : i32
    %c1_i32_6 = arith.constant 1 : i32
    %8:2 = scf.for %arg5 = %c0_i32_4 to %7 step %c1_i32_6 iter_args(%arg6 = %4, %arg7 = %4) -> (vector<2x16xf32>, vector<2x16xf32>)  : i32 {
      %9 = arith.index_cast %arg5 : i32 to index
      %c0_8 = arith.constant 0 : index
      %c0_9 = arith.constant 0 : index
      %10 = vector.load %arg0[%9, %c0_8, %c0_9] : memref<8x2x128xf32, #tpu.memory_space<vmem>>, vector<1x2x128xf32>
      %11 = vector.shape_cast %10 : vector<1x2x128xf32> to vector<2x128xf32>
      %12 = vector.extract_strided_slice %11 {offsets = [0, 0], sizes = [2, 64], strides = [1, 1]} : vector<2x128xf32> to vector<2x64xf32>
      %13 = arith.truncf %arg6 : vector<2x16xf32> to vector<2x16xbf16>
      %cst_10 = arith.constant dense<0.000000e+00> : vector<2x64xf32>
      %14 = tpu.matmul %13, %1, %cst_10 {dimension_numbers = #tpu.dot_dimension_numbers<[1], [0], [0], [1], [0, 0, 1, 1], [], []>} : vector<2x16xbf16>, vector<16x64xbf16>, vector<2x64xf32> -> vector<2x64xf32>
      %15 = arith.addf %12, %14 : vector<2x64xf32>
      %16 = vector.extract_strided_slice %15 {offsets = [0, 0], sizes = [2, 16], strides = [1, 1]} : vector<2x64xf32> to vector<2x16xf32>
      %17 = arith.negf %16 : vector<2x16xf32>
      %18 = math.exp %17 : vector<2x16xf32>
      %cst_11 = arith.constant 1.000000e+00 : f32
      %19 = vector.broadcast %cst_11 : f32 to vector<2x16xf32>
      %20 = arith.addf %19, %18 : vector<2x16xf32>
      %21 = arith.divf %19, %20 : vector<2x16xf32>
      %22 = vector.extract_strided_slice %15 {offsets = [0, 16], sizes = [2, 16], strides = [1, 1]} : vector<2x64xf32> to vector<2x16xf32>
      %23 = arith.negf %22 : vector<2x16xf32>
      %24 = math.exp %23 : vector<2x16xf32>
      %cst_12 = arith.constant 1.000000e+00 : f32
      %25 = vector.broadcast %cst_12 : f32 to vector<2x16xf32>
      %26 = arith.addf %25, %24 : vector<2x16xf32>
      %27 = arith.divf %25, %26 : vector<2x16xf32>
      %28 = vector.extract_strided_slice %15 {offsets = [0, 32], sizes = [2, 16], strides = [1, 1]} : vector<2x64xf32> to vector<2x16xf32>
      %29 = math.tanh %28 : vector<2x16xf32>
      %30 = vector.extract_strided_slice %15 {offsets = [0, 48], sizes = [2, 16], strides = [1, 1]} : vector<2x64xf32> to vector<2x16xf32>
      %31 = arith.negf %30 : vector<2x16xf32>
      %32 = math.exp %31 : vector<2x16xf32>
      %cst_13 = arith.constant 1.000000e+00 : f32
      %33 = vector.broadcast %cst_13 : f32 to vector<2x16xf32>
      %34 = arith.addf %33, %32 : vector<2x16xf32>
      %35 = arith.divf %33, %34 : vector<2x16xf32>
      %36 = arith.mulf %27, %arg7 : vector<2x16xf32>
      %37 = arith.mulf %21, %29 : vector<2x16xf32>
      %38 = arith.addf %36, %37 : vector<2x16xf32>
      %39 = math.tanh %38 : vector<2x16xf32>
      %40 = arith.mulf %35, %39 : vector<2x16xf32>
      %41 = arith.index_cast %arg5 : i32 to index
      %c0_14 = arith.constant 0 : index
      %c0_15 = arith.constant 0 : index
      %42 = vector.load %arg4[%41, %c0_14, %c0_15] : memref<8x2x16xf32, #tpu.memory_space<vmem>>, vector<1x2x16xf32>
      %43 = vector.shape_cast %42 : vector<1x2x16xf32> to vector<2x16xf32>
      %44 = tpu.concatenate %40, %43 in 1 : vector<2x16xf32>, vector<2x16xf32> -> vector<2x32xf32>
      %45 = arith.index_cast %arg5 : i32 to index
      %c0_16 = arith.constant 0 : index
      %c0_17 = arith.constant 0 : index
      %46 = vector.load %arg3[%45, %c0_16, %c0_17] : memref<8x2x32xf32, #tpu.memory_space<vmem>>, vector<1x2x32xf32>
      %47 = vector.shape_cast %46 : vector<1x2x32xf32> to vector<2x32xf32>
      %48 = vector.shape_cast %44 : vector<2x32xf32> to vector<1x2x32xf32>
      tpu.vector_store %arg3[%45, %c0_16, %c0_17], %48 {strides = array<i32>} : memref<8x2x32xf32, #tpu.memory_space<vmem>>, vector<1x2x32xf32>,
      scf.yield %40, %38 : vector<2x16xf32>, vector<2x16xf32>
    }
    %c8_i32_7 = arith.constant 8 : i32
    return
  }
}

module attributes {stable_mosaic.version = 11 : i64} {
  func.func @_linear_kernel(%arg0: i32, %arg1: memref<16x16xf32, #tpu.memory_space<vmem>>, %arg2: memref<16x128xf32, #tpu.memory_space<vmem>>, %arg3: memref<1x128xf32, #tpu.memory_space<vmem>>, %arg4: memref<16x128xf32, #tpu.memory_space<vmem>>) attributes {dimension_semantics = [#tpu.dimension_semantics<parallel>], iteration_bounds = array<i64: 1>, scalar_prefetch = 0 : i64, scratch_operands = 0 : i64, tpu.core_type = #tpu.core_type<tc>, window_params = [{transform_indices = @transform_0, window_bounds = array<i64: 16, 16>}, {pipeline_mode = #tpu.pipeline_mode<synchronous>, transform_indices = @transform_1, window_bounds = array<i64: 16, 128>}, {pipeline_mode = #tpu.pipeline_mode<synchronous>, transform_indices = @transform_2, window_bounds = array<i64: 1, 128>}, {transform_indices = @transform_3, window_bounds = array<i64: 16, 128>}]} {
    %c0 = arith.constant 0 : index
    %c0_0 = arith.constant 0 : index
    %0 = vector.load %arg1[%c0, %c0_0] : memref<16x16xf32, #tpu.memory_space<vmem>>, vector<16x16xf32>
    %c0_1 = arith.constant 0 : index
    %c0_2 = arith.constant 0 : index
    %1 = vector.load %arg2[%c0_1, %c0_2] : memref<16x128xf32, #tpu.memory_space<vmem>>, vector<16x128xf32>
    %2 = arith.truncf %0 : vector<16x16xf32> to vector<16x16xbf16>
    %3 = arith.truncf %1 : vector<16x128xf32> to vector<16x128xbf16>
    %cst = arith.constant dense<0.000000e+00> : vector<16x128xf32>
    %4 = tpu.matmul %2, %3, %cst {dimension_numbers = #tpu.dot_dimension_numbers<[1], [0], [0], [1], [0, 0, 1, 1], [], []>} : vector<16x16xbf16>, vector<16x128xbf16>, vector<16x128xf32> -> vector<16x128xf32>
    %c0_3 = arith.constant 0 : index
    %c0_4 = arith.constant 0 : index
    %5 = vector.load %arg3[%c0_3, %c0_4] : memref<1x128xf32, #tpu.memory_space<vmem>>, vector<1x128xf32>
    %6 = vector.broadcast %5 : vector<1x128xf32> to vector<16x128xf32>
    %7 = arith.addf %4, %6 : vector<16x128xf32>
    %c0_5 = arith.constant 0 : index
    %c0_6 = arith.constant 0 : index
    %8 = vector.load %arg4[%c0_5, %c0_6] : memref<16x128xf32, #tpu.memory_space<vmem>>, vector<16x128xf32>
    tpu.vector_store %arg4[%c0_5, %c0_6], %7 {strides = array<i32>} : memref<16x128xf32, #tpu.memory_space<vmem>>, vector<16x128xf32>,
    return
  }
  func.func @transform_0(%arg0: i32) -> (i32, i32) {
    %c0_i32 = arith.constant 0 : i32
    %c0_i32_0 = arith.constant 0 : i32
    return %arg0, %c0_i32 : i32, i32
  }
  func.func @transform_1(%arg0: i32) -> (i32, i32) {
    %c0_i32 = arith.constant 0 : i32
    %c0_i32_0 = arith.constant 0 : i32
    %c0_i32_1 = arith.constant 0 : i32
    return %c0_i32, %c0_i32_0 : i32, i32
  }
  func.func @transform_2(%arg0: i32) -> (i32, i32) {
    %c0_i32 = arith.constant 0 : i32
    %c0_i32_0 = arith.constant 0 : i32
    %c0_i32_1 = arith.constant 0 : i32
    return %c0_i32, %c0_i32_0 : i32, i32
  }
  func.func @transform_3(%arg0: i32) -> (i32, i32) {
    %c0_i32 = arith.constant 0 : i32
    %c0_i32_0 = arith.constant 0 : i32
    return %arg0, %c0_i32 : i32, i32
  }
}

module attributes {stable_mosaic.version = 11 : i64} {
  func.func @_bidaf_att_kernel(%arg0: i32, %arg1: memref<1x16x32xf32, #tpu.memory_space<vmem>>, %arg2: memref<1x8x32xf32, #tpu.memory_space<vmem>>, %arg3: memref<1x16x1xf32, #tpu.memory_space<vmem>>, %arg4: memref<1x1x8xf32, #tpu.memory_space<vmem>>, %arg5: memref<32x1xf32, #tpu.memory_space<vmem>>, %arg6: memref<1x32xf32, #tpu.memory_space<vmem>>, %arg7: memref<1x32xf32, #tpu.memory_space<vmem>>, %arg8: memref<1x1xf32, #tpu.memory_space<vmem>>, %arg9: memref<1x16x128xf32, #tpu.memory_space<vmem>>) attributes {dimension_semantics = [#tpu.dimension_semantics<parallel>], iteration_bounds = array<i64: 2>, scalar_prefetch = 0 : i64, scratch_operands = 0 : i64, tpu.core_type = #tpu.core_type<tc>, window_params = [{transform_indices = @transform_0, window_bounds = array<i64: 1, 16, 32>}, {transform_indices = @transform_1, window_bounds = array<i64: 1, 8, 32>}, {transform_indices = @transform_2, window_bounds = array<i64: 1, 16, 1>}, {transform_indices = @transform_3, window_bounds = array<i64: 1, 1, 8>}, {pipeline_mode = #tpu.pipeline_mode<synchronous>, transform_indices = @transform_4, window_bounds = array<i64: 32, 1>}, {pipeline_mode = #tpu.pipeline_mode<synchronous>, transform_indices = @transform_5, window_bounds = array<i64: 1, 32>}, {pipeline_mode = #tpu.pipeline_mode<synchronous>, transform_indices = @transform_6, window_bounds = array<i64: 1, 32>}, {pipeline_mode = #tpu.pipeline_mode<synchronous>, transform_indices = @transform_7, window_bounds = array<i64: 1, 1>}, {transform_indices = @transform_8, window_bounds = array<i64: 1, 16, 128>}]} {
    %c0 = arith.constant 0 : index
    %c0_0 = arith.constant 0 : index
    %c0_1 = arith.constant 0 : index
    %0 = vector.load %arg1[%c0, %c0_0, %c0_1] : memref<1x16x32xf32, #tpu.memory_space<vmem>>, vector<1x16x32xf32>
    %1 = vector.shape_cast %0 : vector<1x16x32xf32> to vector<16x32xf32>
    %c0_2 = arith.constant 0 : index
    %c0_3 = arith.constant 0 : index
    %c0_4 = arith.constant 0 : index
    %2 = vector.load %arg2[%c0_2, %c0_3, %c0_4] : memref<1x8x32xf32, #tpu.memory_space<vmem>>, vector<1x8x32xf32>
    %3 = vector.shape_cast %2 : vector<1x8x32xf32> to vector<8x32xf32>
    %c0_5 = arith.constant 0 : index
    %c0_6 = arith.constant 0 : index
    %c0_7 = arith.constant 0 : index
    %4 = vector.load %arg3[%c0_5, %c0_6, %c0_7] : memref<1x16x1xf32, #tpu.memory_space<vmem>>, vector<1x16x1xf32>
    %5 = vector.shape_cast %4 : vector<1x16x1xf32> to vector<16x1xf32>
    %c0_8 = arith.constant 0 : index
    %c0_9 = arith.constant 0 : index
    %c0_10 = arith.constant 0 : index
    %6 = vector.load %arg4[%c0_8, %c0_9, %c0_10] : memref<1x1x8xf32, #tpu.memory_space<vmem>>, vector<1x1x8xf32>
    %7 = vector.shape_cast %6 : vector<1x1x8xf32> to vector<1x8xf32>
    %c0_11 = arith.constant 0 : index
    %c0_12 = arith.constant 0 : index
    %8 = vector.load %arg5[%c0_11, %c0_12] : memref<32x1xf32, #tpu.memory_space<vmem>>, vector<32x1xf32>
    %9 = arith.truncf %1 : vector<16x32xf32> to vector<16x32xbf16>
    %10 = arith.truncf %8 : vector<32x1xf32> to vector<32x1xbf16>
    %cst = arith.constant dense<0.000000e+00> : vector<16x1xf32>
    %11 = tpu.matmul %9, %10, %cst {dimension_numbers = #tpu.dot_dimension_numbers<[1], [0], [0], [1], [0, 0, 1, 1], [], []>} : vector<16x32xbf16>, vector<32x1xbf16>, vector<16x1xf32> -> vector<16x1xf32>
    %c0_13 = arith.constant 0 : index
    %c0_14 = arith.constant 0 : index
    %12 = vector.load %arg6[%c0_13, %c0_14] : memref<1x32xf32, #tpu.memory_space<vmem>>, vector<1x32xf32>
    %13 = arith.truncf %12 : vector<1x32xf32> to vector<1x32xbf16>
    %14 = arith.truncf %3 : vector<8x32xf32> to vector<8x32xbf16>
    %cst_15 = arith.constant dense<0.000000e+00> : vector<1x8xf32>
    %15 = tpu.matmul %13, %14, %cst_15 {dimension_numbers = #tpu.dot_dimension_numbers<[1], [1], [0], [0], [0, 0, 1, 0], [], []>} : vector<1x32xbf16>, vector<8x32xbf16>, vector<1x8xf32> -> vector<1x8xf32>
    %c0_16 = arith.constant 0 : index
    %c0_17 = arith.constant 0 : index
    %16 = vector.load %arg7[%c0_16, %c0_17] : memref<1x32xf32, #tpu.memory_space<vmem>>, vector<1x32xf32>
    %17 = vector.broadcast %16 : vector<1x32xf32> to vector<16x32xf32>
    %18 = arith.mulf %1, %17 : vector<16x32xf32>
    %19 = arith.truncf %18 : vector<16x32xf32> to vector<16x32xbf16>
    %20 = arith.truncf %3 : vector<8x32xf32> to vector<8x32xbf16>
    %cst_18 = arith.constant dense<0.000000e+00> : vector<16x8xf32>
    %21 = tpu.matmul %19, %20, %cst_18 {dimension_numbers = #tpu.dot_dimension_numbers<[1], [1], [0], [0], [0, 0, 1, 0], [], []>} : vector<16x32xbf16>, vector<8x32xbf16>, vector<16x8xf32> -> vector<16x8xf32>
    %22 = vector.broadcast %11 : vector<16x1xf32> to vector<16x8xf32>
    %23 = vector.broadcast %15 : vector<1x8xf32> to vector<16x8xf32>
    %24 = arith.addf %22, %23 : vector<16x8xf32>
    %25 = arith.addf %24, %21 : vector<16x8xf32>
    %c0_19 = arith.constant 0 : index
    %c0_20 = arith.constant 0 : index
    %26 = vector.load %arg8[%c0_19, %c0_20] : memref<1x1xf32, #tpu.memory_space<vmem>>, vector<1x1xf32>
    %27 = vector.broadcast %26 : vector<1x1xf32> to vector<16x8xf32>
    %28 = arith.addf %25, %27 : vector<16x8xf32>
    %cst_21 = arith.constant 0.000000e+00 : f32
    %29 = vector.broadcast %cst_21 : f32 to vector<1x8xf32>
    %30 = arith.cmpf ogt, %7, %29 : vector<1x8xf32>
    %cst_22 = arith.constant -1.000000e+30 : f32
    %31 = vector.shape_cast %30 : vector<1x8xi1> to vector<1x8xi1>
    %32 = vector.broadcast %31 : vector<1x8xi1> to vector<16x8xi1>
    %33 = vector.broadcast %cst_22 : f32 to vector<16x8xf32>
    %34 = arith.select %32, %28, %33 : vector<16x8xi1>, vector<16x8xf32>
    %cst_23 = arith.constant dense<0xFF800000> : vector<16xf32>
    %35 = vector.multi_reduction <maximumf>, %34, %cst_23 [1] : vector<16x8xf32> to vector<16xf32>
    %36 = vector.shape_cast %35 : vector<16xf32> to vector<16x1xf32>
    %37 = vector.broadcast %36 : vector<16x1xf32> to vector<16x8xf32>
    %38 = arith.subf %34, %37 : vector<16x8xf32>
    %39 = math.exp %38 : vector<16x8xf32>
    %cst_24 = arith.constant dense<0.000000e+00> : vector<16xf32>
    %40 = vector.multi_reduction <add>, %39, %cst_24 [1] : vector<16x8xf32> to vector<16xf32>
    %41 = vector.shape_cast %40 : vector<16xf32> to vector<16x1xf32>
    %42 = tpu.reciprocal %41 {approx = true} : vector<16x1xf32> -> vector<16x1xf32>
    %43 = vector.broadcast %42 : vector<16x1xf32> to vector<16x8xf32>
    %44 = arith.mulf %39, %43 : vector<16x8xf32>
    %cst_25 = arith.constant 0.000000e+00 : f32
    %45 = vector.broadcast %cst_25 : f32 to vector<16x1xf32>
    %46 = arith.cmpf ogt, %5, %45 : vector<16x1xf32>
    %cst_26 = arith.constant -1.000000e+30 : f32
    %47 = vector.shape_cast %46 : vector<16x1xi1> to vector<16x1xi1>
    %48 = vector.broadcast %47 : vector<16x1xi1> to vector<16x8xi1>
    %49 = vector.broadcast %cst_26 : f32 to vector<16x8xf32>
    %50 = arith.select %48, %28, %49 : vector<16x8xi1>, vector<16x8xf32>
    %cst_27 = arith.constant dense<0xFF800000> : vector<8xf32>
    %51 = vector.multi_reduction <maximumf>, %50, %cst_27 [0] : vector<16x8xf32> to vector<8xf32>
    %52 = vector.shape_cast %51 : vector<8xf32> to vector<1x8xf32>
    %53 = vector.broadcast %52 : vector<1x8xf32> to vector<16x8xf32>
    %54 = arith.subf %50, %53 : vector<16x8xf32>
    %55 = math.exp %54 : vector<16x8xf32>
    %cst_28 = arith.constant dense<0.000000e+00> : vector<8xf32>
    %56 = vector.multi_reduction <add>, %55, %cst_28 [0] : vector<16x8xf32> to vector<8xf32>
    %57 = vector.shape_cast %56 : vector<8xf32> to vector<1x8xf32>
    %58 = tpu.reciprocal %57 {approx = true} : vector<1x8xf32> -> vector<1x8xf32>
    %59 = vector.broadcast %58 : vector<1x8xf32> to vector<16x8xf32>
    %60 = arith.mulf %55, %59 : vector<16x8xf32>
    %61 = arith.truncf %44 : vector<16x8xf32> to vector<16x8xbf16>
    %62 = arith.truncf %3 : vector<8x32xf32> to vector<8x32xbf16>
    %cst_29 = arith.constant dense<0.000000e+00> : vector<16x32xf32>
    %63 = tpu.matmul %61, %62, %cst_29 {dimension_numbers = #tpu.dot_dimension_numbers<[1], [0], [0], [1], [0, 0, 1, 1], [], []>} : vector<16x8xbf16>, vector<8x32xbf16>, vector<16x32xf32> -> vector<16x32xf32>
    %64 = arith.truncf %60 : vector<16x8xf32> to vector<16x8xbf16>
    %65 = arith.truncf %1 : vector<16x32xf32> to vector<16x32xbf16>
    %cst_30 = arith.constant dense<0.000000e+00> : vector<8x32xf32>
    %66 = tpu.matmul %64, %65, %cst_30 {dimension_numbers = #tpu.dot_dimension_numbers<[0], [0], [1], [1], [0, 1, 1, 1], [], []>} : vector<16x8xbf16>, vector<16x32xbf16>, vector<8x32xf32> -> vector<8x32xf32>
    %67 = arith.truncf %44 : vector<16x8xf32> to vector<16x8xbf16>
    %68 = arith.truncf %66 : vector<8x32xf32> to vector<8x32xbf16>
    %cst_31 = arith.constant dense<0.000000e+00> : vector<16x32xf32>
    %69 = tpu.matmul %67, %68, %cst_31 {dimension_numbers = #tpu.dot_dimension_numbers<[1], [0], [0], [1], [0, 0, 1, 1], [], []>} : vector<16x8xbf16>, vector<8x32xbf16>, vector<16x32xf32> -> vector<16x32xf32>
    %70 = arith.mulf %1, %63 : vector<16x32xf32>
    %71 = arith.mulf %1, %69 : vector<16x32xf32>
    %72 = tpu.concatenate %1, %63, %70, %71 in 1 : vector<16x32xf32>, vector<16x32xf32>, vector<16x32xf32>, vector<16x32xf32> -> vector<16x128xf32>
    %c0_32 = arith.constant 0 : index
    %c0_33 = arith.constant 0 : index
    %c0_34 = arith.constant 0 : index
    %73 = vector.load %arg9[%c0_32, %c0_33, %c0_34] : memref<1x16x128xf32, #tpu.memory_space<vmem>>, vector<1x16x128xf32>
    %74 = vector.shape_cast %73 : vector<1x16x128xf32> to vector<16x128xf32>
    %75 = vector.shape_cast %72 : vector<16x128xf32> to vector<1x16x128xf32>
    tpu.vector_store %arg9[%c0_32, %c0_33, %c0_34], %75 {strides = array<i32>} : memref<1x16x128xf32, #tpu.memory_space<vmem>>, vector<1x16x128xf32>,
    return
  }
  func.func @transform_0(%arg0: i32) -> (i32, i32, i32) {
    %c0_i32 = arith.constant 0 : i32
    %c0_i32_0 = arith.constant 0 : i32
    %c0_i32_1 = arith.constant 0 : i32
    return %arg0, %c0_i32, %c0_i32_0 : i32, i32, i32
  }
  func.func @transform_1(%arg0: i32) -> (i32, i32, i32) {
    %c0_i32 = arith.constant 0 : i32
    %c0_i32_0 = arith.constant 0 : i32
    %c0_i32_1 = arith.constant 0 : i32
    return %arg0, %c0_i32, %c0_i32_0 : i32, i32, i32
  }
  func.func @transform_2(%arg0: i32) -> (i32, i32, i32) {
    %c0_i32 = arith.constant 0 : i32
    %c0_i32_0 = arith.constant 0 : i32
    %c0_i32_1 = arith.constant 0 : i32
    return %arg0, %c0_i32, %c0_i32_0 : i32, i32, i32
  }
  func.func @transform_3(%arg0: i32) -> (i32, i32, i32) {
    %c0_i32 = arith.constant 0 : i32
    %c0_i32_0 = arith.constant 0 : i32
    %c0_i32_1 = arith.constant 0 : i32
    return %arg0, %c0_i32, %c0_i32_0 : i32, i32, i32
  }
  func.func @transform_4(%arg0: i32) -> (i32, i32) {
    %c0_i32 = arith.constant 0 : i32
    %c0_i32_0 = arith.constant 0 : i32
    %c0_i32_1 = arith.constant 0 : i32
    return %c0_i32, %c0_i32_0 : i32, i32
  }
  func.func @transform_5(%arg0: i32) -> (i32, i32) {
    %c0_i32 = arith.constant 0 : i32
    %c0_i32_0 = arith.constant 0 : i32
    %c0_i32_1 = arith.constant 0 : i32
    return %c0_i32, %c0_i32_0 : i32, i32
  }
  func.func @transform_6(%arg0: i32) -> (i32, i32) {
    %c0_i32 = arith.constant 0 : i32
    %c0_i32_0 = arith.constant 0 : i32
    %c0_i32_1 = arith.constant 0 : i32
    return %c0_i32, %c0_i32_0 : i32, i32
  }
  func.func @transform_7(%arg0: i32) -> (i32, i32) {
    %c0_i32 = arith.constant 0 : i32
    %c0_i32_0 = arith.constant 0 : i32
    %c0_i32_1 = arith.constant 0 : i32
    return %c0_i32, %c0_i32_0 : i32, i32
  }
  func.func @transform_8(%arg0: i32) -> (i32, i32, i32) {
    %c0_i32 = arith.constant 0 : i32
    %c0_i32_0 = arith.constant 0 : i32
    %c0_i32_1 = arith.constant 0 : i32
    return %arg0, %c0_i32, %c0_i32_0 : i32, i32, i32
  }
}

module attributes {stable_mosaic.version = 11 : i64} {
  func.func @_self_att_kernel(%arg0: i32, %arg1: memref<1x16x128xf32, #tpu.memory_space<vmem>>, %arg2: memref<1x1x16xf32, #tpu.memory_space<vmem>>, %arg3: memref<128x16xf32, #tpu.memory_space<vmem>>, %arg4: memref<128x16xf32, #tpu.memory_space<vmem>>, %arg5: memref<128x128xf32, #tpu.memory_space<vmem>>, %arg6: memref<128x128xf32, #tpu.memory_space<vmem>>, %arg7: memref<1x128xf32, #tpu.memory_space<vmem>>, %arg8: memref<1x16x128xf32, #tpu.memory_space<vmem>>) attributes {dimension_semantics = [#tpu.dimension_semantics<parallel>], iteration_bounds = array<i64: 2>, scalar_prefetch = 0 : i64, scratch_operands = 0 : i64, tpu.core_type = #tpu.core_type<tc>, window_params = [{transform_indices = @transform_0, window_bounds = array<i64: 1, 16, 128>}, {transform_indices = @transform_1, window_bounds = array<i64: 1, 1, 16>}, {pipeline_mode = #tpu.pipeline_mode<synchronous>, transform_indices = @transform_2, window_bounds = array<i64: 128, 16>}, {pipeline_mode = #tpu.pipeline_mode<synchronous>, transform_indices = @transform_3, window_bounds = array<i64: 128, 16>}, {pipeline_mode = #tpu.pipeline_mode<synchronous>, transform_indices = @transform_4, window_bounds = array<i64: 128, 128>}, {pipeline_mode = #tpu.pipeline_mode<synchronous>, transform_indices = @transform_5, window_bounds = array<i64: 128, 128>}, {pipeline_mode = #tpu.pipeline_mode<synchronous>, transform_indices = @transform_6, window_bounds = array<i64: 1, 128>}, {transform_indices = @transform_7, window_bounds = array<i64: 1, 16, 128>}]} {
    %c0 = arith.constant 0 : index
    %c0_0 = arith.constant 0 : index
    %c0_1 = arith.constant 0 : index
    %0 = vector.load %arg1[%c0, %c0_0, %c0_1] : memref<1x16x128xf32, #tpu.memory_space<vmem>>, vector<1x16x128xf32>
    %1 = vector.shape_cast %0 : vector<1x16x128xf32> to vector<16x128xf32>
    %c0_2 = arith.constant 0 : index
    %c0_3 = arith.constant 0 : index
    %c0_4 = arith.constant 0 : index
    %2 = vector.load %arg2[%c0_2, %c0_3, %c0_4] : memref<1x1x16xf32, #tpu.memory_space<vmem>>, vector<1x1x16xf32>
    %3 = vector.shape_cast %2 : vector<1x1x16xf32> to vector<1x16xf32>
    %c0_5 = arith.constant 0 : index
    %c0_6 = arith.constant 0 : index
    %4 = vector.load %arg3[%c0_5, %c0_6] : memref<128x16xf32, #tpu.memory_space<vmem>>, vector<128x16xf32>
    %5 = arith.truncf %1 : vector<16x128xf32> to vector<16x128xbf16>
    %6 = arith.truncf %4 : vector<128x16xf32> to vector<128x16xbf16>
    %cst = arith.constant dense<0.000000e+00> : vector<16x16xf32>
    %7 = tpu.matmul %5, %6, %cst {dimension_numbers = #tpu.dot_dimension_numbers<[1], [0], [0], [1], [0, 0, 1, 1], [], []>} : vector<16x128xbf16>, vector<128x16xbf16>, vector<16x16xf32> -> vector<16x16xf32>
    %8 = math.tanh %7 : vector<16x16xf32>
    %c0_7 = arith.constant 0 : index
    %c0_8 = arith.constant 0 : index
    %9 = vector.load %arg4[%c0_7, %c0_8] : memref<128x16xf32, #tpu.memory_space<vmem>>, vector<128x16xf32>
    %10 = arith.truncf %1 : vector<16x128xf32> to vector<16x128xbf16>
    %11 = arith.truncf %9 : vector<128x16xf32> to vector<128x16xbf16>
    %cst_9 = arith.constant dense<0.000000e+00> : vector<16x16xf32>
    %12 = tpu.matmul %10, %11, %cst_9 {dimension_numbers = #tpu.dot_dimension_numbers<[1], [0], [0], [1], [0, 0, 1, 1], [], []>} : vector<16x128xbf16>, vector<128x16xbf16>, vector<16x16xf32> -> vector<16x16xf32>
    %13 = math.tanh %12 : vector<16x16xf32>
    %14 = arith.truncf %8 : vector<16x16xf32> to vector<16x16xbf16>
    %15 = arith.truncf %13 : vector<16x16xf32> to vector<16x16xbf16>
    %cst_10 = arith.constant dense<0.000000e+00> : vector<16x16xf32>
    %16 = tpu.matmul %14, %15, %cst_10 {dimension_numbers = #tpu.dot_dimension_numbers<[1], [1], [0], [0], [0, 0, 1, 0], [], []>} : vector<16x16xbf16>, vector<16x16xbf16>, vector<16x16xf32> -> vector<16x16xf32>
    %cst_11 = arith.constant 0.000000e+00 : f32
    %17 = vector.broadcast %cst_11 : f32 to vector<1x16xf32>
    %18 = arith.cmpf ogt, %3, %17 : vector<1x16xf32>
    %cst_12 = arith.constant -1.000000e+30 : f32
    %19 = vector.shape_cast %18 : vector<1x16xi1> to vector<1x16xi1>
    %20 = vector.broadcast %19 : vector<1x16xi1> to vector<16x16xi1>
    %21 = vector.broadcast %cst_12 : f32 to vector<16x16xf32>
    %22 = arith.select %20, %16, %21 : vector<16x16xi1>, vector<16x16xf32>
    %cst_13 = arith.constant dense<0xFF800000> : vector<16xf32>
    %23 = vector.multi_reduction <maximumf>, %22, %cst_13 [1] : vector<16x16xf32> to vector<16xf32>
    %24 = vector.shape_cast %23 : vector<16xf32> to vector<16x1xf32>
    %25 = vector.broadcast %24 : vector<16x1xf32> to vector<16x16xf32>
    %26 = arith.subf %22, %25 : vector<16x16xf32>
    %27 = math.exp %26 : vector<16x16xf32>
    %cst_14 = arith.constant dense<0.000000e+00> : vector<16xf32>
    %28 = vector.multi_reduction <add>, %27, %cst_14 [1] : vector<16x16xf32> to vector<16xf32>
    %29 = vector.shape_cast %28 : vector<16xf32> to vector<16x1xf32>
    %30 = tpu.reciprocal %29 {approx = true} : vector<16x1xf32> -> vector<16x1xf32>
    %31 = vector.broadcast %30 : vector<16x1xf32> to vector<16x16xf32>
    %32 = arith.mulf %27, %31 : vector<16x16xf32>
    %33 = arith.truncf %32 : vector<16x16xf32> to vector<16x16xbf16>
    %34 = arith.truncf %1 : vector<16x128xf32> to vector<16x128xbf16>
    %cst_15 = arith.constant dense<0.000000e+00> : vector<16x128xf32>
    %35 = tpu.matmul %33, %34, %cst_15 {dimension_numbers = #tpu.dot_dimension_numbers<[1], [0], [0], [1], [0, 0, 1, 1], [], []>} : vector<16x16xbf16>, vector<16x128xbf16>, vector<16x128xf32> -> vector<16x128xf32>
    %c0_16 = arith.constant 0 : index
    %c0_17 = arith.constant 0 : index
    %36 = vector.load %arg5[%c0_16, %c0_17] : memref<128x128xf32, #tpu.memory_space<vmem>>, vector<128x128xf32>
    %37 = arith.truncf %1 : vector<16x128xf32> to vector<16x128xbf16>
    %38 = arith.truncf %36 : vector<128x128xf32> to vector<128x128xbf16>
    %cst_18 = arith.constant dense<0.000000e+00> : vector<16x128xf32>
    %39 = tpu.matmul %37, %38, %cst_18 {dimension_numbers = #tpu.dot_dimension_numbers<[1], [0], [0], [1], [0, 0, 1, 1], [], []>} : vector<16x128xbf16>, vector<128x128xbf16>, vector<16x128xf32> -> vector<16x128xf32>
    %c0_19 = arith.constant 0 : index
    %c0_20 = arith.constant 0 : index
    %40 = vector.load %arg6[%c0_19, %c0_20] : memref<128x128xf32, #tpu.memory_space<vmem>>, vector<128x128xf32>
    %41 = arith.truncf %35 : vector<16x128xf32> to vector<16x128xbf16>
    %42 = arith.truncf %40 : vector<128x128xf32> to vector<128x128xbf16>
    %cst_21 = arith.constant dense<0.000000e+00> : vector<16x128xf32>
    %43 = tpu.matmul %41, %42, %cst_21 {dimension_numbers = #tpu.dot_dimension_numbers<[1], [0], [0], [1], [0, 0, 1, 1], [], []>} : vector<16x128xbf16>, vector<128x128xbf16>, vector<16x128xf32> -> vector<16x128xf32>
    %44 = arith.addf %39, %43 : vector<16x128xf32>
    %c0_22 = arith.constant 0 : index
    %c0_23 = arith.constant 0 : index
    %45 = vector.load %arg7[%c0_22, %c0_23] : memref<1x128xf32, #tpu.memory_space<vmem>>, vector<1x128xf32>
    %46 = vector.broadcast %45 : vector<1x128xf32> to vector<16x128xf32>
    %47 = arith.addf %44, %46 : vector<16x128xf32>
    %48 = arith.negf %47 : vector<16x128xf32>
    %49 = math.exp %48 : vector<16x128xf32>
    %cst_24 = arith.constant 1.000000e+00 : f32
    %50 = vector.broadcast %cst_24 : f32 to vector<16x128xf32>
    %51 = arith.addf %50, %49 : vector<16x128xf32>
    %52 = arith.divf %50, %51 : vector<16x128xf32>
    %53 = arith.mulf %52, %35 : vector<16x128xf32>
    %cst_25 = arith.constant 1.000000e+00 : f32
    %54 = vector.broadcast %cst_25 : f32 to vector<16x128xf32>
    %55 = arith.subf %54, %52 : vector<16x128xf32>
    %56 = arith.mulf %55, %1 : vector<16x128xf32>
    %57 = arith.addf %53, %56 : vector<16x128xf32>
    %c0_26 = arith.constant 0 : index
    %c0_27 = arith.constant 0 : index
    %c0_28 = arith.constant 0 : index
    %58 = vector.load %arg8[%c0_26, %c0_27, %c0_28] : memref<1x16x128xf32, #tpu.memory_space<vmem>>, vector<1x16x128xf32>
    %59 = vector.shape_cast %58 : vector<1x16x128xf32> to vector<16x128xf32>
    %60 = vector.shape_cast %57 : vector<16x128xf32> to vector<1x16x128xf32>
    tpu.vector_store %arg8[%c0_26, %c0_27, %c0_28], %60 {strides = array<i32>} : memref<1x16x128xf32, #tpu.memory_space<vmem>>, vector<1x16x128xf32>,
    return
  }
  func.func @transform_0(%arg0: i32) -> (i32, i32, i32) {
    %c0_i32 = arith.constant 0 : i32
    %c0_i32_0 = arith.constant 0 : i32
    %c0_i32_1 = arith.constant 0 : i32
    return %arg0, %c0_i32, %c0_i32_0 : i32, i32, i32
  }
  func.func @transform_1(%arg0: i32) -> (i32, i32, i32) {
    %c0_i32 = arith.constant 0 : i32
    %c0_i32_0 = arith.constant 0 : i32
    %c0_i32_1 = arith.constant 0 : i32
    return %arg0, %c0_i32, %c0_i32_0 : i32, i32, i32
  }
  func.func @transform_2(%arg0: i32) -> (i32, i32) {
    %c0_i32 = arith.constant 0 : i32
    %c0_i32_0 = arith.constant 0 : i32
    %c0_i32_1 = arith.constant 0 : i32
    return %c0_i32, %c0_i32_0 : i32, i32
  }
  func.func @transform_3(%arg0: i32) -> (i32, i32) {
    %c0_i32 = arith.constant 0 : i32
    %c0_i32_0 = arith.constant 0 : i32
    %c0_i32_1 = arith.constant 0 : i32
    return %c0_i32, %c0_i32_0 : i32, i32
  }
  func.func @transform_4(%arg0: i32) -> (i32, i32) {
    %c0_i32 = arith.constant 0 : i32
    %c0_i32_0 = arith.constant 0 : i32
    %c0_i32_1 = arith.constant 0 : i32
    return %c0_i32, %c0_i32_0 : i32, i32
  }
  func.func @transform_5(%arg0: i32) -> (i32, i32) {
    %c0_i32 = arith.constant 0 : i32
    %c0_i32_0 = arith.constant 0 : i32
    %c0_i32_1 = arith.constant 0 : i32
    return %c0_i32, %c0_i32_0 : i32, i32
  }
  func.func @transform_6(%arg0: i32) -> (i32, i32) {
    %c0_i32 = arith.constant 0 : i32
    %c0_i32_0 = arith.constant 0 : i32
    %c0_i32_1 = arith.constant 0 : i32
    return %c0_i32, %c0_i32_0 : i32, i32
  }
  func.func @transform_7(%arg0: i32) -> (i32, i32, i32) {
    %c0_i32 = arith.constant 0 : i32
    %c0_i32_0 = arith.constant 0 : i32
    %c0_i32_1 = arith.constant 0 : i32
    return %arg0, %c0_i32, %c0_i32_0 : i32, i32, i32
  }
}

module attributes {stable_mosaic.version = 11 : i64} {
  func.func @_linear_kernel(%arg0: i32, %arg1: memref<32x128xf32, #tpu.memory_space<vmem>>, %arg2: memref<128x128xf32, #tpu.memory_space<vmem>>, %arg3: memref<1x128xf32, #tpu.memory_space<vmem>>, %arg4: memref<32x128xf32, #tpu.memory_space<vmem>>) attributes {dimension_semantics = [#tpu.dimension_semantics<parallel>], iteration_bounds = array<i64: 1>, scalar_prefetch = 0 : i64, scratch_operands = 0 : i64, tpu.core_type = #tpu.core_type<tc>, window_params = [{transform_indices = @transform_0, window_bounds = array<i64: 32, 128>}, {pipeline_mode = #tpu.pipeline_mode<synchronous>, transform_indices = @transform_1, window_bounds = array<i64: 128, 128>}, {pipeline_mode = #tpu.pipeline_mode<synchronous>, transform_indices = @transform_2, window_bounds = array<i64: 1, 128>}, {transform_indices = @transform_3, window_bounds = array<i64: 32, 128>}]} {
    %c0 = arith.constant 0 : index
    %c0_0 = arith.constant 0 : index
    %0 = vector.load %arg1[%c0, %c0_0] : memref<32x128xf32, #tpu.memory_space<vmem>>, vector<32x128xf32>
    %c0_1 = arith.constant 0 : index
    %c0_2 = arith.constant 0 : index
    %1 = vector.load %arg2[%c0_1, %c0_2] : memref<128x128xf32, #tpu.memory_space<vmem>>, vector<128x128xf32>
    %2 = arith.truncf %0 : vector<32x128xf32> to vector<32x128xbf16>
    %3 = arith.truncf %1 : vector<128x128xf32> to vector<128x128xbf16>
    %cst = arith.constant dense<0.000000e+00> : vector<32x128xf32>
    %4 = tpu.matmul %2, %3, %cst {dimension_numbers = #tpu.dot_dimension_numbers<[1], [0], [0], [1], [0, 0, 1, 1], [], []>} : vector<32x128xbf16>, vector<128x128xbf16>, vector<32x128xf32> -> vector<32x128xf32>
    %c0_3 = arith.constant 0 : index
    %c0_4 = arith.constant 0 : index
    %5 = vector.load %arg3[%c0_3, %c0_4] : memref<1x128xf32, #tpu.memory_space<vmem>>, vector<1x128xf32>
    %6 = vector.broadcast %5 : vector<1x128xf32> to vector<32x128xf32>
    %7 = arith.addf %4, %6 : vector<32x128xf32>
    %c0_5 = arith.constant 0 : index
    %c0_6 = arith.constant 0 : index
    %8 = vector.load %arg4[%c0_5, %c0_6] : memref<32x128xf32, #tpu.memory_space<vmem>>, vector<32x128xf32>
    tpu.vector_store %arg4[%c0_5, %c0_6], %7 {strides = array<i32>} : memref<32x128xf32, #tpu.memory_space<vmem>>, vector<32x128xf32>,
    return
  }
  func.func @transform_0(%arg0: i32) -> (i32, i32) {
    %c0_i32 = arith.constant 0 : i32
    %c0_i32_0 = arith.constant 0 : i32
    return %arg0, %c0_i32 : i32, i32
  }
  func.func @transform_1(%arg0: i32) -> (i32, i32) {
    %c0_i32 = arith.constant 0 : i32
    %c0_i32_0 = arith.constant 0 : i32
    %c0_i32_1 = arith.constant 0 : i32
    return %c0_i32, %c0_i32_0 : i32, i32
  }
  func.func @transform_2(%arg0: i32) -> (i32, i32) {
    %c0_i32 = arith.constant 0 : i32
    %c0_i32_0 = arith.constant 0 : i32
    %c0_i32_1 = arith.constant 0 : i32
    return %c0_i32, %c0_i32_0 : i32, i32
  }
  func.func @transform_3(%arg0: i32) -> (i32, i32) {
    %c0_i32 = arith.constant 0 : i32
    %c0_i32_0 = arith.constant 0 : i32
    return %arg0, %c0_i32 : i32, i32
  }
}

module attributes {stable_mosaic.version = 11 : i64} {
  func.func @_linear_kernel(%arg0: i32, %arg1: memref<32x32xf32, #tpu.memory_space<vmem>>, %arg2: memref<32x128xf32, #tpu.memory_space<vmem>>, %arg3: memref<1x128xf32, #tpu.memory_space<vmem>>, %arg4: memref<32x128xf32, #tpu.memory_space<vmem>>) attributes {dimension_semantics = [#tpu.dimension_semantics<parallel>], iteration_bounds = array<i64: 1>, scalar_prefetch = 0 : i64, scratch_operands = 0 : i64, tpu.core_type = #tpu.core_type<tc>, window_params = [{transform_indices = @transform_0, window_bounds = array<i64: 32, 32>}, {pipeline_mode = #tpu.pipeline_mode<synchronous>, transform_indices = @transform_1, window_bounds = array<i64: 32, 128>}, {pipeline_mode = #tpu.pipeline_mode<synchronous>, transform_indices = @transform_2, window_bounds = array<i64: 1, 128>}, {transform_indices = @transform_3, window_bounds = array<i64: 32, 128>}]} {
    %c0 = arith.constant 0 : index
    %c0_0 = arith.constant 0 : index
    %0 = vector.load %arg1[%c0, %c0_0] : memref<32x32xf32, #tpu.memory_space<vmem>>, vector<32x32xf32>
    %c0_1 = arith.constant 0 : index
    %c0_2 = arith.constant 0 : index
    %1 = vector.load %arg2[%c0_1, %c0_2] : memref<32x128xf32, #tpu.memory_space<vmem>>, vector<32x128xf32>
    %2 = arith.truncf %0 : vector<32x32xf32> to vector<32x32xbf16>
    %3 = arith.truncf %1 : vector<32x128xf32> to vector<32x128xbf16>
    %cst = arith.constant dense<0.000000e+00> : vector<32x128xf32>
    %4 = tpu.matmul %2, %3, %cst {dimension_numbers = #tpu.dot_dimension_numbers<[1], [0], [0], [1], [0, 0, 1, 1], [], []>} : vector<32x32xbf16>, vector<32x128xbf16>, vector<32x128xf32> -> vector<32x128xf32>
    %c0_3 = arith.constant 0 : index
    %c0_4 = arith.constant 0 : index
    %5 = vector.load %arg3[%c0_3, %c0_4] : memref<1x128xf32, #tpu.memory_space<vmem>>, vector<1x128xf32>
    %6 = vector.broadcast %5 : vector<1x128xf32> to vector<32x128xf32>
    %7 = arith.addf %4, %6 : vector<32x128xf32>
    %c0_5 = arith.constant 0 : index
    %c0_6 = arith.constant 0 : index
    %8 = vector.load %arg4[%c0_5, %c0_6] : memref<32x128xf32, #tpu.memory_space<vmem>>, vector<32x128xf32>
    tpu.vector_store %arg4[%c0_5, %c0_6], %7 {strides = array<i32>} : memref<32x128xf32, #tpu.memory_space<vmem>>, vector<32x128xf32>,
    return
  }
  func.func @transform_0(%arg0: i32) -> (i32, i32) {
    %c0_i32 = arith.constant 0 : i32
    %c0_i32_0 = arith.constant 0 : i32
    return %arg0, %c0_i32 : i32, i32
  }
  func.func @transform_1(%arg0: i32) -> (i32, i32) {
    %c0_i32 = arith.constant 0 : i32
    %c0_i32_0 = arith.constant 0 : i32
    %c0_i32_1 = arith.constant 0 : i32
    return %c0_i32, %c0_i32_0 : i32, i32
  }
  func.func @transform_2(%arg0: i32) -> (i32, i32) {
    %c0_i32 = arith.constant 0 : i32
    %c0_i32_0 = arith.constant 0 : i32
    %c0_i32_1 = arith.constant 0 : i32
    return %c0_i32, %c0_i32_0 : i32, i32
  }
  func.func @transform_3(%arg0: i32) -> (i32, i32) {
    %c0_i32 = arith.constant 0 : i32
    %c0_i32_0 = arith.constant 0 : i32
    return %arg0, %c0_i32 : i32, i32
  }
}

module attributes {stable_mosaic.version = 11 : i64} {
  func.func @_output_kernel(%arg0: i32, %arg1: memref<1x16x128xf32, #tpu.memory_space<vmem>>, %arg2: memref<1x16x32xf32, #tpu.memory_space<vmem>>, %arg3: memref<1x16x32xf32, #tpu.memory_space<vmem>>, %arg4: memref<1x1x16xf32, #tpu.memory_space<vmem>>, %arg5: memref<2x128xf32, #tpu.memory_space<vmem>>, %arg6: memref<2x64xf32, #tpu.memory_space<vmem>>, %arg7: memref<2x1xf32, #tpu.memory_space<vmem>>, %arg8: memref<1x2x16xf32, #tpu.memory_space<vmem>>) attributes {dimension_semantics = [#tpu.dimension_semantics<parallel>], iteration_bounds = array<i64: 2>, scalar_prefetch = 0 : i64, scratch_operands = 0 : i64, tpu.core_type = #tpu.core_type<tc>, window_params = [{transform_indices = @transform_0, window_bounds = array<i64: 1, 16, 128>}, {transform_indices = @transform_1, window_bounds = array<i64: 1, 16, 32>}, {transform_indices = @transform_2, window_bounds = array<i64: 1, 16, 32>}, {transform_indices = @transform_3, window_bounds = array<i64: 1, 1, 16>}, {pipeline_mode = #tpu.pipeline_mode<synchronous>, transform_indices = @transform_4, window_bounds = array<i64: 2, 128>}, {pipeline_mode = #tpu.pipeline_mode<synchronous>, transform_indices = @transform_5, window_bounds = array<i64: 2, 64>}, {pipeline_mode = #tpu.pipeline_mode<synchronous>, transform_indices = @transform_6, window_bounds = array<i64: 2, 1>}, {transform_indices = @transform_7, window_bounds = array<i64: 1, 2, 16>}]} {
    %c0 = arith.constant 0 : index
    %c0_0 = arith.constant 0 : index
    %c0_1 = arith.constant 0 : index
    %0 = vector.load %arg1[%c0, %c0_0, %c0_1] : memref<1x16x128xf32, #tpu.memory_space<vmem>>, vector<1x16x128xf32>
    %1 = vector.shape_cast %0 : vector<1x16x128xf32> to vector<16x128xf32>
    %c0_2 = arith.constant 0 : index
    %c0_3 = arith.constant 0 : index
    %c0_4 = arith.constant 0 : index
    %2 = vector.load %arg2[%c0_2, %c0_3, %c0_4] : memref<1x16x32xf32, #tpu.memory_space<vmem>>, vector<1x16x32xf32>
    %3 = vector.shape_cast %2 : vector<1x16x32xf32> to vector<16x32xf32>
    %c0_5 = arith.constant 0 : index
    %c0_6 = arith.constant 0 : index
    %c0_7 = arith.constant 0 : index
    %4 = vector.load %arg3[%c0_5, %c0_6, %c0_7] : memref<1x16x32xf32, #tpu.memory_space<vmem>>, vector<1x16x32xf32>
    %5 = vector.shape_cast %4 : vector<1x16x32xf32> to vector<16x32xf32>
    %6 = tpu.concatenate %3, %5 in 1 : vector<16x32xf32>, vector<16x32xf32> -> vector<16x64xf32>
    %c0_8 = arith.constant 0 : index
    %c0_9 = arith.constant 0 : index
    %c0_10 = arith.constant 0 : index
    %7 = vector.load %arg4[%c0_8, %c0_9, %c0_10] : memref<1x1x16xf32, #tpu.memory_space<vmem>>, vector<1x1x16xf32>
    %8 = vector.shape_cast %7 : vector<1x1x16xf32> to vector<1x16xf32>
    %c0_11 = arith.constant 0 : index
    %c0_12 = arith.constant 0 : index
    %9 = vector.load %arg5[%c0_11, %c0_12] : memref<2x128xf32, #tpu.memory_space<vmem>>, vector<2x128xf32>
    %10 = arith.truncf %9 : vector<2x128xf32> to vector<2x128xbf16>
    %11 = arith.truncf %1 : vector<16x128xf32> to vector<16x128xbf16>
    %cst = arith.constant dense<0.000000e+00> : vector<2x16xf32>
    %12 = tpu.matmul %10, %11, %cst {dimension_numbers = #tpu.dot_dimension_numbers<[1], [1], [0], [0], [0, 0, 1, 0], [], []>} : vector<2x128xbf16>, vector<16x128xbf16>, vector<2x16xf32> -> vector<2x16xf32>
    %c0_13 = arith.constant 0 : index
    %c0_14 = arith.constant 0 : index
    %13 = vector.load %arg6[%c0_13, %c0_14] : memref<2x64xf32, #tpu.memory_space<vmem>>, vector<2x64xf32>
    %14 = arith.truncf %13 : vector<2x64xf32> to vector<2x64xbf16>
    %15 = arith.truncf %6 : vector<16x64xf32> to vector<16x64xbf16>
    %cst_15 = arith.constant dense<0.000000e+00> : vector<2x16xf32>
    %16 = tpu.matmul %14, %15, %cst_15 {dimension_numbers = #tpu.dot_dimension_numbers<[1], [1], [0], [0], [0, 0, 1, 0], [], []>} : vector<2x64xbf16>, vector<16x64xbf16>, vector<2x16xf32> -> vector<2x16xf32>
    %17 = arith.addf %12, %16 : vector<2x16xf32>
    %c0_16 = arith.constant 0 : index
    %c0_17 = arith.constant 0 : index
    %18 = vector.load %arg7[%c0_16, %c0_17] : memref<2x1xf32, #tpu.memory_space<vmem>>, vector<2x1xf32>
    %19 = vector.broadcast %18 : vector<2x1xf32> to vector<2x16xf32>
    %20 = arith.addf %17, %19 : vector<2x16xf32>
    %cst_18 = arith.constant 0.000000e+00 : f32
    %21 = vector.broadcast %cst_18 : f32 to vector<1x16xf32>
    %22 = arith.cmpf ogt, %8, %21 : vector<1x16xf32>
    %cst_19 = arith.constant -1.000000e+30 : f32
    %23 = vector.shape_cast %22 : vector<1x16xi1> to vector<1x16xi1>
    %24 = vector.broadcast %23 : vector<1x16xi1> to vector<2x16xi1>
    %25 = vector.broadcast %cst_19 : f32 to vector<2x16xf32>
    %26 = arith.select %24, %20, %25 : vector<2x16xi1>, vector<2x16xf32>
    %cst_20 = arith.constant dense<0xFF800000> : vector<2xf32>
    %27 = vector.multi_reduction <maximumf>, %26, %cst_20 [1] : vector<2x16xf32> to vector<2xf32>
    %28 = vector.shape_cast %27 : vector<2xf32> to vector<2x1xf32>
    %29 = vector.broadcast %28 : vector<2x1xf32> to vector<2x16xf32>
    %30 = arith.subf %26, %29 : vector<2x16xf32>
    %31 = math.exp %30 : vector<2x16xf32>
    %cst_21 = arith.constant dense<0.000000e+00> : vector<2xf32>
    %32 = vector.multi_reduction <add>, %31, %cst_21 [1] : vector<2x16xf32> to vector<2xf32>
    %33 = vector.shape_cast %32 : vector<2xf32> to vector<2x1xf32>
    %34 = math.log %33 : vector<2x1xf32>
    %35 = vector.broadcast %34 : vector<2x1xf32> to vector<2x16xf32>
    %36 = arith.subf %30, %35 : vector<2x16xf32>
    %c0_22 = arith.constant 0 : index
    %c0_23 = arith.constant 0 : index
    %c0_24 = arith.constant 0 : index
    %37 = vector.load %arg8[%c0_22, %c0_23, %c0_24] : memref<1x2x16xf32, #tpu.memory_space<vmem>>, vector<1x2x16xf32>
    %38 = vector.shape_cast %37 : vector<1x2x16xf32> to vector<2x16xf32>
    %39 = vector.shape_cast %36 : vector<2x16xf32> to vector<1x2x16xf32>
    tpu.vector_store %arg8[%c0_22, %c0_23, %c0_24], %39 {strides = array<i32>} : memref<1x2x16xf32, #tpu.memory_space<vmem>>, vector<1x2x16xf32>,
    return
  }
  func.func @transform_0(%arg0: i32) -> (i32, i32, i32) {
    %c0_i32 = arith.constant 0 : i32
    %c0_i32_0 = arith.constant 0 : i32
    %c0_i32_1 = arith.constant 0 : i32
    return %arg0, %c0_i32, %c0_i32_0 : i32, i32, i32
  }
  func.func @transform_1(%arg0: i32) -> (i32, i32, i32) {
    %c0_i32 = arith.constant 0 : i32
    %c0_i32_0 = arith.constant 0 : i32
    %c0_i32_1 = arith.constant 0 : i32
    return %arg0, %c0_i32, %c0_i32_0 : i32, i32, i32
  }
  func.func @transform_2(%arg0: i32) -> (i32, i32, i32) {
    %c0_i32 = arith.constant 0 : i32
    %c0_i32_0 = arith.constant 0 : i32
    %c0_i32_1 = arith.constant 0 : i32
    return %arg0, %c0_i32, %c0_i32_0 : i32, i32, i32
  }
  func.func @transform_3(%arg0: i32) -> (i32, i32, i32) {
    %c0_i32 = arith.constant 0 : i32
    %c0_i32_0 = arith.constant 0 : i32
    %c0_i32_1 = arith.constant 0 : i32
    return %arg0, %c0_i32, %c0_i32_0 : i32, i32, i32
  }
  func.func @transform_4(%arg0: i32) -> (i32, i32) {
    %c0_i32 = arith.constant 0 : i32
    %c0_i32_0 = arith.constant 0 : i32
    %c0_i32_1 = arith.constant 0 : i32
    return %c0_i32, %c0_i32_0 : i32, i32
  }
  func.func @transform_5(%arg0: i32) -> (i32, i32) {
    %c0_i32 = arith.constant 0 : i32
    %c0_i32_0 = arith.constant 0 : i32
    %c0_i32_1 = arith.constant 0 : i32
    return %c0_i32, %c0_i32_0 : i32, i32
  }
  func.func @transform_6(%arg0: i32) -> (i32, i32) {
    %c0_i32 = arith.constant 0 : i32
    %c0_i32_0 = arith.constant 0 : i32
    %c0_i32_1 = arith.constant 0 : i32
    return %c0_i32, %c0_i32_0 : i32, i32
  }
  func.func @transform_7(%arg0: i32) -> (i32, i32, i32) {
    %c0_i32 = arith.constant 0 : i32
    %c0_i32_0 = arith.constant 0 : i32
    %c0_i32_1 = arith.constant 0 : i32
    return %arg0, %c0_i32, %c0_i32_0 : i32, i32, i32
  }
}

</mosaic_0001>

<bundles_post_ra>
// kernel: bidaf_selfatt_forward.17
= control target key start
LH: loop header
LB: loop body
LE: loop exit
PB: predicated region body
PF: predicated region fallthrough
CT: control target
= control target key end

     0   :  { %vm31_vm0 = vcmask 130048   ;;  %s160_s1 = inlined_call_operand.vmem [shape: f32[16,128], index: 1, kind: input, shape index: {}]   ;;  %s161_s0 = inlined_call_operand.vmem [shape: f32[32,16], index: 0, kind: input, shape index: {}]   ;;  %s162_s2 = inlined_call_operand.vmem [shape: f32[1,128], index: 2, kind: input, shape index: {}]   ;;  %s163_s3 = inlined_call_operand.vmem [shape: f32[32,128], index: 3, kind: output, shape index: {}]  }
   0x1   :  { %v19_v0 = vld [vmem:[%s160_s1] sm:$0xff]  ;;  %v20_v1 = vld [vmem:[%s160_s1 + $0x8] sm:$0xff]  ;;  %v17_v5 = vld [vmem:[%s161_s0 + $0x10] sm:$0xff] }
   0x2   :  { %v15_v2 = vld [vmem:[%s161_s0] sm:$0xff]  ;;  %v23_v3 = vpack.c.bf16 %v20_v1, %v19_v0  ;;  %v16_v4 = vld [vmem:[%s161_s0 + $0x8] sm:$0xff]  ;;  %v18_v6 = vld [vmem:[%s161_s0 + $0x18] sm:$0xff] }
   0x3   :  { %v21_v7 = vpack.c.bf16 %v16_v4, %v15_v2  ;;  %v22_v8 = vpack.c.bf16 %v18_v6, %v17_v5  ;;  %v95_v9 = vld [vmem:[%s162_s2] ss:$0 sm:$0xff] }
   0x4   :  { %101 = vmatprep.subr.bf16.mxu0 %v23_v3 }
   0x5   :  { %102 = vmatpush3.bf16.msra.mxu0 %v23_v3  ;;  %103 = vmatprep.mubr.msk.bf16.mxu0 %vm31_vm0, %v21_v7 }
   0x8   :  { %104 = vmatmul.mubr.msk.bf16.vlgmr.msra.gmra.mxu0 %vm31_vm0, %v22_v8 }
  0xc8   :  { %v105_v10 = vpop.f32.mrf.mxu0 }
  0xc9   :  { %v81_v11 = vadd.f32 %v105_v10, %v95_v9 }
  0xca   :  { %v72_v12 = vpop.f32.mrf.mxu0 }
  0xcb   :  { %89 = vst [vmem:[%s163_s3 + $0x10] sm:$0xff] %v81_v11  ;;  %v73_v13 = vadd.f32 %v95_v9, %v72_v12 }
  0xcc   :  { %v106_v14 = vpop.f32.mrf.mxu0 }
  0xcd   :  { %87 = vst [vmem:[%s163_s3] sm:$0xff] %v73_v13  ;;  %v84_v15 = vadd.f32 %v106_v14, %v95_v9 }
  0xce   :  { %v75_v16 = vpop.f32.mrf.mxu0 }
  0xcf   :  { %90 = vst [vmem:[%s163_s3 + $0x18] sm:$0xff] %v84_v15  ;;  %v76_v17 = vadd.f32 %v95_v9, %v75_v16 }
  0xd1   :  { %88 = vst [vmem:[%s163_s3 + $0x8] sm:$0xff] %v76_v17 }

// kernel: bidaf_selfatt_forward.15
= control target key start
LH: loop header
LB: loop body
LE: loop exit
PB: predicated region body
PF: predicated region fallthrough
CT: control target
= control target key end

     0   :  { %vm54_vm0 = vcmask 1043456   ;;  %vm47_vm1 = vcmask 195584   ;;  %vm119_vm2 = vcmask 130048   ;;  %s719_s1 = inlined_call_operand.vmem [shape: f32[24,16], index: 1, kind: input, shape index: {}]   ;;  %s720_s0 = inlined_call_operand.vmem [shape: f32[32,24], index: 0, kind: input, shape index: {}]   ;;  %s721_s2 = inlined_call_operand.vmem [shape: f32[16,16], index: 2, kind: input, shape index: {}]   ;;  %s722_s4 = inlined_call_operand.vmem [shape: f32[16,16], index: 4, kind: input, shape index: {}]   ;;  %s723_s8 = inlined_call_operand.vmem [shape: f32[16,16], index: 8, kind: input, shape index: {}]   ;;  %s724_s6 = inlined_call_operand.vmem [shape: f32[16,16], index: 6, kind: input, shape index: {}]   ;;  %s725_s5 = inlined_call_operand.vmem [shape: f32[1,16], index: 5, kind: input, shape index: {}]   ;;  %s726_s3 = inlined_call_operand.vmem [shape: f32[1,16], index: 3, kind: input, shape index: {}]   ;;  %s727_s9 = inlined_call_operand.vmem [shape: f32[1,16], index: 9, kind: input, shape index: {}]   ;;  %s728_s7 = inlined_call_operand.vmem [shape: f32[1,16], index: 7, kind: input, shape index: {}]   ;;  %s729_s10 = inlined_call_operand.vmem [shape: f32[32,16], index: 10, kind: output, shape index: {}]  }
   0x1   :  { %v42_v0 = vld [vmem:[%s719_s1 + $0x10] sm:$0xff]  ;;  %v40_v1 = vld [vmem:[%s719_s1] sm:$0xff]  ;;  %v41_v2 = vld [vmem:[%s719_s1 + $0x8] sm:$0xff] }
   0x2   :  { %v46_v3 = vpack.c.bf16 %v42_v0, %v42_v0  ;;  %v45_v4 = vpack.c.bf16 %v41_v2, %v40_v1  ;;  %v36_v5 = vld [vmem:[%s720_s0] sm:$0xff]  ;;  %v37_v6 = vld [vmem:[%s720_s0 + $0x8] sm:$0xff]  ;;  %v38_v9 = vld [vmem:[%s720_s0 + $0x10] sm:$0xff] }
   0x3   :  { %v43_v7 = vpack.c.bf16 %v37_v6, %v36_v5  ;;  %v39_v10 = vld [vmem:[%s720_s0 + $0x18] sm:$0xff]  ;;  %v107_v12 = vld [vmem:[%s721_s2] sm:$0xff]  ;;  %v108_v13 = vld [vmem:[%s721_s2 + $0x8] sm:$0xff] }
   0x4   :  { %526 = vmatprep.subr.msk.bf16.mxu0 %vm54_vm0, %v46_v3  ;;  %v56_v8 = vsel %vm54_vm0, %v46_v3, 0  ;;  %v44_v11 = vpack.c.bf16 %v39_v10, %v38_v9  ;;  %v111_v14 = vpack.c.bf16 %v108_v13, %v107_v12  ;;  %v179_v15 = vld [vmem:[%s722_s4] sm:$0xff]  ;;  %v180_v16 = vld [vmem:[%s722_s4 + $0x8] sm:$0xff] }
   0x5   :  { %495 = vmatpush3.bf16.msra.mxu0 %v56_v8  ;;  %498 = vmatprep.mubr.msk.bf16.mxu0 %vm47_vm1, %v43_v7  ;;  %v181_v17 = vpack.c.bf16 %v180_v16, %v179_v15  ;;  %v349_v24 = vld [vmem:[%s723_s8] sm:$0xff]  ;;  %v350_v25 = vld [vmem:[%s723_s8 + $0x8] sm:$0xff] }
   0x6   :  { %496 = vmatprep.subr.bf16.mxu0 %v45_v4  ;;  %502 = vmatprep.subr.bf16.mxu1 %v111_v14  ;;  %v278_v26 = vld [vmem:[%s724_s6] sm:$0xff]  ;;  %v351_v27 = vpack.c.bf16 %v350_v25, %v349_v24  ;;  %v279_v28 = vld [vmem:[%s724_s6 + $0x8] sm:$0xff] }
   0x7   :  { %503 = vmatpush3.bf16.msra.mxu1 %v111_v14  ;;  %v282_v29 = vpack.c.bf16 %v279_v28, %v278_v26  ;;  %v461_v34 = vld [vmem:[%s725_s5] ss:$0 sm:$0xff] }
   0x8   :  { %508 = vmatprep.subr.bf16.mxu1 %v181_v17  ;;  %v458_v56 = vld [vmem:[%s726_s3] ss:$0 sm:$0xff] }
   0x9   :  { %497 = vmatpush3.bf16.msra.mxu0 %v45_v4 }
   0xa   :  { %514 = vmatprep.subr.bf16.mxu0 %v282_v29 }
   0xc   :  { %499 = vmatmul.mubr.msk.bf16.vlgmr.msra.gmra.mxu0 %vm47_vm1, %v44_v11 }
   0xd   :  { %515 = vmatpush3.bf16.msra.mxu0 %v282_v29 }
  0xcc   :  { %v647_v18 = vpop.f32.mrf.mxu0 }
  0xce   :  { %v649_v19 = vpop.f32.mrf.mxu0 }
  0xd0   :  { %v651_v20 = vpop.f32.mrf.mxu0 }
  0xd1   :  { %v110_v23 = vpack.c.bf16 %v651_v20, %v647_v18 }
  0xd2   :  { %v653_v21 = vpop.f32.mrf.mxu0 }
  0xd3   :  { %v109_v22 = vpack.c.bf16 %v653_v21, %v649_v19 }
  0xd5   :  { %504 = vmatprep.mubr.msk.bf16.mxu1 %vm119_vm2, %v109_v22 }
  0xd6   :  { %505 = vmatmul.mubr.msk.bf16.vlgmr.msra.gmra.mxu1 %vm119_vm2, %v110_v23 }
  0xd7   :  { %509 = vmatpush3.bf16.msra.mxu1 %v181_v17  ;;  %510 = vmatprep.mubr.msk.bf16.mxu1 %vm119_vm2, %v109_v22 }
  0xd8   :  { %520 = vmatprep.subr.bf16.mxu1 %v351_v27 }
  0xde   :  { %511 = vmatmul.mubr.msk.bf16.vlgmr.msra.gmra.mxu1 %vm119_vm2, %v110_v23 }
  0xdf   :  { %521 = vmatpush3.bf16.msra.mxu1 %v351_v27 }
 0x196   :  { %v506_v30 = vpop.f32.mrf.mxu1 }
 0x197   :  { %v169_v63 = vadd.f32 %v506_v30, %v458_v56 }
 0x198   :  { %v160_v31 = vpop.f32.mrf.mxu1 }
 0x199   :  { %v161_v58 = vadd.f32 %v458_v56, %v160_v31  ;;  %v177_v9 = vmax.f32 %v169_v63, 0.0 }
 0x19a   :  { %v507_v32 = vpop.f32.mrf.mxu1 }
 0x19b   :  { %v172_v59 = vadd.f32 %v507_v32, %v458_v56  ;;  %v175_v3 = vmax.f32 %v161_v58, 0.0 }
 0x19c   :  { %v163_v33 = vpop.f32.mrf.mxu1 }
 0x19d   :  { %v164_v60 = vadd.f32 %v458_v56, %v163_v33  ;;  %v178_v4 = vmax.f32 %v172_v59, 0.0 }
 0x19e   :  { %v512_v35 = vpop.f32.mrf.mxu1 }
 0x19f   :  { %v232_v36 = vadd.f32 %v512_v35, %v461_v34  ;;  %v176_v5 = vmax.f32 %v164_v60, 0.0 }
 0x1a0   :  { %v223_v37 = vpop.f32.mrf.mxu1 }
 0x1a1   :  { %v466_v38 = vmul.f32 -1.442695, %v232_v36  ;;  %v224_v39 = vadd.f32 %v461_v34, %v223_v37 }
 0x1a2   :  { %v513_v40 = vpop.f32.mrf.mxu1 }
 0x1a3   :  { %527 = vpow2.f32 %v466_v38  ;;  %v464_v41 = vmul.f32 -1.442695, %v224_v39  ;;  %v235_v42 = vadd.f32 %v513_v40, %v461_v34 }
 0x1a4   :  { %v226_v43 = vpop.f32.mrf.mxu1 }
 0x1a5   :  { %529 = vpow2.f32 %v464_v41  ;;  %v467_v44 = vmul.f32 -1.442695, %v235_v42  ;;  %v227_v45 = vadd.f32 %v461_v34, %v226_v43 }
 0x1a7   :  { %531 = vpow2.f32 %v467_v44  ;;  %v465_v46 = vmul.f32 -1.442695, %v227_v45  ;;  %v468_v45 = vld [vmem:[%s728_s7] ss:$0 sm:$0xff] }
 0x1a9   :  { %533 = vpow2.f32 %v465_v46 }
 0x1b0   :  { %v528_v47 = vpop.eup %527 }
 0x1b1   :  { %v252_v48 = vadd.f32 1.0, %v528_v47 }
 0x1b2   :  { %v530_v49 = vpop.eup %529 }
 0x1b3   :  { %v250_v50 = vadd.f32 1.0, %v530_v49  ;;  %535 = vrcp.f32 %v252_v48 }
 0x1b4   :  { %v532_v51 = vpop.eup %531 }
 0x1b5   :  { %537 = vrcp.f32 %v250_v50  ;;  %v253_v52 = vadd.f32 1.0, %v532_v51 }
 0x1b6   :  { %v534_v53 = vpop.eup %533 }
 0x1b7   :  { %539 = vrcp.f32 %v253_v52  ;;  %v251_v54 = vadd.f32 1.0, %v534_v53 }
 0x1b9   :  { %541 = vrcp.f32 %v251_v54 }
 0x1c0   :  { %v536_v55 = vpop.eup %535 }
 0x1c1   :  { %v268_v0 = vsub.f32 1.0, %v536_v55  ;;  %v264_v15 = vmul.f32 %v536_v55, %v177_v9 }
 0x1c2   :  { %v538_v57 = vpop.eup %537 }
 0x1c3   :  { %v266_v61 = vsub.f32 1.0, %v538_v57  ;;  %v272_v11 = vmul.f32 %v647_v18, %v268_v0  ;;  %v262_v12 = vmul.f32 %v538_v57, %v175_v3  ;;  %v471_v18 = vld [vmem:[%s727_s9] ss:$0 sm:$0xff] }
 0x1c4   :  { %v540_v62 = vpop.eup %539 }
 0x1c5   :  { %v269_v1 = vsub.f32 1.0, %v540_v62  ;;  %v270_v7 = vmul.f32 %v266_v61, %v649_v19  ;;  %v265_v10 = vmul.f32 %v540_v62, %v178_v4  ;;  %v276_v23 = vadd.f32 %v272_v11, %v264_v15 }
 0x1c6   :  { %v542_v2 = vpop.eup %541 }
 0x1c7   :  { %v267_v6 = vsub.f32 1.0, %v542_v2  ;;  %v273_v8 = vmul.f32 %v651_v20, %v269_v1  ;;  %v263_v13 = vmul.f32 %v542_v2, %v176_v5  ;;  %v274_v17 = vadd.f32 %v270_v7, %v262_v12 }
 0x1c9   :  { %v271_v14 = vmul.f32 %v267_v6, %v653_v21  ;;  %v685_v16 = vadd.f32 %v273_v8, %v265_v10 }
 0x1cb   :  { %v687_v22 = vadd.f32 %v271_v14, %v263_v13  ;;  %v281_v19 = vpack.c.bf16 %v685_v16, %v276_v23 }
 0x1cd   :  { %v280_v24 = vpack.c.bf16 %v687_v22, %v274_v17 }
 0x1cf   :  { %516 = vmatprep.mubr.msk.bf16.mxu0 %vm119_vm2, %v280_v24  ;;  %522 = vmatprep.mubr.msk.bf16.mxu1 %vm119_vm2, %v280_v24 }
 0x1d0   :  { %517 = vmatmul.mubr.msk.bf16.vlgmr.msra.gmra.mxu0 %vm119_vm2, %v281_v19  ;;  %523 = vmatmul.mubr.msk.bf16.vlgmr.msra.gmra.mxu1 %vm119_vm2, %v281_v19 }
 0x290   :  { %v524_v20 = vpop.f32.mrf.mxu1  ;;  %v518_v39 = vpop.f32.mrf.mxu0 }
 0x291   :  { %v402_v21 = vadd.f32 %v524_v20, %v471_v18  ;;  %v339_v47 = vadd.f32 %v518_v39, %v468_v45 }
 0x292   :  { %v393_v25 = vpop.f32.mrf.mxu1  ;;  %v330_v44 = vpop.f32.mrf.mxu0 }
 0x293   :  { %v476_v26 = vmul.f32 -1.442695, %v402_v21  ;;  %v394_v27 = vadd.f32 %v471_v18, %v393_v25  ;;  %v331_v48 = vadd.f32 %v468_v45, %v330_v44  ;;  %v347_v51 = vmax.f32 %v339_v47, 0.0 }
 0x294   :  { %v525_v28 = vpop.f32.mrf.mxu1  ;;  %v519_v46 = vpop.f32.mrf.mxu0 }
 0x295   :  { %543 = vpow2.f32 %v476_v26  ;;  %v474_v29 = vmul.f32 -1.442695, %v394_v27  ;;  %v405_v30 = vadd.f32 %v525_v28, %v471_v18  ;;  %v345_v54 = vmax.f32 %v331_v48, 0.0 }
 0x296   :  { %v396_v31 = vpop.f32.mrf.mxu1  ;;  %v333_v50 = vpop.f32.mrf.mxu0  ;;  %v342_v55 = vadd.f32 %v519_v46, %v468_v45 }
 0x297   :  { %545 = vpow2.f32 %v474_v29  ;;  %v397_v32 = vadd.f32 %v471_v18, %v396_v31  ;;  %v477_v33 = vmul.f32 -1.442695, %v405_v30  ;;  %v334_v59 = vadd.f32 %v468_v45, %v333_v50 }
 0x298   :  { %v348_v1 = vmax.f32 %v342_v55, 0.0 }
 0x299   :  { %v475_v34 = vmul.f32 -1.442695, %v397_v32  ;;  %547 = vpow2.f32 %v477_v33  ;;  %v346_v4 = vmax.f32 %v334_v59, 0.0 }
 0x29b   :  { %549 = vpow2.f32 %v475_v34 }
 0x2a2   :  { %v544_v35 = vpop.eup %543 }
 0x2a3   :  { %v422_v36 = vadd.f32 1.0, %v544_v35 }
 0x2a4   :  { %v546_v37 = vpop.eup %545 }
 0x2a5   :  { %551 = vrcp.f32 %v422_v36  ;;  %v420_v38 = vadd.f32 1.0, %v546_v37 }
 0x2a6   :  { %v548_v40 = vpop.eup %547 }
 0x2a7   :  { %553 = vrcp.f32 %v420_v38  ;;  %v423_v42 = vadd.f32 1.0, %v548_v40 }
 0x2a8   :  { %v550_v41 = vpop.eup %549 }
 0x2a9   :  { %v421_v43 = vadd.f32 1.0, %v550_v41  ;;  %555 = vrcp.f32 %v423_v42 }
 0x2ab   :  { %557 = vrcp.f32 %v421_v43 }
 0x2b2   :  { %v552_v49 = vpop.eup %551 }
 0x2b3   :  { %v438_v52 = vsub.f32 1.0, %v552_v49  ;;  %v434_v56 = vmul.f32 %v552_v49, %v347_v51 }
 0x2b4   :  { %v554_v53 = vpop.eup %553 }
 0x2b5   :  { %v442_v57 = vmul.f32 %v438_v52, %v276_v23  ;;  %v436_v58 = vsub.f32 1.0, %v554_v53  ;;  %v432_v62 = vmul.f32 %v554_v53, %v345_v54 }
 0x2b6   :  { %v556_v60 = vpop.eup %555 }
 0x2b7   :  { %v446_v61 = vadd.f32 %v442_v57, %v434_v56  ;;  %v440_v63 = vmul.f32 %v436_v58, %v274_v17  ;;  %v439_v2 = vsub.f32 1.0, %v556_v60  ;;  %v435_v6 = vmul.f32 %v556_v60, %v348_v1 }
 0x2b8   :  { %v558_v0 = vpop.eup %557 }
 0x2b9   :  { %450 = vst.msk [vmem:[%s729_s10 + $0x10] sm:$0xff] %vm119_vm2, %v446_v61  ;;  %v444_v3 = vadd.f32 %v440_v63, %v432_v62  ;;  %v437_v5 = vsub.f32 1.0, %v558_v0  ;;  %v443_v7 = vmul.f32 %v439_v2, %v685_v16  ;;  %v433_v8 = vmul.f32 %v558_v0, %v346_v4 }
 0x2bb   :  { %448 = vst.msk [vmem:[%s729_s10] sm:$0xff] %vm119_vm2, %v444_v3  ;;  %v441_v9 = vmul.f32 %v437_v5, %v687_v22  ;;  %v447_v10 = vadd.f32 %v443_v7, %v435_v6 }
 0x2bd   :  { %v445_v11 = vadd.f32 %v441_v9, %v433_v8  ;;  %451 = vst.msk [vmem:[%s729_s10 + $0x18] sm:$0xff] %vm119_vm2, %v447_v10 }
 0x2bf   :  { %449 = vst.msk [vmem:[%s729_s10 + $0x8] sm:$0xff] %vm119_vm2, %v445_v11 }

// kernel: bidaf_selfatt_forward.18
= control target key start
LH: loop header
LB: loop body
LE: loop exit
PB: predicated region body
PF: predicated region fallthrough
CT: control target
= control target key end

     0   :  { %v453_v6 = vmov 0.0   ;;  %v377_v7 = vmov 0.0   ;;  %s518_s0 = inlined_call_operand.vmem [shape: f32[16,2,128], index: 0, kind: input, shape index: {}]   ;;  %s519_s1 = inlined_call_operand.vmem [shape: f32[16,64], index: 1, kind: input, shape index: {}]   ;;  %s520_s2 = inlined_call_operand.vmem [shape: f32[16,64], index: 2, kind: input, shape index: {}]   ;;  %s521_s3 = inlined_call_operand.vmem [shape: f32[16,2,32], index: 3, kind: output, shape index: {}]  }
   0x1   :  { %v432_v0 = vld [vmem:[%s519_s1] sm:$0xff]  ;;  %v437_v1 = vld [vmem:[%s519_s1 + $0x8] sm:$0xff]  ;;  %s455_s1 = smov 0  }
   0x2   :  { %v442_v2 = vld [vmem:[%s520_s2] sm:$0xff]  ;;  %v17_v3 = vpack.c.bf16 %v437_v1, %v432_v0  ;;  %v449_v4 = vld [vmem:[%s520_s2 + $0x8] sm:$0xff] }
   0x3   :  { %v20_v5 = vpack.c.bf16 %v449_v4, %v442_v2 }
   0x4 LB: > { %v397_v8 = vmov 0.0   ;;  %vm398_vm0 = vmmov 0   ;;  %v33_v9 = vpack.c.bf16 %v379_v7, %v379_v7  ;;  %s399_s2 = smov 16   ;;  %vm37_vm1 = vcmask 130048   ;;  %s400_s20 = smov 64   ;;  %s383_s1 = sphi %s455_s1, %s26_s1   ;;  %v379_v7 = vphi %v377_v7, %v109_v7   ;;  %v375_v6 = vphi %v453_v6, %v103_v6  }
   0x5   : > { %261 = vmatprep.subr.bf16.mxu0 %v397_v8  ;;  %263 = vmatprep.mubr.msk.bf16.mxu0 %vm398_vm0, %v397_v8  ;;  %s29_s21 = ssub.s32 15, %s383_s1  ;;  %s401_s26 = smov 96   ;;  %vm115_vm2 = vcmask 123904  }
   0x6   : > { %262 = vmatpush3.bf16.msra.mxu0 %v20_v5  ;;  %35 = vrot.lane.b32.xlu0 %v33_v9, %s399_s2  ;;  %s467_s22 = sshll.u32 %s29_s21, 1  ;;  %s402_s27 = smov 32  }
   0x7   : > { %s31_s25 = scalar_lea.vmem %s518_s0, %s467_s22  ;;  %s114_s28 = scalar_lea.vmem [#allocation2], %s467_s22 }
   0x8   : > { %v32_v15 = vld [vmem:[%s31_s25] sm:$0x3]  ;;  %s26_s1 = sadd.s32 1, %s383_s1  }
   0x9   : > { %p23_p0 = scmp.ge.s32.totalorder %s26_s1, 16  }
   0xa   :  { %v481_v30 = vmov (%p23_p0), 0.0   ;;  %v483_v31 = vmov (%p23_p0), 0.0   ;;  %s485_s29 = smov (%p23_p0), 0  }
  0x78   : > { %v36_v10 = vpop.permute.xlu0 %35 }
  0x79   : > { %264 = vmatmul.mubr.msk.bf16.vlgmr.msra.gmra.mxu0 %vm37_vm1, %v36_v10 }
 0x139   : > { %v75_v11 = vpop.f32.mrf.mxu0 }
 0x13a   : > { %82 = vrot.lane.b32.xlu0 %v75_v11, %s400_s20 }
 0x13b   : > { %v265_v12 = vpop.f32.mrf.mxu0 }
 0x13d   : > { %v78_v13 = vpop.f32.mrf.mxu0 }
 0x13f   : > { %v266_v14 = vpop.f32.mrf.mxu0 }
 0x1ac   : > { %v83_v16 = vpop.permute.xlu0 %82 }
 0x1ad   : > { %v85_v17 = vadd.f32 %v83_v16, %v32_v15 }
 0x1af   : > { %333 = vtanh.f32 %v85_v17  ;;  %v253_v19 = vmul.f32 -1.442695, %v85_v17 }
 0x1b1   : > { %335 = vpow2.f32 %v253_v19 }
 0x1bc   : > { %v334_v18 = vpop.eup %333 }
 0x1bd   : > { %95 = vrot.lane.b32.xlu1 %v334_v18, %s401_s26 }
 0x1be   : > { %v336_v20 = vpop.eup %335 }
 0x1bf   : > { %v89_v21 = vadd.f32 1.0, %v336_v20 }
 0x1c1   : > { %337 = vrcp.f32 %v89_v21 }
 0x1ce   : > { %v338_v22 = vpop.eup %337 }
 0x1cf   : > { %v93_v25 = vmul.f32 %v375_v6, %v338_v22 }
 0x22f   : > { %v96_v23 = vpop.permute.xlu1 %95 }
 0x230   : > { %v98_v24 = vmul.f32 %v338_v22, %v96_v23 }
 0x232   : > { %100 = vrot.lane.b32.xlu1 %v98_v24, %s399_s2 }
 0x2a4   : > { %v101_v26 = vpop.permute.xlu1 %100 }
 0x2a5   : > { %v103_v6 = vadd.f32 %v101_v26, %v93_v25  }
 0x2a7   : > { %339 = vtanh.f32 %v103_v6 }
 0x2b4   : > { %v340_v27 = vpop.eup %339 }
 0x2b5   : > { %106 = vrot.lane.b32.xlu0 %v340_v27, %s402_s27 }
 0x327   : > { %v107_v28 = vpop.permute.xlu0 %106 }
 0x328   : > { %v109_v7 = vmul.f32 %v338_v22, %v107_v28  }
 0x32a   : > { %111 = vrot.lane.b32.xlu1 %v109_v7, %s399_s2 }
 0x399   :  { %25 = sbr.rel (!%p23_p0) target bundleno = 4 (0x4), region = 51 }
 0x39c   : > { %v112_v29 = vpop.permute.xlu1 %111 }
 0x39d   : > { %116 = vst.msk [vmem:[%s114_s28] sm:$0x3] %vm115_vm2, %v112_v29 }
 0x39e LB: > { %v403_v32 = vmov 0.0   ;;  %vm404_vm3 = vmmov 0   ;;  %v128_v33 = vpack.c.bf16 %v391_v31, %v391_v31  ;;  %s405_s30 = smov 80   ;;  %s498_s4 = sshll.u32 %s395_s29, 1  ;;  %vm213_vm4 = vcmask 254976   ;;  %s395_s29 = sphi %s485_s29, %s122_s29   ;;  %v391_v31 = vphi %v483_v31, %v200_v31   ;;  %v387_v30 = vphi %v481_v30, %v194_v30  }
 0x39f   : > { %267 = vmatprep.subr.bf16.mxu0 %v403_v32  ;;  %269 = vmatprep.mubr.msk.bf16.mxu0 %vm404_vm3, %v403_v32  ;;  %s126_s7 = scalar_lea.vmem %s518_s0, %s498_s4  ;;  %s406_s8 = smov 96  }
 0x3a0   : > { %268 = vmatpush3.bf16.msra.mxu0 %v17_v3  ;;  %130 = vrot.lane.b32.xlu0 %v128_v33, %s405_s30  ;;  %v127_v35 = vld [vmem:[%s126_s7] sm:$0x3]  ;;  %s407_s9 = smov 16   ;;  %s408_s10 = smov 32  }
 0x3a1   : > { %s201_s11 = scalar_lea.vmem [#allocation2], %s498_s4  ;;  %s212_s14 = scalar_lea.vmem %s521_s3, %s498_s4 }
 0x3a2   : > { %s122_s29 = sadd.s32 1, %s395_s29  }
 0x3a3   : > { %p119_p1 = scmp.ge.s32.totalorder %s122_s29, 16  }
 0x3a4   : > { %v202_v51 = vld [vmem:[%s201_s11] sm:$0x3] }
 0x412   : > { %v131_v34 = vpop.permute.xlu0 %130 }
 0x413   : > { %270 = vmatmul.mubr.msk.bf16.vlgmr.msra.gmra.mxu0 %vm37_vm1, %v131_v34 }
 0x4d3   : > { %v170_v36 = vpop.f32.mrf.mxu0 }
 0x4d4   : > { %v176_v37 = vadd.f32 %v170_v36, %v127_v35 }
 0x4d5   : > { %v271_v38 = vpop.f32.mrf.mxu0 }
 0x4d6   : > { %341 = vtanh.f32 %v176_v37  ;;  %v256_v42 = vmul.f32 -1.442695, %v176_v37 }
 0x4d7   : > { %v173_v39 = vpop.f32.mrf.mxu0 }
 0x4d8   : > { %343 = vpow2.f32 %v256_v42 }
 0x4d9   : > { %v272_v40 = vpop.f32.mrf.mxu0 }
 0x4e3   : > { %v342_v41 = vpop.eup %341 }
 0x4e4   : > { %186 = vrot.lane.b32.xlu0 %v342_v41, %s406_s8 }
 0x4e5   : > { %v344_v43 = vpop.eup %343 }
 0x4e6   : > { %v180_v44 = vadd.f32 1.0, %v344_v43 }
 0x4e8   : > { %345 = vrcp.f32 %v180_v44 }
 0x4f5   : > { %v346_v45 = vpop.eup %345 }
 0x4f6   : > { %v184_v48 = vmul.f32 %v387_v30, %v346_v45 }
 0x556   : > { %v187_v46 = vpop.permute.xlu0 %186 }
 0x557   : > { %v189_v47 = vmul.f32 %v346_v45, %v187_v46 }
 0x559   : > { %191 = vrot.lane.b32.xlu1 %v189_v47, %s407_s9 }
 0x5cb   : > { %v192_v49 = vpop.permute.xlu1 %191 }
 0x5cc   : > { %v194_v30 = vadd.f32 %v192_v49, %v184_v48  }
 0x5ce   : > { %347 = vtanh.f32 %v194_v30 }
 0x5db   : > { %v348_v50 = vpop.eup %347 }
 0x5dc   : > { %197 = vrot.lane.b32.xlu1 %v348_v50, %s408_s10 }
 0x5e0   : > { %208 = vrot.lane.b32.xlu1 %v202_v51, %s407_s9 }
 0x64e   : > { %v198_v52 = vpop.permute.xlu1 %197 }
 0x64f   : > { %v200_v31 = vmul.f32 %v346_v45, %v198_v52  }
 0x651   : > { %204 = vrot.lane.b32.xlu0 %v200_v31, %s405_s30 }
 0x652   : > { %v209_v53 = vpop.permute.xlu1 %208 }
 0x6c1   :  { %121 = sbr.rel (!%p119_p1) target bundleno = 926 (0x39e), region = 62 }
 0x6c3   : > { %v205_v54 = vpop.permute.xlu0 %204 }
 0x6c4   : > { %v211_v55 = vsel %vm37_vm1, %v205_v54, %v209_v53 }
 0x6c5   : > { %214 = vst.msk [vmem:[%s212_s14] sm:$0x3] %vm213_vm4, %v211_v55 }

// kernel: bidaf_selfatt_forward.19
= control target key start
LH: loop header
LB: loop body
LE: loop exit
PB: predicated region body
PF: predicated region fallthrough
CT: control target
= control target key end

     0   :  { %v91_v0 = vmov 0.0   ;;  %vm92_vm0 = vmmov 0   ;;  %vm28_vm1 = vcmask 130048   ;;  %s134_s1 = inlined_call_operand.vmem [shape: f32[16,128], index: 1, kind: input, shape index: {}]   ;;  %s135_s0 = inlined_call_operand.vmem [shape: f32[16,16], index: 0, kind: input, shape index: {}]   ;;  %s136_s2 = inlined_call_operand.vmem [shape: f32[1,128], index: 2, kind: input, shape index: {}]   ;;  %s137_s3 = inlined_call_operand.vmem [shape: f32[16,128], index: 3, kind: output, shape index: {}]  }
   0x1   :  { %83 = vmatprep.subr.bf16.mxu0 %v91_v0  ;;  %v17_v1 = vld [vmem:[%s134_s1] sm:$0xff]  ;;  %v18_v2 = vld [vmem:[%s134_s1 + $0x8] sm:$0xff]  ;;  %85 = vmatprep.mubr.msk.bf16.mxu0 %vm92_vm0, %v91_v0 }
   0x2   :  { %v15_v3 = vld [vmem:[%s135_s0] sm:$0xff]  ;;  %v20_v4 = vpack.c.bf16 %v18_v2, %v17_v1  ;;  %v16_v5 = vld [vmem:[%s135_s0 + $0x8] sm:$0xff] }
   0x3   :  { %v19_v6 = vpack.c.bf16 %v16_v5, %v15_v3  ;;  %v79_v7 = vld [vmem:[%s136_s2] ss:$0 sm:$0xff] }
   0x4   :  { %84 = vmatpush3.bf16.msra.mxu0 %v20_v4 }
   0x7   :  { %86 = vmatmul.mubr.msk.bf16.vlgmr.msra.gmra.mxu0 %vm28_vm1, %v19_v6 }
  0xc7   :  { %v66_v8 = vpop.f32.mrf.mxu0 }
  0xc8   :  { %v67_v9 = vadd.f32 %v79_v7, %v66_v8 }
  0xc9   :  { %v87_v10 = vpop.f32.mrf.mxu0 }
  0xca   :  { %73 = vst [vmem:[%s137_s3] sm:$0xff] %v67_v9 }
  0xcb   :  { %v69_v11 = vpop.f32.mrf.mxu0 }
  0xcc   :  { %v70_v12 = vadd.f32 %v79_v7, %v69_v11 }
  0xcd   :  { %v88_v13 = vpop.f32.mrf.mxu0 }
  0xce   :  { %74 = vst [vmem:[%s137_s3 + $0x8] sm:$0xff] %v70_v12 }

// kernel: bidaf_selfatt_forward.20
= control target key start
LH: loop header
LB: loop body
LE: loop exit
PB: predicated region body
PF: predicated region fallthrough
CT: control target
= control target key end

     0   :  { %v453_v6 = vmov 0.0   ;;  %v377_v7 = vmov 0.0   ;;  %s518_s0 = inlined_call_operand.vmem [shape: f32[8,2,128], index: 0, kind: input, shape index: {}]   ;;  %s519_s1 = inlined_call_operand.vmem [shape: f32[16,64], index: 1, kind: input, shape index: {}]   ;;  %s520_s2 = inlined_call_operand.vmem [shape: f32[16,64], index: 2, kind: input, shape index: {}]   ;;  %s521_s3 = inlined_call_operand.vmem [shape: f32[8,2,32], index: 3, kind: output, shape index: {}]  }
   0x1   :  { %v432_v0 = vld [vmem:[%s519_s1] sm:$0xff]  ;;  %v437_v1 = vld [vmem:[%s519_s1 + $0x8] sm:$0xff]  ;;  %s455_s1 = smov 0  }
   0x2   :  { %v442_v2 = vld [vmem:[%s520_s2] sm:$0xff]  ;;  %v17_v3 = vpack.c.bf16 %v437_v1, %v432_v0  ;;  %v449_v4 = vld [vmem:[%s520_s2 + $0x8] sm:$0xff] }
   0x3   :  { %v20_v5 = vpack.c.bf16 %v449_v4, %v442_v2 }
   0x4 LB: > { %v397_v8 = vmov 0.0   ;;  %vm398_vm0 = vmmov 0   ;;  %v33_v9 = vpack.c.bf16 %v379_v7, %v379_v7  ;;  %s399_s2 = smov 16   ;;  %vm37_vm1 = vcmask 130048   ;;  %s400_s20 = smov 64   ;;  %s383_s1 = sphi %s455_s1, %s26_s1   ;;  %v379_v7 = vphi %v377_v7, %v109_v7   ;;  %v375_v6 = vphi %v453_v6, %v103_v6  }
   0x5   : > { %261 = vmatprep.subr.bf16.mxu0 %v397_v8  ;;  %263 = vmatprep.mubr.msk.bf16.mxu0 %vm398_vm0, %v397_v8  ;;  %s29_s21 = ssub.s32 7, %s383_s1  ;;  %s401_s26 = smov 96   ;;  %vm115_vm2 = vcmask 123904  }
   0x6   : > { %262 = vmatpush3.bf16.msra.mxu0 %v20_v5  ;;  %35 = vrot.lane.b32.xlu0 %v33_v9, %s399_s2  ;;  %s467_s22 = sshll.u32 %s29_s21, 1  ;;  %s402_s27 = smov 32  }
   0x7   : > { %s31_s25 = scalar_lea.vmem %s518_s0, %s467_s22  ;;  %s114_s28 = scalar_lea.vmem [#allocation2], %s467_s22 }
   0x8   : > { %v32_v15 = vld [vmem:[%s31_s25] sm:$0x3]  ;;  %s26_s1 = sadd.s32 1, %s383_s1  }
   0x9   : > { %p23_p0 = scmp.ge.s32.totalorder %s26_s1, 8  }
   0xa   :  { %v481_v30 = vmov (%p23_p0), 0.0   ;;  %v483_v31 = vmov (%p23_p0), 0.0   ;;  %s485_s29 = smov (%p23_p0), 0  }
  0x78   : > { %v36_v10 = vpop.permute.xlu0 %35 }
  0x79   : > { %264 = vmatmul.mubr.msk.bf16.vlgmr.msra.gmra.mxu0 %vm37_vm1, %v36_v10 }
 0x139   : > { %v75_v11 = vpop.f32.mrf.mxu0 }
 0x13a   : > { %82 = vrot.lane.b32.xlu0 %v75_v11, %s400_s20 }
 0x13b   : > { %v265_v12 = vpop.f32.mrf.mxu0 }
 0x13d   : > { %v78_v13 = vpop.f32.mrf.mxu0 }
 0x13f   : > { %v266_v14 = vpop.f32.mrf.mxu0 }
 0x1ac   : > { %v83_v16 = vpop.permute.xlu0 %82 }
 0x1ad   : > { %v85_v17 = vadd.f32 %v83_v16, %v32_v15 }
 0x1af   : > { %333 = vtanh.f32 %v85_v17  ;;  %v253_v19 = vmul.f32 -1.442695, %v85_v17 }
 0x1b1   : > { %335 = vpow2.f32 %v253_v19 }
 0x1bc   : > { %v334_v18 = vpop.eup %333 }
 0x1bd   : > { %95 = vrot.lane.b32.xlu1 %v334_v18, %s401_s26 }
 0x1be   : > { %v336_v20 = vpop.eup %335 }
 0x1bf   : > { %v89_v21 = vadd.f32 1.0, %v336_v20 }
 0x1c1   : > { %337 = vrcp.f32 %v89_v21 }
 0x1ce   : > { %v338_v22 = vpop.eup %337 }
 0x1cf   : > { %v93_v25 = vmul.f32 %v375_v6, %v338_v22 }
 0x22f   : > { %v96_v23 = vpop.permute.xlu1 %95 }
 0x230   : > { %v98_v24 = vmul.f32 %v338_v22, %v96_v23 }
 0x232   : > { %100 = vrot.lane.b32.xlu1 %v98_v24, %s399_s2 }
 0x2a4   : > { %v101_v26 = vpop.permute.xlu1 %100 }
 0x2a5   : > { %v103_v6 = vadd.f32 %v101_v26, %v93_v25  }
 0x2a7   : > { %339 = vtanh.f32 %v103_v6 }
 0x2b4   : > { %v340_v27 = vpop.eup %339 }
 0x2b5   : > { %106 = vrot.lane.b32.xlu0 %v340_v27, %s402_s27 }
 0x327   : > { %v107_v28 = vpop.permute.xlu0 %106 }
 0x328   : > { %v109_v7 = vmul.f32 %v338_v22, %v107_v28  }
 0x32a   : > { %111 = vrot.lane.b32.xlu1 %v109_v7, %s399_s2 }
 0x399   :  { %25 = sbr.rel (!%p23_p0) target bundleno = 4 (0x4), region = 51 }
 0x39c   : > { %v112_v29 = vpop.permute.xlu1 %111 }
 0x39d   : > { %116 = vst.msk [vmem:[%s114_s28] sm:$0x3] %vm115_vm2, %v112_v29 }
 0x39e LB: > { %v403_v32 = vmov 0.0   ;;  %vm404_vm3 = vmmov 0   ;;  %v128_v33 = vpack.c.bf16 %v391_v31, %v391_v31  ;;  %s405_s30 = smov 80   ;;  %s498_s4 = sshll.u32 %s395_s29, 1  ;;  %vm213_vm4 = vcmask 254976   ;;  %s395_s29 = sphi %s485_s29, %s122_s29   ;;  %v391_v31 = vphi %v483_v31, %v200_v31   ;;  %v387_v30 = vphi %v481_v30, %v194_v30  }
 0x39f   : > { %267 = vmatprep.subr.bf16.mxu0 %v403_v32  ;;  %269 = vmatprep.mubr.msk.bf16.mxu0 %vm404_vm3, %v403_v32  ;;  %s126_s7 = scalar_lea.vmem %s518_s0, %s498_s4  ;;  %s406_s8 = smov 96  }
 0x3a0   : > { %268 = vmatpush3.bf16.msra.mxu0 %v17_v3  ;;  %130 = vrot.lane.b32.xlu0 %v128_v33, %s405_s30  ;;  %v127_v35 = vld [vmem:[%s126_s7] sm:$0x3]  ;;  %s407_s9 = smov 16   ;;  %s408_s10 = smov 32  }
 0x3a1   : > { %s201_s11 = scalar_lea.vmem [#allocation2], %s498_s4  ;;  %s212_s14 = scalar_lea.vmem %s521_s3, %s498_s4 }
 0x3a2   : > { %s122_s29 = sadd.s32 1, %s395_s29  }
 0x3a3   : > { %p119_p1 = scmp.ge.s32.totalorder %s122_s29, 8  }
 0x3a4   : > { %v202_v51 = vld [vmem:[%s201_s11] sm:$0x3] }
 0x412   : > { %v131_v34 = vpop.permute.xlu0 %130 }
 0x413   : > { %270 = vmatmul.mubr.msk.bf16.vlgmr.msra.gmra.mxu0 %vm37_vm1, %v131_v34 }
 0x4d3   : > { %v170_v36 = vpop.f32.mrf.mxu0 }
 0x4d4   : > { %v176_v37 = vadd.f32 %v170_v36, %v127_v35 }
 0x4d5   : > { %v271_v38 = vpop.f32.mrf.mxu0 }
 0x4d6   : > { %341 = vtanh.f32 %v176_v37  ;;  %v256_v42 = vmul.f32 -1.442695, %v176_v37 }
 0x4d7   : > { %v173_v39 = vpop.f32.mrf.mxu0 }
 0x4d8   : > { %343 = vpow2.f32 %v256_v42 }
 0x4d9   : > { %v272_v40 = vpop.f32.mrf.mxu0 }
 0x4e3   : > { %v342_v41 = vpop.eup %341 }
 0x4e4   : > { %186 = vrot.lane.b32.xlu0 %v342_v41, %s406_s8 }
 0x4e5   : > { %v344_v43 = vpop.eup %343 }
 0x4e6   : > { %v180_v44 = vadd.f32 1.0, %v344_v43 }
 0x4e8   : > { %345 = vrcp.f32 %v180_v44 }
 0x4f5   : > { %v346_v45 = vpop.eup %345 }
 0x4f6   : > { %v184_v48 = vmul.f32 %v387_v30, %v346_v45 }
 0x556   : > { %v187_v46 = vpop.permute.xlu0 %186 }
 0x557   : > { %v189_v47 = vmul.f32 %v346_v45, %v187_v46 }
 0x559   : > { %191 = vrot.lane.b32.xlu1 %v189_v47, %s407_s9 }
 0x5cb   : > { %v192_v49 = vpop.permute.xlu1 %191 }
 0x5cc   : > { %v194_v30 = vadd.f32 %v192_v49, %v184_v48  }
 0x5ce   : > { %347 = vtanh.f32 %v194_v30 }
 0x5db   : > { %v348_v50 = vpop.eup %347 }
 0x5dc   : > { %197 = vrot.lane.b32.xlu1 %v348_v50, %s408_s10 }
 0x5e0   : > { %208 = vrot.lane.b32.xlu1 %v202_v51, %s407_s9 }
 0x64e   : > { %v198_v52 = vpop.permute.xlu1 %197 }
 0x64f   : > { %v200_v31 = vmul.f32 %v346_v45, %v198_v52  }
 0x651   : > { %204 = vrot.lane.b32.xlu0 %v200_v31, %s405_s30 }
 0x652   : > { %v209_v53 = vpop.permute.xlu1 %208 }
 0x6c1   :  { %121 = sbr.rel (!%p119_p1) target bundleno = 926 (0x39e), region = 62 }
 0x6c3   : > { %v205_v54 = vpop.permute.xlu0 %204 }
 0x6c4   : > { %v211_v55 = vsel %vm37_vm1, %v205_v54, %v209_v53 }
 0x6c5   : > { %214 = vst.msk [vmem:[%s212_s14] sm:$0x3] %vm213_vm4, %v211_v55 }

// kernel: bidaf_selfatt_forward.16
= control target key start
LH: loop header
LB: loop body
LE: loop exit
PB: predicated region body
PF: predicated region fallthrough
CT: control target
= control target key end

     0   :  { %v430_v0 = vmov 0.0   ;;  %vm48_vm0 = vcmask 1043456   ;;  %vm431_vm1 = vmmov 0   ;;  %vm44_vm2 = vcmask 195584   ;;  %s555_s1 = inlined_call_operand.vmem [shape: f32[24,16], index: 1, kind: input, shape index: {}]   ;;  %s556_s0 = inlined_call_operand.vmem [shape: f32[16,24], index: 0, kind: input, shape index: {}]   ;;  %s557_s2 = inlined_call_operand.vmem [shape: f32[16,16], index: 2, kind: input, shape index: {}]   ;;  %s558_s4 = inlined_call_operand.vmem [shape: f32[16,16], index: 4, kind: input, shape index: {}]   ;;  %s559_s8 = inlined_call_operand.vmem [shape: f32[16,16], index: 8, kind: input, shape index: {}]   ;;  %s560_s6 = inlined_call_operand.vmem [shape: f32[16,16], index: 6, kind: input, shape index: {}]   ;;  %s561_s5 = inlined_call_operand.vmem [shape: f32[1,16], index: 5, kind: input, shape index: {}]   ;;  %s562_s3 = inlined_call_operand.vmem [shape: f32[1,16], index: 3, kind: input, shape index: {}]   ;;  %s563_s9 = inlined_call_operand.vmem [shape: f32[1,16], index: 9, kind: input, shape index: {}]   ;;  %s564_s7 = inlined_call_operand.vmem [shape: f32[1,16], index: 7, kind: input, shape index: {}]   ;;  %s565_s10 = inlined_call_operand.vmem [shape: f32[16,16], index: 10, kind: output, shape index: {}]  }
   0x1   :  { %380 = vmatprep.subr.bf16.mxu0 %v430_v0  ;;  %v40_v1 = vld [vmem:[%s555_s1 + $0x10] sm:$0xff]  ;;  %384 = vmatprep.mubr.msk.bf16.mxu0 %vm431_vm1, %v430_v0  ;;  %v38_v3 = vld [vmem:[%s555_s1] sm:$0xff]  ;;  %v39_v4 = vld [vmem:[%s555_s1 + $0x8] sm:$0xff]  ;;  %vm104_vm3 = vcmask 130048  }
   0x2   :  { %v43_v2 = vpack.c.bf16 %v40_v1, %v40_v1  ;;  %388 = vmatprep.subr.bf16.mxu1 %v430_v0  ;;  %390 = vmatprep.mubr.msk.bf16.mxu1 %vm431_vm1, %v430_v0  ;;  %v42_v6 = vpack.c.bf16 %v39_v4, %v38_v3  ;;  %v36_v7 = vld [vmem:[%s556_s0] sm:$0xff]  ;;  %v37_v8 = vld [vmem:[%s556_s0 + $0x8] sm:$0xff] }
   0x3   :  { %v41_v9 = vpack.c.bf16 %v37_v8, %v36_v7  ;;  %v93_v10 = vld [vmem:[%s557_s2] sm:$0xff]  ;;  %v94_v11 = vld [vmem:[%s557_s2 + $0x8] sm:$0xff] }
   0x4   :  { %v50_v5 = vsel %vm48_vm0, %v43_v2, 0  ;;  %v96_v12 = vpack.c.bf16 %v94_v11, %v93_v10  ;;  %v151_v14 = vld [vmem:[%s558_s4] sm:$0xff]  ;;  %v152_v15 = vld [vmem:[%s558_s4 + $0x8] sm:$0xff] }
   0x5   :  { %381 = vmatpush3.bf16.msra.mxu0 %v50_v5  ;;  %v153_v18 = vpack.c.bf16 %v152_v15, %v151_v14  ;;  %v279_v21 = vld [vmem:[%s559_s8] sm:$0xff]  ;;  %v280_v22 = vld [vmem:[%s559_s8 + $0x8] sm:$0xff] }
   0x6   :  { %382 = vmatprep.subr.bf16.mxu0 %v430_v0  ;;  %389 = vmatpush3.bf16.msra.mxu1 %v96_v12  ;;  %v222_v23 = vld [vmem:[%s560_s6] sm:$0xff]  ;;  %v281_v24 = vpack.c.bf16 %v280_v22, %v279_v21  ;;  %v223_v25 = vld [vmem:[%s560_s6 + $0x8] sm:$0xff] }
   0x7   :  { %394 = vmatprep.subr.bf16.mxu1 %v430_v0  ;;  %v225_v26 = vpack.c.bf16 %v223_v25, %v222_v23  ;;  %v359_v31 = vld [vmem:[%s561_s5] ss:$0 sm:$0xff] }
   0x8   :  { %v357_v44 = vld [vmem:[%s562_s3] ss:$0 sm:$0xff] }
   0x9   :  { %383 = vmatpush3.bf16.msra.mxu0 %v42_v6  ;;  %v365_v60 = vld [vmem:[%s563_s9] ss:$0 sm:$0xff] }
   0xa   :  { %400 = vmatprep.subr.bf16.mxu0 %v430_v0 }
   0xc   :  { %385 = vmatmul.mubr.msk.bf16.vlgmr.msra.gmra.mxu0 %vm44_vm2, %v41_v9 }
   0xd   :  { %402 = vmatprep.mubr.msk.bf16.mxu0 %vm431_vm1, %v430_v0  ;;  %401 = vmatpush3.bf16.msra.mxu0 %v225_v26 }
  0xcc   :  { %v86_v13 = vpop.f32.mrf.mxu0 }
  0xce   :  { %v386_v16 = vpop.f32.mrf.mxu0 }
  0xd0   :  { %v89_v17 = vpop.f32.mrf.mxu0 }
  0xd1   :  { %v95_v19 = vpack.c.bf16 %v89_v17, %v86_v13 }
  0xd2   :  { %v387_v20 = vpop.f32.mrf.mxu0 }
  0xd3   :  { %391 = vmatmul.mubr.msk.bf16.vlgmr.msra.gmra.mxu1 %vm104_vm3, %v95_v19 }
  0xd4   :  { %395 = vmatpush3.bf16.msra.mxu1 %v153_v18  ;;  %396 = vmatprep.mubr.msk.bf16.mxu1 %vm431_vm1, %v430_v0 }
  0xd5   :  { %406 = vmatprep.subr.bf16.mxu1 %v430_v0 }
  0xdb   :  { %397 = vmatmul.mubr.msk.bf16.vlgmr.msra.gmra.mxu1 %vm104_vm3, %v95_v19 }
  0xdc   :  { %408 = vmatprep.mubr.msk.bf16.mxu1 %vm431_vm1, %v430_v0  ;;  %407 = vmatpush3.bf16.msra.mxu1 %v281_v24 }
 0x193   :  { %v142_v27 = vpop.f32.mrf.mxu1 }
 0x194   :  { %v143_v46 = vadd.f32 %v357_v44, %v142_v27 }
 0x195   :  { %v392_v28 = vpop.f32.mrf.mxu1 }
 0x196   :  { %v149_v50 = vmax.f32 %v143_v46, 0.0 }
 0x197   :  { %v145_v29 = vpop.f32.mrf.mxu1 }
 0x198   :  { %v146_v47 = vadd.f32 %v357_v44, %v145_v29 }
 0x199   :  { %v393_v30 = vpop.f32.mrf.mxu1 }
 0x19a   :  { %v150_v51 = vmax.f32 %v146_v47, 0.0 }
 0x19b   :  { %v195_v32 = vpop.f32.mrf.mxu1 }
 0x19c   :  { %v196_v33 = vadd.f32 %v359_v31, %v195_v32 }
 0x19d   :  { %v398_v34 = vpop.f32.mrf.mxu1 }
 0x19e   :  { %v361_v35 = vmul.f32 -1.442695, %v196_v33 }
 0x19f   :  { %v198_v36 = vpop.f32.mrf.mxu1 }
 0x1a0   :  { %414 = vpow2.f32 %v361_v35  ;;  %v199_v37 = vadd.f32 %v359_v31, %v198_v36 }
 0x1a1   :  { %v399_v38 = vpop.f32.mrf.mxu1 }
 0x1a2   :  { %v362_v39 = vmul.f32 -1.442695, %v199_v37 }
 0x1a4   :  { %416 = vpow2.f32 %v362_v39 }
 0x1ad   :  { %v415_v40 = vpop.eup %414 }
 0x1ae   :  { %v208_v41 = vadd.f32 1.0, %v415_v40 }
 0x1b0   :  { %418 = vrcp.f32 %v208_v41 }
 0x1b1   :  { %v417_v42 = vpop.eup %416 }
 0x1b2   :  { %v209_v43 = vadd.f32 1.0, %v417_v42 }
 0x1b4   :  { %420 = vrcp.f32 %v209_v43 }
 0x1bd   :  { %v419_v45 = vpop.eup %418 }
 0x1be   :  { %v216_v48 = vsub.f32 1.0, %v419_v45  ;;  %v214_v54 = vmul.f32 %v419_v45, %v149_v50 }
 0x1c0   :  { %v218_v53 = vmul.f32 %v216_v48, %v86_v13  ;;  %v363_v13 = vld [vmem:[%s564_s7] ss:$0 sm:$0xff] }
 0x1c1   :  { %v421_v49 = vpop.eup %420 }
 0x1c2   :  { %v217_v52 = vsub.f32 1.0, %v421_v49  ;;  %v215_v55 = vmul.f32 %v421_v49, %v150_v51  ;;  %v220_v57 = vadd.f32 %v218_v53, %v214_v54 }
 0x1c4   :  { %v219_v56 = vmul.f32 %v217_v52, %v89_v17 }
 0x1c6   :  { %v221_v58 = vadd.f32 %v219_v56, %v215_v55 }
 0x1c8   :  { %v224_v59 = vpack.c.bf16 %v221_v58, %v220_v57 }
 0x1ca   :  { %403 = vmatmul.mubr.msk.bf16.vlgmr.msra.gmra.mxu0 %vm104_vm3, %v224_v59  ;;  %409 = vmatmul.mubr.msk.bf16.vlgmr.msra.gmra.mxu1 %vm104_vm3, %v224_v59 }
 0x28a   :  { %v270_v61 = vpop.f32.mrf.mxu0  ;;  %v323_v62 = vpop.f32.mrf.mxu1 }
 0x28b   :  { %v324_v63 = vadd.f32 %v365_v60, %v323_v62  ;;  %v271_v14 = vadd.f32 %v363_v13, %v270_v61 }
 0x28c   :  { %v404_v0 = vpop.f32.mrf.mxu0  ;;  %v410_v1 = vpop.f32.mrf.mxu1 }
 0x28d   :  { %v367_v2 = vmul.f32 -1.442695, %v324_v63  ;;  %v277_v16 = vmax.f32 %v271_v14, 0.0 }
 0x28e   :  { %v273_v3 = vpop.f32.mrf.mxu0  ;;  %v326_v4 = vpop.f32.mrf.mxu1 }
 0x28f   :  { %422 = vpow2.f32 %v367_v2  ;;  %v327_v5 = vadd.f32 %v365_v60, %v326_v4  ;;  %v274_v18 = vadd.f32 %v363_v13, %v273_v3 }
 0x290   :  { %v405_v6 = vpop.f32.mrf.mxu0  ;;  %v411_v7 = vpop.f32.mrf.mxu1 }
 0x291   :  { %v368_v8 = vmul.f32 -1.442695, %v327_v5  ;;  %v278_v23 = vmax.f32 %v274_v18, 0.0 }
 0x293   :  { %424 = vpow2.f32 %v368_v8 }
 0x29c   :  { %v423_v9 = vpop.eup %422 }
 0x29d   :  { %v336_v10 = vadd.f32 1.0, %v423_v9 }
 0x29f   :  { %426 = vrcp.f32 %v336_v10 }
 0x2a0   :  { %v425_v11 = vpop.eup %424 }
 0x2a1   :  { %v337_v12 = vadd.f32 1.0, %v425_v11 }
 0x2a3   :  { %428 = vrcp.f32 %v337_v12 }
 0x2ac   :  { %v427_v15 = vpop.eup %426 }
 0x2ad   :  { %v344_v17 = vsub.f32 1.0, %v427_v15  ;;  %v342_v19 = vmul.f32 %v427_v15, %v277_v16 }
 0x2af   :  { %v346_v20 = vmul.f32 %v344_v17, %v220_v57 }
 0x2b0   :  { %v429_v21 = vpop.eup %428 }
 0x2b1   :  { %v348_v22 = vadd.f32 %v346_v20, %v342_v19  ;;  %v345_v24 = vsub.f32 1.0, %v429_v21  ;;  %v343_v25 = vmul.f32 %v429_v21, %v278_v23 }
 0x2b3   :  { %350 = vst.msk [vmem:[%s565_s10] sm:$0xff] %vm104_vm3, %v348_v22  ;;  %v347_v26 = vmul.f32 %v345_v24, %v221_v58 }
 0x2b5   :  { %v349_v27 = vadd.f32 %v347_v26, %v343_v25 }
 0x2b7   :  { %351 = vst.msk [vmem:[%s565_s10 + $0x8] sm:$0xff] %vm104_vm3, %v349_v27 }

// kernel: bidaf_selfatt_forward.23
= control target key start
LH: loop header
LB: loop body
LE: loop exit
PB: predicated region body
PF: predicated region fallthrough
CT: control target
= control target key end

     0   :  { %s235_s1 = inlined_call_operand.vmem [shape: f32[128,128], index: 1, kind: input, shape index: {}]   ;;  %s236_s0 = inlined_call_operand.vmem [shape: f32[32,128], index: 0, kind: input, shape index: {}]   ;;  %s237_s2 = inlined_call_operand.vmem [shape: f32[1,128], index: 2, kind: input, shape index: {}]   ;;  %s238_s3 = inlined_call_operand.vmem [shape: f32[32,128], index: 3, kind: output, shape index: {}]  }
   0x1   :  { %v33_v0 = vld [vmem:[%s235_s1 + $0x70] sm:$0xff]  ;;  %v34_v1 = vld [vmem:[%s235_s1 + $0x78] sm:$0xff]  ;;  %v31_v2 = vld [vmem:[%s235_s1 + $0x60] sm:$0xff] }
   0x2   :  { %v44_v3 = vpack.c.bf16 %v34_v1, %v33_v0  ;;  %v32_v4 = vld [vmem:[%s235_s1 + $0x68] sm:$0xff]  ;;  %v29_v6 = vld [vmem:[%s235_s1 + $0x50] sm:$0xff]  ;;  %v30_v7 = vld [vmem:[%s235_s1 + $0x58] sm:$0xff] }
   0x3   :  { %v43_v5 = vpack.c.bf16 %v32_v4, %v31_v2  ;;  %v42_v8 = vpack.c.bf16 %v30_v7, %v29_v6  ;;  %v15_v9 = vld [vmem:[%s236_s0] sm:$0xff]  ;;  %v16_v10 = vld [vmem:[%s236_s0 + $0x8] sm:$0xff]  ;;  %v25_v15 = vld [vmem:[%s235_s1 + $0x30] sm:$0xff] }
   0x4   :  { %120 = vmatprep.subr.bf16.mxu0 %v44_v3  ;;  %v27_v11 = vld [vmem:[%s235_s1 + $0x40] sm:$0xff]  ;;  %v28_v12 = vld [vmem:[%s235_s1 + $0x48] sm:$0xff]  ;;  %v35_v13 = vpack.c.bf16 %v16_v10, %v15_v9  ;;  %v26_v16 = vld [vmem:[%s235_s1 + $0x38] sm:$0xff] }
   0x5   :  { %121 = vmatpush3.bf16.msra.mxu0 %v44_v3  ;;  %v41_v14 = vpack.c.bf16 %v28_v12, %v27_v11  ;;  %v40_v17 = vpack.c.bf16 %v26_v16, %v25_v15  ;;  %v23_v18 = vld [vmem:[%s235_s1 + $0x20] sm:$0xff]  ;;  %v24_v19 = vld [vmem:[%s235_s1 + $0x28] sm:$0xff]  ;;  %v21_v21 = vld [vmem:[%s235_s1 + $0x10] sm:$0xff] }
   0x6   :  { %122 = vmatprep.subr.bf16.mxu0 %v43_v5  ;;  %136 = vmatprep.mubr.bf16.mxu0 %v35_v13  ;;  %v39_v20 = vpack.c.bf16 %v24_v19, %v23_v18  ;;  %v22_v22 = vld [vmem:[%s235_s1 + $0x18] sm:$0xff]  ;;  %v19_v24 = vld [vmem:[%s235_s1] sm:$0xff]  ;;  %v20_v25 = vld [vmem:[%s235_s1 + $0x8] sm:$0xff] }
   0x7   :  { %v38_v23 = vpack.c.bf16 %v22_v22, %v21_v21  ;;  %v37_v26 = vpack.c.bf16 %v20_v25, %v19_v24  ;;  %v17_v27 = vld [vmem:[%s236_s0 + $0x10] sm:$0xff]  ;;  %v18_v28 = vld [vmem:[%s236_s0 + $0x18] sm:$0xff]  ;;  %v109_v30 = vld [vmem:[%s237_s2] ss:$0 sm:$0xff] }
   0x8   :  { %v36_v29 = vpack.c.bf16 %v18_v28, %v17_v27 }
   0x9   :  { %123 = vmatpush3.bf16.msra.mxu0 %v43_v5 }
   0xa   :  { %124 = vmatprep.subr.bf16.mxu0 %v42_v8 }
   0xd   :  { %125 = vmatpush3.bf16.msra.mxu0 %v42_v8 }
   0xe   :  { %126 = vmatprep.subr.bf16.mxu0 %v41_v14 }
  0x11   :  { %127 = vmatpush3.bf16.msra.mxu0 %v41_v14 }
  0x12   :  { %128 = vmatprep.subr.bf16.mxu0 %v40_v17 }
  0x15   :  { %129 = vmatpush3.bf16.msra.mxu0 %v40_v17 }
  0x16   :  { %130 = vmatprep.subr.bf16.mxu0 %v39_v20 }
  0x19   :  { %131 = vmatpush3.bf16.msra.mxu0 %v39_v20 }
  0x1a   :  { %132 = vmatprep.subr.bf16.mxu0 %v38_v23 }
  0x1d   :  { %133 = vmatpush3.bf16.msra.mxu0 %v38_v23 }
  0x1e   :  { %134 = vmatprep.subr.bf16.mxu0 %v37_v26 }
  0x21   :  { %135 = vmatpush3.bf16.msra.mxu0 %v37_v26 }
  0x24   :  { %137 = vmatmul.mubr.bf16.vlgmr.msra.gmra.mxu0 %v36_v29 }
  0xe4   :  { %v138_v31 = vpop.f32.mrf.mxu0 }
  0xe5   :  { %v95_v32 = vadd.f32 %v138_v31, %v109_v30 }
  0xe6   :  { %v86_v33 = vpop.f32.mrf.mxu0 }
  0xe7   :  { %103 = vst [vmem:[%s238_s3 + $0x10] sm:$0xff] %v95_v32  ;;  %v87_v34 = vadd.f32 %v109_v30, %v86_v33 }
  0xe8   :  { %v139_v35 = vpop.f32.mrf.mxu0 }
  0xe9   :  { %101 = vst [vmem:[%s238_s3] sm:$0xff] %v87_v34  ;;  %v98_v36 = vadd.f32 %v139_v35, %v109_v30 }
  0xea   :  { %v89_v37 = vpop.f32.mrf.mxu0 }
  0xeb   :  { %104 = vst [vmem:[%s238_s3 + $0x18] sm:$0xff] %v98_v36  ;;  %v90_v38 = vadd.f32 %v109_v30, %v89_v37 }
  0xed   :  { %102 = vst [vmem:[%s238_s3 + $0x8] sm:$0xff] %v90_v38 }

// kernel: bidaf_selfatt_forward.25
= control target key start
LH: loop header
LB: loop body
LE: loop exit
PB: predicated region body
PF: predicated region fallthrough
CT: control target
= control target key end

     0   :  { %vm34_vm0 = vcmask 261120   ;;  %s172_s1 = inlined_call_operand.vmem [shape: f32[32,128], index: 1, kind: input, shape index: {}]   ;;  %s173_s0 = inlined_call_operand.vmem [shape: f32[32,32], index: 0, kind: input, shape index: {}]   ;;  %s174_s2 = inlined_call_operand.vmem [shape: f32[1,128], index: 2, kind: input, shape index: {}]   ;;  %s175_s3 = inlined_call_operand.vmem [shape: f32[32,128], index: 3, kind: output, shape index: {}]  }
   0x1   :  { %v21_v0 = vld [vmem:[%s172_s1 + $0x10] sm:$0xff]  ;;  %v22_v1 = vld [vmem:[%s172_s1 + $0x18] sm:$0xff]  ;;  %v19_v2 = vld [vmem:[%s172_s1] sm:$0xff] }
   0x2   :  { %v26_v3 = vpack.c.bf16 %v22_v1, %v21_v0  ;;  %v20_v4 = vld [vmem:[%s172_s1 + $0x8] sm:$0xff]  ;;  %v15_v5 = vld [vmem:[%s173_s0] sm:$0xff]  ;;  %v17_v9 = vld [vmem:[%s173_s0 + $0x10] sm:$0xff] }
   0x3   :  { %v16_v6 = vld [vmem:[%s173_s0 + $0x8] sm:$0xff]  ;;  %v25_v7 = vpack.c.bf16 %v20_v4, %v19_v2  ;;  %v18_v10 = vld [vmem:[%s173_s0 + $0x18] sm:$0xff]  ;;  %v98_v12 = vld [vmem:[%s174_s2] ss:$0 sm:$0xff] }
   0x4   :  { %v23_v8 = vpack.c.bf16 %v16_v6, %v15_v5  ;;  %105 = vmatprep.subr.bf16.mxu0 %v26_v3  ;;  %v24_v11 = vpack.c.bf16 %v18_v10, %v17_v9 }
   0x5   :  { %106 = vmatpush3.bf16.msra.mxu0 %v26_v3 }
   0x6   :  { %109 = vmatprep.mubr.msk.bf16.mxu0 %vm34_vm0, %v23_v8  ;;  %107 = vmatprep.subr.bf16.mxu0 %v25_v7 }
   0x9   :  { %108 = vmatpush3.bf16.msra.mxu0 %v25_v7 }
   0xc   :  { %110 = vmatmul.mubr.msk.bf16.vlgmr.msra.gmra.mxu0 %vm34_vm0, %v24_v11 }
  0xcc   :  { %v111_v13 = vpop.f32.mrf.mxu0 }
  0xcd   :  { %v84_v14 = vadd.f32 %v111_v13, %v98_v12 }
  0xce   :  { %v75_v15 = vpop.f32.mrf.mxu0 }
  0xcf   :  { %92 = vst [vmem:[%s175_s3 + $0x10] sm:$0xff] %v84_v14  ;;  %v76_v16 = vadd.f32 %v98_v12, %v75_v15 }
  0xd0   :  { %v112_v17 = vpop.f32.mrf.mxu0 }
  0xd1   :  { %90 = vst [vmem:[%s175_s3] sm:$0xff] %v76_v16  ;;  %v87_v18 = vadd.f32 %v112_v17, %v98_v12 }
  0xd2   :  { %v78_v19 = vpop.f32.mrf.mxu0 }
  0xd3   :  { %93 = vst [vmem:[%s175_s3 + $0x18] sm:$0xff] %v87_v18  ;;  %v79_v20 = vadd.f32 %v98_v12, %v78_v19 }
  0xd5   :  { %91 = vst [vmem:[%s175_s3 + $0x8] sm:$0xff] %v79_v20 }

// kernel: bidaf_selfatt_forward.21
= control target key start
LH: loop header
LB: loop body
LE: loop exit
PB: predicated region body
PF: predicated region fallthrough
CT: control target
= control target key end

     0   :  { %s1072_s29 = smov 0   ;;  %s1186_s0 = inlined_call_operand.vmem [shape: f32[2,16,32], index: 0, kind: input, shape index: {}]   ;;  %s1187_s1 = inlined_call_operand.vmem [shape: f32[2,8,32], index: 1, kind: input, shape index: {}]   ;;  %s1188_s2 = inlined_call_operand.vmem [shape: f32[2,16,1], index: 2, kind: input, shape index: {}]   ;;  %s1189_s3 = inlined_call_operand.vmem [shape: f32[2,1,8], index: 3, kind: input, shape index: {}]   ;;  %s1190_s4 = inlined_call_operand.vmem [shape: f32[32,1], index: 4, kind: input, shape index: {}]   ;;  %s1191_s5 = inlined_call_operand.vmem [shape: f32[1,32], index: 5, kind: input, shape index: {}]   ;;  %s1192_s6 = inlined_call_operand.vmem [shape: f32[1,32], index: 6, kind: input, shape index: {}]   ;;  %s1193_s7 = inlined_call_operand.<no memory space> [shape: f32[1,1], index: 7, kind: input, shape index: {}]   ;;  %s1194_s8 = inlined_call_operand.vmem [shape: f32[2,16,128], index: 8, kind: output, shape index: {}]  }
   0x1   :  { %v13_v0 = vstv %s1193_s7 }
   0x2   :  { %14 = vst [vmem:[#allocation2] sm:$0x1] %v13_v0 }
   0x3 LB: > { %s904_s30 = sadd.s32 4294967295, %s1016_s29   ;;  %p908_p0 = scmp.ge.s32.totalorder %s1016_s29, 1  ;;  %s1016_s29 = sphi %s1072_s29, %s20_s29  }
   0x4   : > { %p291_p1 = scmp.lt.s32.totalorder %s1016_s29, 3 }
   0x6   : > { %p292_p2 = pnand %p908_p0, %p291_p1 }
   0x7   : > { %p337_p3 = scmp.lt.s32.totalorder (!%p292_p2), %s904_s30, 1  ;;  %s1022_s13 = smov (!%p292_p2), 64  }
   0x8   : > { %295 = sbr.rel (%p292_p2) target bundleno = 1032 (0x408), region = 52  ;;  %s1023_s14 = smov (!%p292_p2), 96  }
   0xd   : > { %v368_v1 = vld [vmem:[%s1190_s4 + $0x10] sm:$0xff]  ;;  %v369_v2 = vld [vmem:[%s1190_s4 + $0x18] sm:$0xff]  ;;  %v366_v3 = vld [vmem:[%s1190_s4] sm:$0xff]  ;;  %v1018_v4 = vmov 0.0   ;;  %vm1019_vm0 = vmmov 0   ;;  %s1196_s30 = smov (!%p337_p3, %s904_s30), 1  ;;  %v531_v38 = vlaneseq }
   0xe   : > { %942 = vmatprep.subr.bf16.mxu0 %v1018_v4  ;;  %v372_v5 = vpack.c.bf16 %v369_v2, %v368_v1  ;;  %v367_v6 = vld [vmem:[%s1190_s4 + $0x8] sm:$0xff]  ;;  %946 = vmatprep.mubr.msk.bf16.mxu0 %vm1019_vm0, %v1018_v4  ;;  %v1020_v8 = vmov 0   ;;  %s1103_s16 = sshll.u32 %s1196_s30, 4  ;;  %s911_s17 = sshll.u32 %s1196_s30, 3  ;;  %vm373_vm1 = vcmask 261120   ;;  %vm560_vm6 = vcmask 64512  }
   0xf   : > { %950 = vmatprep.subr.bf16.mxu1 %v1018_v4  ;;  %952 = vmatprep.mubr.msk.bf16.mxu1 %vm1019_vm0, %v1018_v4  ;;  %v371_v7 = vpack.c.bf16 %v367_v6, %v366_v3  ;;  %s341_s20 = scalar_lea.vmem %s1186_s0, %s1103_s16  ;;  %s345_s23 = scalar_lea.vmem %s1187_s1, %s911_s17  ;;  %v918_v14 = vld [vmem:[%s1192_s6] ss:$0 sm:$0xff]  ;;  %v532_v39 = vshrl.u32 %v531_v38, 7  ;;  %vm689_vm9 = vcmask 130048   ;;  %vm628_vm10 = vcmask 1043456  }
  0x10   : > { %943 = vmatpush3.bf16.msra.mxu0 %v372_v5  ;;  %994 = vset.pattern.permute.xlu0 %v1020_v8  ;;  %v1114_v9 = vld [vmem:[%s341_s20] sm:$0xff]  ;;  %v1116_v10 = vld [vmem:[%s341_s20 + $0x8] sm:$0xff]  ;;  %s350_s10 = scalar_lea.vmem %s1188_s2, %s1103_s16  ;;  %s353_s12 = scalar_lea.vmem %s1189_s3, %s1196_s30  ;;  %vm808_vm11 = vcmask 523264   ;;  %vm811_vm12 = vcmask 785408  }
  0x11   : > { %944 = vmatprep.subr.bf16.mxu0 %v1018_v4  ;;  %995 = vset.pattern.permute.xlu1 %v1020_v8  ;;  %v362_v11 = vld [vmem:[%s345_s23] sm:$0xff]  ;;  %v370_v12 = vpack.c.bf16 %v1116_v10, %v1114_v9  ;;  %v474_v17 = vmul.f32 %v918_v14, %v1114_v9  ;;  %v475_v18 = vmul.f32 %v918_v14, %v1116_v10  ;;  %v364_v25 = vld [vmem:[%s350_s10 + $0x8] sm:$0xff]  ;;  %v533_v41 = vsub.s32 0, %v532_v39  ;;  %s1021_s30 = smov 32   ;;  %s358_s18 = scalar_lea.vmem %s1194_s8, %s1103_s16 }
  0x12   : > { %v1120_v13 = vpack.c.bf16 %v362_v11, %v362_v11  ;;  %v418_v16 = vld [vmem:[%s1191_s5] sm:$0x1]  ;;  %vm584_vm3 = vcmp.gt.f32.partialorder %v364_v25, 0.0 }
  0x13   : > { %v419_v19 = vpack.c.bf16 %v418_v16, %v418_v16  ;;  %v476_v20 = vpack.c.bf16 %v475_v18, %v474_v17  ;;  %v920_v21 = vld [vmem:[#allocation2] ss:$0 sm:$0xff]  ;;  %v586_v29 = vsel %vm584_vm3, 1, %v1020_v8 }
  0x14   : > { %945 = vmatpush3.bf16.msra.mxu0 %v371_v7  ;;  %v425_v15 = vsel %vm373_vm1, %v1120_v13, 0  ;;  %546 = vperm.xlu1 %995, %v920_v21   ;;  %v363_v22 = vld [vmem:[%s350_s10] sm:$0xff] }
  0x15   : > { %956 = vmatprep.subr.bf16.mxu0 %v1018_v4  ;;  %951 = vmatpush3.bf16.xpose.msra.mxu1 %v425_v15  ;;  %vm583_vm2 = vcmp.gt.f32.partialorder %v363_v22, 0.0  ;;  %v365_v40 = vld [vmem:[%s353_s12] sm:$0x1] }
  0x16   : > { %962 = vmatprep.subr.bf16.mxu1 %v1018_v4  ;;  %v585_v23 = vsel %vm583_vm2, 1, %v1020_v8  ;;  %vm551_vm4 = vcmp.gt.f32.partialorder %v365_v40, 0.0 }
  0x17   : > { %947 = vmatmul.mubr.msk.bf16.vlgmr.msra.gmra.mxu0 %vm373_vm1, %v370_v12  ;;  %v552_v44 = vsel %vm551_vm4, 1, %v1020_v8 }
  0x18   : > { %957 = vmatpush3.bf16.xpose.msra.mxu0 %v425_v15  ;;  %958 = vmatprep.mubr.msk.bf16.mxu0 %vm1019_vm0, %v1018_v4  ;;  %v556_v46 = vrot.slane %v552_v44, %v533_v41 }
  0x19   : > { %968 = vmatprep.subr.bf16.mxu0 %v1018_v4  ;;  %588 = vperm.xlu1 %995, %v585_v23  }
  0x1a   : > { %vm557_vm5 = vcmp.eq.s32.totalorder %v556_v46, 1 }
  0x1c   : > { %953 = vmatmul.mubr.msk.bf16.vlgmr.msra.gmra.mxu1 %vm373_vm1, %v419_v19 }
  0x1d   : > { %964 = vmatprep.mubr.msk.bf16.mxu1 %vm1019_vm0, %v1018_v4 }
  0x1f   : > { %959 = vmatmul.mubr.msk.bf16.vlgmr.msra.gmra.mxu0 %vm373_vm1, %v476_v20 }
  0x20   : > { %969 = vmatpush3.bf16.msra.mxu0 %v370_v12  ;;  %970 = vmatprep.mubr.msk.bf16.mxu0 %vm1019_vm0, %v1018_v4 }
  0x8f   : > { %v547_v43 = vpop.permute.xlu1 %546 }
  0x94   : > { %v589_v49 = vpop.permute.xlu1 %588 }
  0x95   : > { %vm593_vm7 = vcmp.eq.s32.totalorder %v589_v49, 1 }
  0xd7   : > { %v411_v24 = vpop.f32.mrf.mxu0 }
  0xd8   : > { %523 = vperm.xlu0 %994, %v411_v24  }
  0xd9   : > { %v948_v26 = vpop.f32.mrf.mxu0 }
  0xdb   : > { %v414_v27 = vpop.f32.mrf.mxu0 }
  0xdc   : > { %528 = vperm.xlu0 %994, %v414_v27   ;;  %v461_v30 = vpop.f32.mrf.mxu1 }
  0xdd   : > { %v949_v28 = vpop.f32.mrf.mxu0  ;;  %v534_v42 = vrot.slane %v461_v30, %v533_v41  ;;  %v629_v41 = vsel %vm628_vm10, %v1120_v13, 0 }
  0xde   : > { %v954_v32 = vpop.f32.mrf.mxu1  ;;  %963 = vmatpush3.bf16.msra.mxu1 %v629_v41 }
  0xdf   : > { %v514_v31 = vpop.f32.mrf.mxu0  ;;  %974 = vmatprep.subr.bf16.mxu1 %v1018_v4 }
  0xe0   : > { %591 = vperm.xlu0 %994, %v586_v29   ;;  %v464_v34 = vpop.f32.mrf.mxu1 }
  0xe1   : > { %v960_v33 = vpop.f32.mrf.mxu0 }
  0xe2   : > { %v955_v36 = vpop.f32.mrf.mxu1 }
  0xe3   : > { %v517_v35 = vpop.f32.mrf.mxu0 }
  0xe5   : > { %v961_v37 = vpop.f32.mrf.mxu0 }
 0x153   : > { %v524_v45 = vpop.permute.xlu0 %523 }
 0x154   : > { %v535_v47 = vadd.f32 %v534_v42, %v524_v45 }
 0x156   : > { %v537_v48 = vadd.f32 %v535_v47, %v514_v31 }
 0x157   : > { %v529_v50 = vpop.permute.xlu0 %528 }
 0x158   : > { %v549_v51 = vadd.f32 %v547_v43, %v537_v48  ;;  %v536_v52 = vadd.f32 %v534_v42, %v529_v50 }
 0x15a   : > { %v538_v53 = vadd.f32 %v536_v52, %v517_v35  ;;  %v558_v54 = vsel %vm557_vm5, %v549_v51, -1e+30  ;;  %v595_v57 = vsel %vm593_vm7, %v549_v51, -1e+30 }
 0x15b   : > { %v592_v55 = vpop.permute.xlu0 %591  ;;  %v561_v56 = vsel %vm560_vm6, %v558_v54, -inf  ;;  %v597_v61 = vsel %vm560_vm6, %v595_v57, -inf }
 0x15c   : > { %v550_v58 = vadd.f32 %v547_v43, %v538_v53  ;;  %vm594_vm8 = vcmp.eq.s32.totalorder %v592_v55, 1  ;;  %562 = vmax.xlane.f32.xlu0 %v561_v56 }
 0x15e   : > { %v596_v59 = vsel %vm594_vm8, %v550_v58, -1e+30  ;;  %v559_v60 = vsel %vm557_vm5, %v550_v58, -1e+30 }
 0x15f   : > { %v598_v62 = vsel %vm560_vm6, %v596_v59, -inf  ;;  %v564_v63 = vsel %vm560_vm6, %v559_v60, -inf }
 0x160   : > { %v599_v0 = vmax.f32 %v597_v61, %v598_v62  ;;  %565 = vmax.xlane.f32.xlu0 %v564_v63 }
 0x162   : > { %v600_v1 = vrot.slane %v599_v0, 4 }
 0x164   : > { %v601_v2 = vmax.f32 %v599_v0, %v600_v1 }
 0x166   : > { %v602_v3 = vrot.slane %v601_v2, 2 }
 0x168   : > { %v603_v5 = vmax.f32 %v601_v2, %v602_v3 }
 0x16a   : > { %v604_v6 = vrot.slane %v603_v5, 1 }
 0x16c   : > { %v605_v7 = vmax.f32 %v603_v5, %v604_v6 }
 0x16e   : > { %v606_v8 = vsub.f32 %v595_v57, %v605_v7  ;;  %v607_v11 = vsub.f32 %v596_v59, %v605_v7 }
 0x170   : > { %v608_v12 = vmul.f32 1.442695, %v606_v8  ;;  %v610_v14 = vmul.f32 1.442695, %v607_v11 }
 0x172   : > { %996 = vpow2.f32 %v608_v12 }
 0x173   : > { %998 = vpow2.f32 %v610_v14 }
 0x17f   : > { %v997_v15 = vpop.eup %996 }
 0x180   : > { %v999_v16 = vpop.eup %998  ;;  %v612_v17 = vsel %vm560_vm6, %v997_v15, 0.0 }
 0x181   : > { %v613_v18 = vsel %vm560_vm6, %v999_v16, 0.0 }
 0x182   : > { %v614_v19 = vadd.f32 %v613_v18, %v612_v17 }
 0x184   : > { %v615_v20 = vrot.slane %v614_v19, 4 }
 0x186   : > { %v616_v21 = vadd.f32 %v615_v20, %v614_v19 }
 0x188   : > { %v617_v22 = vrot.slane %v616_v21, 2 }
 0x18a   : > { %v618_v23 = vadd.f32 %v617_v22, %v616_v21 }
 0x18c   : > { %v619_v24 = vrot.slane %v618_v23, 1 }
 0x18e   : > { %v620_v25 = vadd.f32 %v619_v24, %v618_v23 }
 0x190   : > { %1000 = vrcp.f32 %v620_v25 }
 0x19d   : > { %v1001_v26 = vpop.eup %1000 }
 0x19e   : > { %v622_v27 = vmul.f32 %v1001_v26, %v997_v15  ;;  %v623_v28 = vmul.f32 %v1001_v26, %v999_v16 }
 0x1a0   : > { %v672_v29 = vpack.c.bf16 %v623_v28, %v622_v27 }
 0x1a2   : > { %673 = vxpose.xlu1.c.b16.start.end [1/1] (short) (narrow) %v672_v29, 16 }
 0x1e5   : > { %v563_v30 = vpop.xlane.xlu0 %562 }
 0x1e6   : > { %v567_v31 = vsub.f32 %v558_v54, %v563_v30 }
 0x1e8   : > { %v569_v32 = vmul.f32 1.442695, %v567_v31 }
 0x1e9   : > { %v566_v33 = vpop.xlane.xlu0 %565 }
 0x1ea   : > { %1002 = vpow2.f32 %v569_v32  ;;  %v568_v34 = vsub.f32 %v559_v60, %v566_v33 }
 0x1ec   : > { %v571_v35 = vmul.f32 1.442695, %v568_v34 }
 0x1ee   : > { %1004 = vpow2.f32 %v571_v35 }
 0x1f7   : > { %v1003_v36 = vpop.eup %1002 }
 0x1f8   : > { %v573_v37 = vsel %vm560_vm6, %v1003_v36, 0.0 }
 0x1f9   : > { %574 = vadd.xlane.f32.xlu1 %v573_v37 }
 0x1fb   : > { %v1005_v38 = vpop.eup %1004 }
 0x1fc   : > { %v576_v39 = vsel %vm560_vm6, %v1005_v38, 0.0 }
 0x1fd   : > { %577 = vadd.xlane.f32.xlu0 %v576_v39 }
 0x204   : > { %v681_v40 = vpop.trf.xlu1 }
 0x205   : > { %971 = vmatmul.mubr.msk.bf16.vlgmr.msra.gmra.mxu0 %vm689_vm9, %v681_v40 }
 0x282   : > { %v575_v42 = vpop.xlane.xlu1 %574 }
 0x283   : > { %1006 = vrcp.f32 %v575_v42 }
 0x286   : > { %v578_v43 = vpop.xlane.xlu0 %577 }
 0x287   : > { %1008 = vrcp.f32 %v578_v43 }
 0x290   : > { %v1007_v44 = vpop.eup %1006 }
 0x291   : > { %v581_v46 = vmul.f32 %v1007_v44, %v1003_v36 }
 0x294   : > { %v1009_v45 = vpop.eup %1008 }
 0x295   : > { %v582_v47 = vmul.f32 %v1009_v45, %v1005_v38 }
 0x297   : > { %v624_v48 = vpack.c.bf16 %v582_v47, %v581_v46 }
 0x299   : > { %965 = vmatmul.mubr.msk.bf16.vlgmr.msra.gmra.mxu1 %vm560_vm6, %v624_v48 }
 0x29a   : > { %976 = vmatprep.mubr.msk.bf16.mxu1 %vm1019_vm0, %v1018_v4 }
 0x2c5   : > { %v727_v49 = vpop.f32.mrf.mxu0 }
 0x2c6   : > { %v733_v50 = vpack.c.bf16 %v727_v49, %v727_v49 }
 0x2c7   : > { %v972_v13 = vpop.f32.mrf.mxu0 }
 0x2c8   : > { %v735_v51 = vsel %vm628_vm10, %v733_v50, 0 }
 0x2c9   : > { %v730_v52 = vpop.f32.mrf.mxu0  ;;  %975 = vmatpush3.bf16.msra.mxu1 %v735_v51 }
 0x2cb   : > { %v973_v53 = vpop.f32.mrf.mxu0 }
 0x2cc   : > { %977 = vmatmul.mubr.msk.bf16.vlgmr.msra.gmra.mxu1 %vm560_vm6, %v624_v48 }
 0x359   : > { %v665_v54 = vpop.f32.mrf.mxu1 }
 0x35a   : > { %784 = vrot.lane.b32.xlu0 %v665_v54, %s1021_s30  ;;  %v778_v56 = vmul.f32 %v665_v54, %v1114_v9 }
 0x35b   : > { %v966_v55 = vpop.f32.mrf.mxu1 }
 0x35d   : > { %v668_v57 = vpop.f32.mrf.mxu1 }
 0x35e   : > { %792 = vrot.lane.b32.xlu0 %v778_v56, %s1022_s13  ;;  %786 = vrot.lane.b32.xlu1 %v668_v57, %s1021_s30  ;;  %v779_v58 = vmul.f32 %v668_v57, %v1116_v10 }
 0x35f   : > { %v967_v4 = vpop.f32.mrf.mxu1 }
 0x362   : > { %794 = vrot.lane.b32.xlu1 %v779_v58, %s1022_s13 }
 0x38c   : > { %v771_v59 = vpop.f32.mrf.mxu1 }
 0x38d   : > { %v780_v60 = vmul.f32 %v771_v59, %v1114_v9 }
 0x38e   : > { %v978_v61 = vpop.f32.mrf.mxu1 }
 0x38f   : > { %800 = vrot.lane.b32.xlu0 %v780_v60, %s1023_s14 }
 0x390   : > { %v774_v62 = vpop.f32.mrf.mxu1 }
 0x391   : > { %v781_v63 = vmul.f32 %v774_v62, %v1116_v10 }
 0x392   : > { %v979_v0 = vpop.f32.mrf.mxu1 }
 0x393   : > { %802 = vrot.lane.b32.xlu1 %v781_v63, %s1023_s14 }
 0x3cc   : > { %v785_v1 = vpop.permute.xlu0 %784 }
 0x3cd   : > { %v806_v5 = vsel %vm373_vm1, %v1114_v9, %v785_v1 }
 0x3d0   : > { %v787_v2 = vpop.permute.xlu1 %786  ;;  %v793_v3 = vpop.permute.xlu0 %792 }
 0x3d1   : > { %v809_v6 = vsel %vm808_vm11, %v806_v5, %v793_v3  ;;  %v807_v12 = vsel %vm373_vm1, %v1116_v10, %v787_v2 }
 0x3d4   : > { %v795_v7 = vpop.permute.xlu1 %794 }
 0x3d5   : > { %v810_v14 = vsel %vm808_vm11, %v807_v12, %v795_v7 }
 0x401   : > { %v801_v8 = vpop.permute.xlu0 %800 }
 0x402   : > { %v812_v11 = vsel %vm811_vm12, %v809_v6, %v801_v8 }
 0x403   : > { %814 = vst [vmem:[%s358_s18] sm:$0xff] %v812_v11 }
 0x405   : > { %v803_v15 = vpop.permute.xlu1 %802 }
 0x406   : > { %v813_v16 = vsel %vm811_vm12, %v810_v14, %v803_v15 }
 0x407   : > { %815 = vst [vmem:[%s358_s18 + $0x8] sm:$0xff] %v813_v16 }
 0x408 PF: > { %s20_s29 = sadd.s32 1, %s1016_s29  }
 0x409   : > { %p17_p4 = scmp.ge.s32.totalorder %s20_s29, 4  }
 0x40b   :  { %19 = sbr.rel (!%p17_p4) target bundleno = 3 (0x3), region = 91 }

// kernel: bidaf_selfatt_forward.22
= control target key start
LH: loop header
LB: loop body
LE: loop exit
PB: predicated region body
PF: predicated region fallthrough
CT: control target
= control target key end

     0   :  { %s1020_s24 = smov 0   ;;  %s1314_s0 = inlined_call_operand.vmem [shape: f32[2,16,128], index: 0, kind: input, shape index: {}]   ;;  %s1315_s1 = inlined_call_operand.vmem [shape: f32[2,1,16], index: 1, kind: input, shape index: {}]   ;;  %s1316_s2 = inlined_call_operand.vmem [shape: f32[128,16], index: 2, kind: input, shape index: {}]   ;;  %s1317_s3 = inlined_call_operand.vmem [shape: f32[128,16], index: 3, kind: input, shape index: {}]   ;;  %s1318_s4 = inlined_call_operand.vmem [shape: f32[128,128], index: 4, kind: input, shape index: {}]   ;;  %s1319_s5 = inlined_call_operand.vmem [shape: f32[128,128], index: 5, kind: input, shape index: {}]   ;;  %s1320_s6 = inlined_call_operand.vmem [shape: f32[1,128], index: 6, kind: input, shape index: {}]   ;;  %s1321_s7 = inlined_call_operand.vmem [shape: f32[2,16,128], index: 7, kind: output, shape index: {}]  }
   0x1 LB: > { %s784_s25 = sadd.s32 4294967295, %s975_s24   ;;  %p788_p0 = scmp.ge.s32.totalorder %s975_s24, 1  ;;  %s975_s24 = sphi %s1020_s24, %s17_s24  }
   0x2   : > { %p245_p1 = scmp.lt.s32.totalorder %s975_s24, 3 }
   0x4   : > { %p246_p2 = pnand %p788_p0, %p245_p1 }
   0x5   : > { %p280_p3 = scmp.lt.s32.totalorder (!%p246_p2), %s784_s25, 1 }
   0x6   : > { %249 = sbr.rel (%p246_p2) target bundleno = 1217 (0x4c1), region = 48 }
   0xb   : > { %v379_v0 = vld [vmem:[%s1317_s3 + $0x70] sm:$0xff]  ;;  %v380_v1 = vld [vmem:[%s1317_s3 + $0x78] sm:$0xff]  ;;  %v977_v3 = vmov 0.0   ;;  %v377_v6 = vld [vmem:[%s1317_s3 + $0x60] sm:$0xff]  ;;  %vm978_vm0 = vmmov 0   ;;  %s1323_s25 = smov (!%p280_p3, %s784_s25), 1 }
   0xc   : > { %v311_v2 = vld [vmem:[%s1316_s2 + $0x70] sm:$0xff]  ;;  %862 = vmatprep.subr.bf16.mxu1 %v977_v3  ;;  %v388_v4 = vpack.c.bf16 %v380_v1, %v379_v0  ;;  %842 = vmatprep.subr.bf16.mxu0 %v977_v3  ;;  %v312_v5 = vld [vmem:[%s1316_s2 + $0x78] sm:$0xff]  ;;  %v378_v7 = vld [vmem:[%s1317_s3 + $0x68] sm:$0xff]  ;;  %s800_s17 = sshll.u32 %s1323_s25, 4  ;;  %vm434_vm1 = vcmask 130048   ;;  %s287_s10 = scalar_lea.vmem %s1315_s1, %s1323_s25 }
   0xd   : > { %v321_v8 = vpack.c.bf16 %v312_v5, %v311_v2  ;;  %v309_v9 = vld [vmem:[%s1316_s2 + $0x60] sm:$0xff]  ;;  %v310_v10 = vld [vmem:[%s1316_s2 + $0x68] sm:$0xff]  ;;  %878 = vmatprep.mubr.msk.bf16.mxu1 %vm978_vm0, %v977_v3  ;;  %858 = vmatprep.mubr.msk.bf16.mxu0 %vm978_vm0, %v977_v3  ;;  %v387_v11 = vpack.c.bf16 %v378_v7, %v377_v6  ;;  %v375_v13 = vld [vmem:[%s1317_s3 + $0x50] sm:$0xff]  ;;  %s284_s26 = scalar_lea.vmem %s1314_s0, %s800_s17  ;;  %s292_s20 = scalar_lea.vmem %s1321_s7, %s800_s17 }
   0xe   : > { %863 = vmatpush3.bf16.msra.mxu1 %v388_v4  ;;  %v320_v12 = vpack.c.bf16 %v310_v10, %v309_v9  ;;  %v376_v14 = vld [vmem:[%s1317_s3 + $0x58] sm:$0xff]  ;;  %v307_v15 = vld [vmem:[%s1316_s2 + $0x50] sm:$0xff]  ;;  %v373_v19 = vld [vmem:[%s1317_s3 + $0x40] sm:$0xff]  ;;  %v484_v4 = vlaneseq }
   0xf   : > { %843 = vmatpush3.bf16.msra.mxu0 %v321_v8  ;;  %864 = vmatprep.subr.bf16.mxu1 %v977_v3  ;;  %v308_v16 = vld [vmem:[%s1316_s2 + $0x58] sm:$0xff]  ;;  %v386_v17 = vpack.c.bf16 %v376_v14, %v375_v13  ;;  %v374_v20 = vld [vmem:[%s1317_s3 + $0x48] sm:$0xff]  ;;  %v305_v21 = vld [vmem:[%s1316_s2 + $0x40] sm:$0xff]  ;;  %v979_v8 = vmov 0  }
  0x10   : > { %844 = vmatprep.subr.bf16.mxu0 %v977_v3  ;;  %v319_v18 = vpack.c.bf16 %v308_v16, %v307_v15  ;;  %v306_v22 = vld [vmem:[%s1316_s2 + $0x48] sm:$0xff]  ;;  %v385_v23 = vpack.c.bf16 %v374_v20, %v373_v19  ;;  %v371_v25 = vld [vmem:[%s1317_s3 + $0x30] sm:$0xff]  ;;  %v372_v26 = vld [vmem:[%s1317_s3 + $0x38] sm:$0xff]  ;;  %v485_v6 = vshrl.u32 %v484_v4, 7 }
  0x11   : > { %v318_v24 = vpack.c.bf16 %v306_v22, %v305_v21  ;;  %v303_v27 = vld [vmem:[%s1316_s2 + $0x30] sm:$0xff]  ;;  %v304_v28 = vld [vmem:[%s1316_s2 + $0x38] sm:$0xff]  ;;  %v384_v29 = vpack.c.bf16 %v372_v26, %v371_v25  ;;  %v369_v31 = vld [vmem:[%s1317_s3 + $0x20] sm:$0xff] }
  0x12   : > { %865 = vmatpush3.bf16.msra.mxu1 %v387_v11  ;;  %v317_v30 = vpack.c.bf16 %v304_v28, %v303_v27  ;;  %v370_v32 = vld [vmem:[%s1317_s3 + $0x28] sm:$0xff]  ;;  %v301_v33 = vld [vmem:[%s1316_s2 + $0x20] sm:$0xff]  ;;  %v367_v37 = vld [vmem:[%s1317_s3 + $0x10] sm:$0xff]  ;;  %v486_v7 = vsub.s32 0, %v485_v6 }
  0x13   : > { %845 = vmatpush3.bf16.msra.mxu0 %v320_v12  ;;  %866 = vmatprep.subr.bf16.mxu1 %v977_v3  ;;  %v302_v34 = vld [vmem:[%s1316_s2 + $0x28] sm:$0xff]  ;;  %v383_v35 = vpack.c.bf16 %v370_v32, %v369_v31  ;;  %v368_v38 = vld [vmem:[%s1317_s3 + $0x18] sm:$0xff]  ;;  %v299_v39 = vld [vmem:[%s1316_s2 + $0x10] sm:$0xff] }
  0x14   : > { %846 = vmatprep.subr.bf16.mxu0 %v977_v3  ;;  %v316_v36 = vpack.c.bf16 %v302_v34, %v301_v33  ;;  %v300_v40 = vld [vmem:[%s1316_s2 + $0x18] sm:$0xff]  ;;  %v382_v41 = vpack.c.bf16 %v368_v38, %v367_v37  ;;  %v365_v43 = vld [vmem:[%s1317_s3] sm:$0xff]  ;;  %v366_v44 = vld [vmem:[%s1317_s3 + $0x8] sm:$0xff] }
  0x15   : > { %v315_v42 = vpack.c.bf16 %v300_v40, %v299_v39  ;;  %v297_v45 = vld [vmem:[%s1316_s2] sm:$0xff]  ;;  %v298_v46 = vld [vmem:[%s1316_s2 + $0x8] sm:$0xff]  ;;  %v381_v47 = vpack.c.bf16 %v366_v44, %v365_v43  ;;  %v564_v6 = vld [vmem:[%s1318_s4 + $0x30] sm:$0xff] }
  0x16   : > { %867 = vmatpush3.bf16.msra.mxu1 %v386_v17  ;;  %v1154_v48 = vld [vmem:[%s284_s26] sm:$0xff]  ;;  %v1156_v49 = vld [vmem:[%s284_s26 + $0x8] sm:$0xff]  ;;  %v314_v50 = vpack.c.bf16 %v298_v46, %v297_v45 }
  0x17   : > { %847 = vmatpush3.bf16.msra.mxu0 %v319_v18  ;;  %868 = vmatprep.subr.bf16.mxu1 %v977_v3  ;;  %v1162_v51 = vpack.c.bf16 %v1156_v49, %v1154_v48  ;;  %v296_v5 = vld [vmem:[%s287_s10] sm:$0x1]  ;;  %v595_v33 = vld [vmem:[%s1319_s5 + $0x68] sm:$0xff] }
  0x18   : > { %848 = vmatprep.subr.bf16.mxu0 %v977_v3  ;;  %vm482_vm2 = vcmp.gt.f32.partialorder %v296_v5, 0.0  ;;  %v594_v32 = vld [vmem:[%s1319_s5 + $0x60] sm:$0xff]  ;;  %v591_v39 = vld [vmem:[%s1319_s5 + $0x48] sm:$0xff] }
  0x19   : > { %v483_v9 = vsel %vm482_vm2, 1, %v979_v8  ;;  %v605_v34 = vpack.c.bf16 %v595_v33, %v594_v32  ;;  %v590_v38 = vld [vmem:[%s1319_s5 + $0x40] sm:$0xff]  ;;  %v587_v45 = vld [vmem:[%s1319_s5 + $0x28] sm:$0xff] }
  0x1a   : > { %869 = vmatpush3.bf16.msra.mxu1 %v385_v23  ;;  %v487_v10 = vrot.slane %v483_v9, %v486_v7  ;;  %v603_v40 = vpack.c.bf16 %v591_v39, %v590_v38  ;;  %v586_v44 = vld [vmem:[%s1319_s5 + $0x20] sm:$0xff]  ;;  %v567_v4 = vld [vmem:[%s1318_s4 + $0x48] sm:$0xff]  ;;  %v565_v7 = vld [vmem:[%s1318_s4 + $0x38] sm:$0xff] }
  0x1b   : > { %849 = vmatpush3.bf16.msra.mxu0 %v318_v24  ;;  %870 = vmatprep.subr.bf16.mxu1 %v977_v3  ;;  %v601_v46 = vpack.c.bf16 %v587_v45, %v586_v44  ;;  %v577_v8 = vpack.c.bf16 %v565_v7, %v564_v6  ;;  %v562_v9 = vld [vmem:[%s1318_s4 + $0x20] sm:$0xff] }
  0x1c   : > { %850 = vmatprep.subr.bf16.mxu0 %v977_v3  ;;  %vm488_vm3 = vcmp.eq.s32.totalorder %v487_v10, 1  ;;  %v563_v10 = vld [vmem:[%s1318_s4 + $0x28] sm:$0xff]  ;;  %v795_v32 = vld [vmem:[%s1320_s6] ss:$0 sm:$0xff] }
  0x1e   : > { %871 = vmatpush3.bf16.msra.mxu1 %v384_v29  ;;  %v596_v29 = vld [vmem:[%s1319_s5 + $0x70] sm:$0xff] }
  0x1f   : > { %851 = vmatpush3.bf16.msra.mxu0 %v317_v30  ;;  %872 = vmatprep.subr.bf16.mxu1 %v977_v3  ;;  %v597_v30 = vld [vmem:[%s1319_s5 + $0x78] sm:$0xff] }
  0x20   : > { %852 = vmatprep.subr.bf16.mxu0 %v977_v3  ;;  %v606_v31 = vpack.c.bf16 %v597_v30, %v596_v29 }
  0x22   : > { %873 = vmatpush3.bf16.msra.mxu1 %v383_v35  ;;  %v592_v35 = vld [vmem:[%s1319_s5 + $0x50] sm:$0xff] }
  0x23   : > { %853 = vmatpush3.bf16.msra.mxu0 %v316_v36  ;;  %874 = vmatprep.subr.bf16.mxu1 %v977_v3  ;;  %v593_v36 = vld [vmem:[%s1319_s5 + $0x58] sm:$0xff] }
  0x24   : > { %854 = vmatprep.subr.bf16.mxu0 %v977_v3  ;;  %v604_v37 = vpack.c.bf16 %v593_v36, %v592_v35 }
  0x26   : > { %875 = vmatpush3.bf16.msra.mxu1 %v382_v41  ;;  %v588_v41 = vld [vmem:[%s1319_s5 + $0x30] sm:$0xff] }
  0x27   : > { %855 = vmatpush3.bf16.msra.mxu0 %v315_v42  ;;  %876 = vmatprep.subr.bf16.mxu1 %v977_v3  ;;  %v589_v42 = vld [vmem:[%s1319_s5 + $0x38] sm:$0xff] }
  0x28   : > { %856 = vmatprep.subr.bf16.mxu0 %v977_v3  ;;  %v602_v43 = vpack.c.bf16 %v589_v42, %v588_v41 }
  0x2a   : > { %877 = vmatpush3.bf16.msra.mxu1 %v381_v47 }
  0x2b   : > { %857 = vmatpush3.bf16.msra.mxu0 %v314_v50  ;;  %888 = vmatprep.subr.bf16.mxu1 %v977_v3 }
  0x2c   : > { %882 = vmatprep.subr.bf16.mxu0 %v977_v3 }
  0x2d   : > { %879 = vmatmul.mubr.bf16.vlgmr.msra.gmra.mxu1 %v1162_v51 }
  0x2e   : > { %859 = vmatmul.mubr.bf16.vlgmr.msra.gmra.mxu0 %v1162_v51  ;;  %889 = vmatpush3.bf16.msra.mxu1 %v1162_v51 }
  0x2f   : > { %884 = vmatprep.mubr.msk.bf16.mxu0 %vm978_vm0, %v977_v3  ;;  %890 = vmatprep.mubr.msk.bf16.mxu1 %vm978_vm0, %v977_v3 }
  0x30   : > { %914 = vmatprep.subr.bf16.mxu1 %v977_v3 }
  0xed   : > { %v423_v52 = vpop.f32.mrf.mxu1 }
  0xee   : > { %v356_v53 = vpop.f32.mrf.mxu0  ;;  %945 = vtanh.f32 %v423_v52 }
  0xef   : > { %v880_v54 = vpop.f32.mrf.mxu1 }
  0xf0   : > { %v860_v55 = vpop.f32.mrf.mxu0  ;;  %v573_v54 = vld [vmem:[%s1318_s4 + $0x78] sm:$0xff] }
  0xf1   : > { %v426_v56 = vpop.f32.mrf.mxu1 }
  0xf2   : > { %947 = vtanh.f32 %v426_v56  ;;  %v359_v57 = vpop.f32.mrf.mxu0 }
  0xf3   : > { %v881_v58 = vpop.f32.mrf.mxu1  ;;  %949 = vtanh.f32 %v356_v53  ;;  %v572_v53 = vld [vmem:[%s1318_s4 + $0x70] sm:$0xff] }
  0xf4   : > { %v861_v59 = vpop.f32.mrf.mxu0  ;;  %951 = vtanh.f32 %v359_v57  ;;  %v581_v58 = vpack.c.bf16 %v573_v54, %v572_v53 }
  0xfb   : > { %v946_v60 = vpop.eup %945 }
  0xff   : > { %v948_v61 = vpop.eup %947 }
 0x100   : > { %v433_v62 = vpack.c.bf16 %v948_v61, %v946_v60  ;;  %v950_v0 = vpop.eup %949  ;;  %v570_v60 = vld [vmem:[%s1318_s4 + $0x60] sm:$0xff]  ;;  %v571_v61 = vld [vmem:[%s1318_s4 + $0x68] sm:$0xff] }
 0x101   : > { %v952_v1 = vpop.eup %951 }
 0x102   : > { %v439_v63 = vsel %vm434_vm1, %v433_v62, 0  ;;  %v432_v2 = vpack.c.bf16 %v952_v1, %v950_v0  ;;  %v580_v62 = vpack.c.bf16 %v571_v61, %v570_v60  ;;  %v569_v0 = vld [vmem:[%s1318_s4 + $0x58] sm:$0xff] }
 0x103   : > { %883 = vmatpush3.bf16.xpose.msra.mxu0 %v439_v63  ;;  %v568_v63 = vld [vmem:[%s1318_s4 + $0x50] sm:$0xff] }
 0x104   : > { %894 = vmatprep.subr.bf16.mxu0 %v977_v3  ;;  %v579_v1 = vpack.c.bf16 %v569_v0, %v568_v63 }
 0x10a   : > { %885 = vmatmul.mubr.msk.bf16.vlgmr.msra.gmra.mxu0 %vm434_vm1, %v432_v2  ;;  %v566_v2 = vld [vmem:[%s1318_s4 + $0x40] sm:$0xff] }
 0x10b   : > { %910 = vmatprep.mubr.msk.bf16.mxu0 %vm978_vm0, %v977_v3  ;;  %895 = vmatpush3.bf16.msra.mxu0 %v606_v31  ;;  %v578_v5 = vpack.c.bf16 %v567_v4, %v566_v2 }
 0x10c   : > { %896 = vmatprep.subr.bf16.mxu0 %v977_v3 }
 0x10f   : > { %897 = vmatpush3.bf16.msra.mxu0 %v605_v34 }
 0x110   : > { %898 = vmatprep.subr.bf16.mxu0 %v977_v3 }
 0x113   : > { %899 = vmatpush3.bf16.msra.mxu0 %v604_v37 }
 0x114   : > { %900 = vmatprep.subr.bf16.mxu0 %v977_v3 }
 0x117   : > { %901 = vmatpush3.bf16.msra.mxu0 %v603_v40 }
 0x118   : > { %902 = vmatprep.subr.bf16.mxu0 %v977_v3 }
 0x11b   : > { %903 = vmatpush3.bf16.msra.mxu0 %v602_v43 }
 0x11c   : > { %904 = vmatprep.subr.bf16.mxu0 %v977_v3 }
 0x11f   : > { %905 = vmatpush3.bf16.msra.mxu0 %v601_v46 }
 0x120   : > { %906 = vmatprep.subr.bf16.mxu0 %v977_v3 }
 0x1ca   : > { %v475_v11 = vpop.f32.mrf.mxu0 }
 0x1cb   : > { %v489_v12 = vsel %vm488_vm3, %v475_v11, -1e+30  ;;  %v576_v11 = vpack.c.bf16 %v563_v10, %v562_v9 }
 0x1cc   : > { %v886_v13 = vpop.f32.mrf.mxu0  ;;  %v491_v14 = vsel %vm434_vm1, %v489_v12, -inf }
 0x1cd   : > { %492 = vmax.xlane.f32.xlu0 %v491_v14  ;;  %v561_v13 = vld [vmem:[%s1318_s4 + $0x18] sm:$0xff] }
 0x1ce   : > { %v478_v15 = vpop.f32.mrf.mxu0 }
 0x1cf   : > { %v490_v16 = vsel %vm488_vm3, %v478_v15, -1e+30  ;;  %v558_v15 = vld [vmem:[%s1318_s4] sm:$0xff] }
 0x1d0   : > { %v887_v17 = vpop.f32.mrf.mxu0  ;;  %v494_v18 = vsel %vm434_vm1, %v490_v16, -inf }
 0x1d1   : > { %495 = vmax.xlane.f32.xlu0 %v494_v18  ;;  %v584_v18 = vld [vmem:[%s1319_s5 + $0x10] sm:$0xff] }
 0x256   : > { %v493_v19 = vpop.xlane.xlu0 %492 }
 0x257   : > { %v497_v20 = vsub.f32 %v489_v12, %v493_v19  ;;  %v560_v12 = vld [vmem:[%s1318_s4 + $0x10] sm:$0xff]  ;;  %v585_v19 = vld [vmem:[%s1319_s5 + $0x18] sm:$0xff] }
 0x258   : > { %v575_v14 = vpack.c.bf16 %v561_v13, %v560_v12 }
 0x259   : > { %v499_v21 = vmul.f32 1.442695, %v497_v20  ;;  %v600_v20 = vpack.c.bf16 %v585_v19, %v584_v18 }
 0x25a   : > { %v496_v22 = vpop.xlane.xlu0 %495 }
 0x25b   : > { %953 = vpow2.f32 %v499_v21  ;;  %v498_v23 = vsub.f32 %v490_v16, %v496_v22  ;;  %v559_v16 = vld [vmem:[%s1318_s4 + $0x8] sm:$0xff]  ;;  %907 = vmatpush3.bf16.msra.mxu0 %v600_v20  ;;  %v582_v21 = vld [vmem:[%s1319_s5] sm:$0xff] }
 0x25c   : > { %v574_v17 = vpack.c.bf16 %v559_v16, %v558_v15  ;;  %908 = vmatprep.subr.bf16.mxu0 %v977_v3 }
 0x25d   : > { %v501_v24 = vmul.f32 1.442695, %v498_v23 }
 0x25f   : > { %955 = vpow2.f32 %v501_v24 }
 0x268   : > { %v954_v25 = vpop.eup %953 }
 0x269   : > { %v503_v26 = vsel %vm434_vm1, %v954_v25, 0.0 }
 0x26a   : > { %504 = vadd.xlane.f32.xlu1 %v503_v26 }
 0x26c   : > { %v956_v27 = vpop.eup %955 }
 0x26d   : > { %v506_v28 = vsel %vm434_vm1, %v956_v27, 0.0 }
 0x26e   : > { %507 = vadd.xlane.f32.xlu1 %v506_v28 }
 0x2f3   : > { %v505_v47 = vpop.xlane.xlu1 %504 }
 0x2f4   : > { %957 = vrcp.f32 %v505_v47 }
 0x2f7   : > { %v508_v50 = vpop.xlane.xlu1 %507 }
 0x2f8   : > { %959 = vrcp.f32 %v508_v50 }
 0x301   : > { %v958_v52 = vpop.eup %957 }
 0x302   : > { %v511_v57 = vmul.f32 %v958_v52, %v954_v25 }
 0x305   : > { %v960_v55 = vpop.eup %959 }
 0x306   : > { %v512_v56 = vmul.f32 %v960_v55, %v956_v27 }
 0x308   : > { %v513_v59 = vpack.c.bf16 %v512_v56, %v511_v57 }
 0x30a   : > { %891 = vmatmul.mubr.msk.bf16.vlgmr.msra.gmra.mxu1 %vm434_vm1, %v513_v59 }
 0x30b   : > { %915 = vmatpush3.bf16.msra.mxu1 %v581_v58  ;;  %930 = vmatprep.mubr.msk.bf16.mxu1 %vm978_vm0, %v977_v3 }
 0x30c   : > { %916 = vmatprep.subr.bf16.mxu1 %v977_v3 }
 0x30f   : > { %917 = vmatpush3.bf16.msra.mxu1 %v580_v62 }
 0x310   : > { %918 = vmatprep.subr.bf16.mxu1 %v977_v3 }
 0x313   : > { %919 = vmatpush3.bf16.msra.mxu1 %v579_v1 }
 0x314   : > { %920 = vmatprep.subr.bf16.mxu1 %v977_v3 }
 0x317   : > { %921 = vmatpush3.bf16.msra.mxu1 %v578_v5 }
 0x318   : > { %922 = vmatprep.subr.bf16.mxu1 %v977_v3 }
 0x31b   : > { %923 = vmatpush3.bf16.msra.mxu1 %v577_v8 }
 0x31c   : > { %924 = vmatprep.subr.bf16.mxu1 %v977_v3 }
 0x31f   : > { %925 = vmatpush3.bf16.msra.mxu1 %v576_v11 }
 0x320   : > { %926 = vmatprep.subr.bf16.mxu1 %v977_v3 }
 0x323   : > { %927 = vmatpush3.bf16.msra.mxu1 %v575_v14 }
 0x324   : > { %928 = vmatprep.subr.bf16.mxu1 %v977_v3 }
 0x327   : > { %929 = vmatpush3.bf16.msra.mxu1 %v574_v17 }
 0x32a   : > { %931 = vmatmul.mubr.bf16.vlgmr.msra.gmra.mxu1 %v1162_v51  ;;  %v583_v51 = vld [vmem:[%s1319_s5 + $0x8] sm:$0xff] }
 0x32b   : > { %v599_v22 = vpack.c.bf16 %v583_v51, %v582_v21 }
 0x32d   : > { %909 = vmatpush3.bf16.msra.mxu0 %v599_v22 }
 0x3ca   : > { %v551_v23 = vpop.f32.mrf.mxu1 }
 0x3cc   : > { %v892_v24 = vpop.f32.mrf.mxu1 }
 0x3ce   : > { %v554_v25 = vpop.f32.mrf.mxu1 }
 0x3cf   : > { %v598_v26 = vpack.c.bf16 %v554_v25, %v551_v23 }
 0x3d0   : > { %v893_v27 = vpop.f32.mrf.mxu1 }
 0x3d1   : > { %911 = vmatmul.mubr.bf16.vlgmr.msra.gmra.mxu0 %v598_v26 }
 0x3ea   : > { %v682_v28 = vpop.f32.mrf.mxu1 }
 0x3ec   : > { %v932_v29 = vpop.f32.mrf.mxu1 }
 0x3ee   : > { %v685_v30 = vpop.f32.mrf.mxu1 }
 0x3f0   : > { %v933_v3 = vpop.f32.mrf.mxu1 }
 0x491   : > { %v641_v31 = vpop.f32.mrf.mxu0 }
 0x492   : > { %v683_v33 = vadd.f32 %v682_v28, %v641_v31 }
 0x493   : > { %v912_v34 = vpop.f32.mrf.mxu0 }
 0x494   : > { %v696_v35 = vadd.f32 %v795_v32, %v683_v33 }
 0x495   : > { %v644_v36 = vpop.f32.mrf.mxu0 }
 0x496   : > { %v796_v37 = vmul.f32 -1.442695, %v696_v35  ;;  %v686_v38 = vadd.f32 %v685_v30, %v644_v36 }
 0x497   : > { %v913_v39 = vpop.f32.mrf.mxu0 }
 0x498   : > { %961 = vpow2.f32 %v796_v37  ;;  %v697_v40 = vadd.f32 %v795_v32, %v686_v38 }
 0x49a   : > { %v797_v41 = vmul.f32 -1.442695, %v697_v40 }
 0x49c   : > { %963 = vpow2.f32 %v797_v41 }
 0x4a5   : > { %v962_v42 = vpop.eup %961 }
 0x4a6   : > { %v704_v43 = vadd.f32 1.0, %v962_v42 }
 0x4a8   : > { %965 = vrcp.f32 %v704_v43 }
 0x4a9   : > { %v964_v44 = vpop.eup %963 }
 0x4aa   : > { %v705_v45 = vadd.f32 1.0, %v964_v44 }
 0x4ac   : > { %967 = vrcp.f32 %v705_v45 }
 0x4b5   : > { %v966_v46 = vpop.eup %965 }
 0x4b6   : > { %v712_v47 = vsub.f32 1.0, %v966_v46  ;;  %v710_v50 = vmul.f32 %v966_v46, %v551_v23 }
 0x4b8   : > { %v714_v52 = vmul.f32 %v712_v47, %v1154_v48 }
 0x4b9   : > { %v968_v53 = vpop.eup %967 }
 0x4ba   : > { %v716_v54 = vadd.f32 %v714_v52, %v710_v50  ;;  %v713_v55 = vsub.f32 1.0, %v968_v53  ;;  %v711_v56 = vmul.f32 %v968_v53, %v554_v25 }
 0x4bc   : > { %718 = vst [vmem:[%s292_s20] sm:$0xff] %v716_v54  ;;  %v715_v57 = vmul.f32 %v713_v55, %v1156_v49 }
 0x4be   : > { %v717_v58 = vadd.f32 %v715_v57, %v711_v56 }
 0x4c0   : > { %719 = vst [vmem:[%s292_s20 + $0x8] sm:$0xff] %v717_v58 }
 0x4c1 PF: > { %s17_s24 = sadd.s32 1, %s975_s24  }
 0x4c2   : > { %p14_p4 = scmp.ge.s32.totalorder %s17_s24, 4  }
 0x4c4   :  { %16 = sbr.rel (!%p14_p4) target bundleno = 1 (0x1), region = 81 }

// kernel: bidaf_selfatt_forward.29
= control target key start
LH: loop header
LB: loop body
LE: loop exit
PB: predicated region body
PF: predicated region fallthrough
CT: control target
= control target key end

     0   :  { %s666_s24 = smov 0   ;;  %s709_s0 = inlined_call_operand.vmem [shape: f32[2,16,128], index: 0, kind: input, shape index: {}]   ;;  %s710_s1 = inlined_call_operand.vmem [shape: f32[2,16,32], index: 1, kind: input, shape index: {}]   ;;  %s711_s2 = inlined_call_operand.vmem [shape: f32[2,16,32], index: 2, kind: input, shape index: {}]   ;;  %s712_s3 = inlined_call_operand.vmem [shape: f32[2,1,16], index: 3, kind: input, shape index: {}]   ;;  %s713_s4 = inlined_call_operand.vmem [shape: f32[2,128], index: 4, kind: input, shape index: {}]   ;;  %s714_s5 = inlined_call_operand.vmem [shape: f32[2,64], index: 5, kind: input, shape index: {}]   ;;  %s715_s6 = inlined_call_operand.vmem [shape: f32[2,1], index: 6, kind: input, shape index: {}]   ;;  %s716_s7 = inlined_call_operand.vmem [shape: f32[2,2,16], index: 7, kind: output, shape index: {}]  }
   0x1 LB: > { %s558_s25 = sadd.s32 4294967295, %s620_s24   ;;  %p562_p0 = scmp.ge.s32.totalorder %s620_s24, 1  ;;  %s620_s24 = sphi %s666_s24, %s17_s24  }
   0x2   : > { %p265_p1 = scmp.lt.s32.totalorder %s620_s24, 3 }
   0x4   : > { %p266_p2 = pnand %p562_p0, %p265_p1 }
   0x5   : > { %p309_p3 = scmp.lt.s32.totalorder (!%p266_p2), %s558_s25, 1  ;;  %s624_s10 = smov (!%p266_p2), 32  }
   0x6   : > { %269 = sbr.rel (%p266_p2) target bundleno = 658 (0x292), region = 48 }
   0xb   : > { %v622_v0 = vmov 0.0   ;;  %s718_s25 = smov (!%p309_p3, %s558_s25), 1  ;;  %vm623_vm0 = vmmov 0   ;;  %v350_v7 = vld [vmem:[%s713_s4] sm:$0x3]  ;;  %v625_v8 = vmov 0   ;;  %v452_v26 = vlaneseq }
   0xc   : > { %586 = vmatprep.subr.bf16.mxu1 %v622_v0  ;;  %580 = vmatprep.subr.bf16.mxu0 %v622_v0  ;;  %s573_s26 = sshll.u32 %s718_s25, 4  ;;  %v443_v9 = vld [vmem:[%s715_s6] sm:$0x3]  ;;  %v351_v10 = vpack.c.bf16 %v350_v7, %v350_v7  ;;  %vm346_vm1 = vcmask 261120   ;;  %vm356_vm2 = vcmask 523264   ;;  %s326_s22 = scalar_lea.vmem %s712_s3, %s718_s25  ;;  %vm458_vm5 = vcmask 123904  }
   0xd   : > { %588 = vmatprep.mubr.msk.bf16.mxu1 %vm623_vm0, %v622_v0  ;;  %582 = vmatprep.mubr.msk.bf16.mxu0 %vm623_vm0, %v622_v0  ;;  %s323_s29 = scalar_lea.vmem %s711_s2, %s573_s26  ;;  %s313_s9 = scalar_lea.vmem %s709_s0, %s573_s26  ;;  %v353_v20 = vld [vmem:[%s714_s5] sm:$0x3]  ;;  %v453_v28 = vshrl.u32 %v452_v26, 7 }
   0xe   : > { %v336_v1 = vld [vmem:[%s323_s29] sm:$0xff]  ;;  %v337_v2 = vld [vmem:[%s323_s29 + $0x8] sm:$0xff]  ;;  %609 = vset.pattern.permute.xlu0 %v625_v8  ;;  %s318_s17 = scalar_lea.vmem %s710_s1, %s573_s26  ;;  %v354_v21 = vpack.c.bf16 %v353_v20, %v353_v20  ;;  %s569_s23 = sshll.u32 %s718_s25, 1 }
   0xf   : > { %v332_v3 = vld [vmem:[%s313_s9] sm:$0xff]  ;;  %v604_v4 = vpack.i.bf16 %v337_v2, %v336_v1  ;;  %v333_v5 = vld [vmem:[%s313_s9 + $0x8] sm:$0xff]  ;;  %v454_v29 = vsub.s32 0, %v453_v28  ;;  %s330_s28 = scalar_lea.vmem %s716_s7, %s569_s23 }
  0x10   : > { %v352_v6 = vpack.c.bf16 %v333_v5, %v332_v3  ;;  %v334_v12 = vld [vmem:[%s318_s17] sm:$0xff]  ;;  %v335_v13 = vld [vmem:[%s318_s17 + $0x8] sm:$0xff] }
  0x11   : > { %605 = vrot.lane.b32.xlu0 %v604_v4, %s624_s10  ;;  %v349_v27 = vld [vmem:[%s326_s22] sm:$0x1] }
  0x12   : > { %587 = vmatpush3.bf16.xpose.msra.mxu1 %v352_v6  ;;  %vm450_vm3 = vcmp.gt.f32.partialorder %v349_v27, 0.0 }
  0x13   : > { %v451_v30 = vsel %vm450_vm3, 1, %v625_v8 }
  0x14   : > { %v455_v31 = vrot.slane %v451_v30, %v454_v29 }
  0x15   : > { %446 = vperm.xlu0 %609, %v443_v9  }
  0x16   : > { %vm456_vm4 = vcmp.eq.s32.totalorder %v455_v31, 1 }
  0x19   : > { %589 = vmatmul.mubr.bf16.vlgmr.msra.gmra.mxu1 %v351_v10 }
  0x83   : > { %v606_v11 = vpop.permute.xlu0 %605 }
  0x84   : > { %v608_v14 = vunpack.i.h.bf16 %v606_v11  ;;  %v607_v15 = vunpack.i.l.bf16 %v606_v11 }
  0x86   : > { %v347_v16 = vsel %vm346_vm1, %v334_v12, %v607_v15  ;;  %v348_v17 = vsel %vm346_vm1, %v335_v13, %v608_v14 }
  0x87   : > { %v355_v18 = vpack.c.bf16 %v348_v17, %v347_v16 }
  0x89   : > { %v361_v19 = vsel %vm356_vm2, %v355_v18, 0 }
  0x8a   : > { %581 = vmatpush3.bf16.xpose.msra.mxu0 %v361_v19 }
  0x90   : > { %v447_v33 = vpop.permute.xlu0 %446 }
  0x91   : > { %583 = vmatmul.mubr.msk.bf16.vlgmr.msra.gmra.mxu0 %vm356_vm2, %v354_v21 }
  0xd9   : > { %v437_v22 = vpop.f32.mrf.mxu1 }
  0xdb   : > { %v590_v23 = vpop.f32.mrf.mxu1 }
  0xdd   : > { %v440_v24 = vpop.f32.mrf.mxu1 }
  0xdf   : > { %v591_v25 = vpop.f32.mrf.mxu1 }
 0x151   : > { %v397_v32 = vpop.f32.mrf.mxu0 }
 0x152   : > { %v438_v34 = vadd.f32 %v437_v22, %v397_v32 }
 0x153   : > { %v584_v35 = vpop.f32.mrf.mxu0 }
 0x154   : > { %v449_v36 = vadd.f32 %v447_v33, %v438_v34 }
 0x155   : > { %v400_v37 = vpop.f32.mrf.mxu0 }
 0x156   : > { %v457_v38 = vsel %vm456_vm4, %v449_v36, -1e+30 }
 0x157   : > { %v585_v39 = vpop.f32.mrf.mxu0  ;;  %v459_v40 = vsel %vm458_vm5, %v457_v38, -inf }
 0x158   : > { %460 = vmax.xlane.f32.xlu1 %v459_v40 }
 0x1e1   : > { %v461_v41 = vpop.xlane.xlu1 %460 }
 0x1e2   : > { %v462_v42 = vsub.f32 %v457_v38, %v461_v41 }
 0x1e4   : > { %v463_v43 = vmul.f32 1.442695, %v462_v42 }
 0x1e6   : > { %610 = vpow2.f32 %v463_v43 }
 0x1f3   : > { %v611_v44 = vpop.eup %610 }
 0x1f4   : > { %v465_v45 = vsel %vm458_vm5, %v611_v44, 0.0 }
 0x1f5   : > { %466 = vadd.xlane.f32.xlu1 %v465_v45 }
 0x27e   : > { %v467_v46 = vpop.xlane.xlu1 %466 }
 0x27f   : > { %612 = vlog2.f32 %v467_v46 }
 0x28c   : > { %v613_v47 = vpop.eup %612 }
 0x28d   : > { %v469_v48 = vmul.f32 0.6931472, %v613_v47 }
 0x28f   : > { %v470_v49 = vsub.f32 %v462_v42, %v469_v48 }
 0x291   : > { %471 = vst.msk [vmem:[%s330_s28] sm:$0x3] %vm458_vm5, %v470_v49 }
 0x292 PF: > { %s17_s24 = sadd.s32 1, %s620_s24  }
 0x293   : > { %p14_p4 = scmp.ge.s32.totalorder %s17_s24, 4  }
 0x295   :  { %16 = sbr.rel (!%p14_p4) target bundleno = 1 (0x1), region = 87 }

</bundles_post_ra>
